<compile_context>
chip_gen: v7x
topology: tpu7x:2x2x1
jax: 0.10.0
libtpu: 0.0.40
codegen_flags: <defaults>
</compile_context>

<pallas_src>
import functools

import jax
import jax.numpy as jnp
from jax.experimental import pallas as pl
from jax.experimental.pallas import tpu as pltpu


# ----------------------------------------------------------------------------
# helpers
# ----------------------------------------------------------------------------
def _rup(x, m):
    return (x + m - 1) // m * m


# ----------------------------------------------------------------------------
# Conv2d ('same', stride 1) Pallas kernel
#
# grid = (N, H, KH): one padded input row per step; kh (kernel row) is the
# reduction axis.  Per step the kernel accumulates KW small MXU dots
# (W, Cin) @ (Cin, Cout) into an f32 VMEM scratch accumulator.  Input and
# output blocks use full-extent last-two dims (exempt from the (8,128) rule),
# so small channel counts never get padded to 128 lanes in HBM.
# ----------------------------------------------------------------------------
def _conv_row_kernel(x_ref, w_ref, b_ref, o_ref, acc_ref, *, KW, W, relu):
    kh = pl.program_id(2)

    @pl.when(kh == 0)
    def _init():
        acc_ref[...] = jnp.zeros_like(acc_ref)

    # One padded input row: (Wp, Cin).  Cast once to f32 so the per-tap
    # sublane-offset slices operate on unpacked 32-bit data, then cast each
    # slice back to bf16 for the MXU (f32 accumulation via
    # preferred_element_type).
    row = x_ref[0, 0].astype(jnp.float32)
    for kw in range(KW):
        lhs = row[kw:kw + W, :].astype(jnp.bfloat16)            # (W, Cin)
        acc_ref[...] += jnp.dot(lhs, w_ref[0, kw],
                                preferred_element_type=jnp.float32)

    @pl.when(kh == pl.num_programs(2) - 1)
    def _finalize():
        y = acc_ref[...] + b_ref[...]                           # f32 epilogue
        if relu:
            y = jnp.maximum(y, 0.0)
        o_ref[0, 0] = y.astype(o_ref.dtype)


def conv2d_same(x, w, b, relu, out_dtype=jnp.bfloat16):
    """'same'-padded stride-1 conv (NHWC), bf16 operands, f32 accumulate."""
    N, H, W, Cin = x.shape
    KH, KW, _, Cout = w.shape
    ph, pw = KH // 2, KW // 2
    xp = jnp.pad(x.astype(jnp.bfloat16), ((0, 0), (ph, ph), (pw, pw), (0, 0)))
    Wp = W + 2 * pw
    b2 = b.astype(jnp.float32).reshape(1, Cout)

    cost = pl.CostEstimate(
        flops=2 * N * H * W * KH * KW * Cin * Cout,
        transcendentals=0,
        bytes_accessed=int(xp.size * 2 * KH + w.size * 2
                           + N * H * W * Cout * jnp.dtype(out_dtype).itemsize),
    )

    return pl.pallas_call(
        functools.partial(_conv_row_kernel, KW=KW, W=W, relu=relu),
        out_shape=jax.ShapeDtypeStruct((N, H, W, Cout), out_dtype),
        grid=(N, H, KH),
        in_specs=[
            # one padded input row per step; kh offsets the (block-size-1) row
            pl.BlockSpec((1, 1, Wp, Cin), lambda n, oh, kh: (n, oh + kh, 0, 0)),
            # one kernel-row slice of the weights per step
            pl.BlockSpec((1, KW, Cin, Cout), lambda n, oh, kh: (kh, 0, 0, 0)),
            # bias, resident for the whole grid
            pl.BlockSpec((1, Cout), lambda n, oh, kh: (0, 0)),
        ],
        out_specs=pl.BlockSpec((1, 1, W, Cout), lambda n, oh, kh: (n, oh, 0, 0)),
        scratch_shapes=[pltpu.VMEM((W, Cout), jnp.float32)],
        compiler_params=pltpu.CompilerParams(
            dimension_semantics=("parallel", "parallel", "arbitrary"),
            vmem_limit_bytes=32 * 1024 * 1024),
        cost_estimate=cost,
    )(xp, w.astype(jnp.bfloat16), b2)
    # TODO(synk): for very large images, widen the M dimension per MXU dot by
    # loading multi-row halo'd tiles (Element-indexed or manual DMA) instead
    # of one output row per grid step.


# ----------------------------------------------------------------------------
# 2x2 / stride-2 max pool: lane-dense 4-way elementwise max Pallas kernel
# ----------------------------------------------------------------------------
def _max4_kernel(a_ref, b_ref, c_ref, d_ref, o_ref):
    o_ref[...] = jnp.maximum(jnp.maximum(a_ref[...], b_ref[...]),
                             jnp.maximum(c_ref[...], d_ref[...]))


def maxpool2x2(x):
    N, H, W, C = x.shape
    Ho, Wo = H // 2, W // 2
    # TODO(synk): the four strided views are still materialized by XLA; a
    # fully fused variant would do the 2x2 reduction in-kernel from the
    # unsliced NHWC tensor.
    views = [x[:, 0::2, 0::2, :], x[:, 0::2, 1::2, :],
             x[:, 1::2, 0::2, :], x[:, 1::2, 1::2, :]]

    L = N * Ho * Wo * C
    LANES = 128
    rows = -(-L // LANES)
    tr = min(256, _rup(rows, 16))           # bf16 native sublane tile = 16
    rows_p = _rup(rows, tr)
    Lp = rows_p * LANES

    def flat(v):
        v = v.reshape(-1)
        if Lp != L:
            v = jnp.pad(v, (0, Lp - L))
        return v.reshape(rows_p, LANES)

    out = pl.pallas_call(
        _max4_kernel,
        out_shape=jax.ShapeDtypeStruct((rows_p, LANES), x.dtype),
        grid=(rows_p // tr,),
        in_specs=[pl.BlockSpec((tr, LANES), lambda i: (i, 0))] * 4,
        out_specs=pl.BlockSpec((tr, LANES), lambda i: (i, 0)),
        compiler_params=pltpu.CompilerParams(
            dimension_semantics=("parallel",),
            vmem_limit_bytes=32 * 1024 * 1024),
    )(*[flat(v) for v in views])
    return out.reshape(-1)[:L].reshape(N, Ho, Wo, C)


# ----------------------------------------------------------------------------
# UNet blocks built on the Pallas kernels
# ----------------------------------------------------------------------------
def double_conv(x, p):
    # BatchNorm (eval mode, default running stats) folds to identity.
    x = conv2d_same(x, p["w1"], p["b1"], relu=True)
    x = conv2d_same(x, p["w2"], p["b2"], relu=True)
    return x


def down_with_sc(x, p):
    skip = double_conv(x, p)
    return maxpool2x2(skip), skip


def up_with_sc(x, p, skip=None):
    if skip is not None:
        x = jnp.concatenate([x, skip], axis=-1)
    N, H, W, C = x.shape
    # TODO(synk): bilinear x2 upsample kept in plain JAX (interpolation glue);
    # fusing the fixed 4-tap stencil into the next conv's input load would
    # save one HBM pass per decoder stage.
    x = jax.image.resize(x, (N, 2 * H, 2 * W, C), method="bilinear")
    return double_conv(x, p)


def unet_forward(x_nchw, params):
    x = jnp.transpose(x_nchw, (0, 2, 3, 1)).astype(jnp.bfloat16)  # NCHW->NHWC
    x, s1 = down_with_sc(x, params["down1"])
    x, s2 = down_with_sc(x, params["down2"])
    x, s3 = down_with_sc(x, params["down3"])
    x = double_conv(x, params["neck"])
    x = up_with_sc(x, params["up1"])                   # concat=False
    x = up_with_sc(x, params["up2"], s3)
    x = up_with_sc(x, params["up3"], s2)
    x = jnp.concatenate([s1, x], axis=-1)              # cat([x1_skip, x], C)
    x = conv2d_same(x, params["outc"]["w1"], params["outc"]["b1"], relu=True)
    logits = conv2d_same(x, params["outc"]["w2"], params["outc"]["b2"],
                         relu=False, out_dtype=jnp.float32)
    return jnp.transpose(logits, (0, 3, 1, 2))         # NHWC -> NCHW


# ----------------------------------------------------------------------------
# deterministic parameter init (shapes follow the module __init__)
# weights are stored once in the exact (KH, KW, Cin, Cout) bf16 kernel layout
# ----------------------------------------------------------------------------
def _init_conv(key, kh, kw, cin, cout):
    k1, k2 = jax.random.split(key)
    w = (jax.random.normal(k1, (kh, kw, cin, cout), jnp.float32)
         / jnp.sqrt(kh * kw * cin)).astype(jnp.bfloat16)
    b = 0.01 * jax.random.normal(k2, (cout,), jnp.float32)
    return w, b


def _init_double_conv(key, cin, cout, ks):
    k1, k2 = jax.random.split(key)
    w1, b1 = _init_conv(k1, ks, ks, cin, cout)
    w2, b2 = _init_conv(k2, ks, ks, cout, cout)
    return {"w1": w1, "b1": b1, "w2": w2, "b2": b2}


def init_unet_params(key, n_channels, n_classes, c1, c2, c3, c_neck):
    ks = jax.random.split(key, 8)
    outc_in = c1 + n_channels
    ow1, ob1 = _init_conv(ks[7], 1, 1, outc_in, outc_in)
    ow2, ob2 = _init_conv(jax.random.fold_in(ks[7], 1), 1, 1, outc_in, n_classes)
    return {
        "down1": _init_double_conv(ks[0], n_channels, c1, 7),
        "down2": _init_double_conv(ks[1], c1, c2, 7),
        "down3": _init_double_conv(ks[2], c2, c3, 5),
        "neck":  _init_double_conv(ks[3], c3, c_neck, 3),
        "up1":   _init_double_conv(ks[4], c_neck, c3, 3),
        "up2":   _init_double_conv(ks[5], c3 + c3, c2, 3),
        "up3":   _init_double_conv(ks[6], c2 + c2, c1, 3),
        "outc":  {"w1": ow1, "b1": ob1, "w2": ow2, "b2": ob2},
    }


# ----------------------------------------------------------------------------
# demo
# ----------------------------------------------------------------------------
if __name__ == "__main__":
    # small config: n_channels == c1 so OutDoubleConv(c1 + n_channels, ...) is
    # consistent with cat([x1_skip (c1), up3-out (c1)]).
    n_channels, n_classes = 8, 3
    c1, c2, c3, c_neck = 8, 16, 16, 32
    assert n_channels == c1

    key = jax.random.PRNGKey(0)
    k_param, k_x = jax.random.split(key)
    params = init_unet_params(k_param, n_channels, n_classes, c1, c2, c3, c_neck)

    x = jax.random.normal(k_x, (2, n_channels, 16, 16), jnp.float32)  # NCHW

    logits = jax.jit(unet_forward)(x, params)
    logits = jax.block_until_ready(logits)

    assert logits.shape == (2, n_classes, 16, 16), logits.shape
    assert bool(jnp.all(jnp.isfinite(logits)))
    print("KERNEL_OK")
</pallas_src>

<mosaic_0001>
module attributes {stable_mosaic.version = 11 : i64} {
  func.func @_conv_row_kernel(%arg0: i32, %arg1: i32, %arg2: i32, %arg3: memref<1x1x22x8xbf16, #tpu.memory_space<vmem>>, %arg4: memref<1x7x8x8xbf16, #tpu.memory_space<vmem>>, %arg5: memref<1x8xf32, #tpu.memory_space<vmem>>, %arg6: memref<1x1x16x8xbf16, #tpu.memory_space<vmem>>, %arg7: memref<16x8xf32, #tpu.memory_space<vmem>>) attributes {dimension_semantics = [#tpu.dimension_semantics<parallel>, #tpu.dimension_semantics<parallel>, #tpu.dimension_semantics<arbitrary>], iteration_bounds = array<i64: 2, 16, 7>, scalar_prefetch = 0 : i64, scratch_operands = 1 : i64, tpu.core_type = #tpu.core_type<tc>, window_params = [{transform_indices = @transform_0, window_bounds = array<i64: 1, 1, 22, 8>}, {transform_indices = @transform_1, window_bounds = array<i64: 1, 7, 8, 8>}, {pipeline_mode = #tpu.pipeline_mode<synchronous>, transform_indices = @transform_2, window_bounds = array<i64: 1, 8>}, {transform_indices = @transform_3, window_bounds = array<i64: 1, 1, 16, 8>}]} {
    %c0_i32 = arith.constant 0 : i32
    %0 = arith.cmpi eq, %arg2, %c0_i32 : i32
    %1 = arith.extui %0 : i1 to i32
    %c0_i32_0 = arith.constant 0 : i32
    %2 = arith.cmpi ne, %1, %c0_i32_0 : i32
    scf.if %2 {
      %cst_61 = arith.constant 0.000000e+00 : f32
      %65 = vector.broadcast %cst_61 : f32 to vector<16x8xf32>
      %c0_62 = arith.constant 0 : index
      %c0_63 = arith.constant 0 : index
      %66 = vector.load %arg7[%c0_62, %c0_63] : memref<16x8xf32, #tpu.memory_space<vmem>>, vector<16x8xf32>
      tpu.vector_store %arg7[%c0_62, %c0_63], %65 {strides = array<i32>} : memref<16x8xf32, #tpu.memory_space<vmem>>, vector<16x8xf32>,
    } else {
    }
    %c0 = arith.constant 0 : index
    %c0_1 = arith.constant 0 : index
    %c0_2 = arith.constant 0 : index
    %c0_3 = arith.constant 0 : index
    %3 = vector.load %arg3[%c0, %c0_1, %c0_2, %c0_3] : memref<1x1x22x8xbf16, #tpu.memory_space<vmem>>, vector<1x1x22x8xbf16>
    %4 = vector.shape_cast %3 : vector<1x1x22x8xbf16> to vector<22x8xbf16>
    %5 = arith.extf %4 : vector<22x8xbf16> to vector<22x8xf32>
    %6 = vector.extract_strided_slice %5 {offsets = [0, 0], sizes = [16, 8], strides = [1, 1]} : vector<22x8xf32> to vector<16x8xf32>
    %7 = arith.truncf %6 : vector<16x8xf32> to vector<16x8xbf16>
    %c0_4 = arith.constant 0 : index
    %c0_5 = arith.constant 0 : index
    %8 = vector.load %arg7[%c0_4, %c0_5] : memref<16x8xf32, #tpu.memory_space<vmem>>, vector<16x8xf32>
    %c0_6 = arith.constant 0 : index
    %c0_7 = arith.constant 0 : index
    %c0_8 = arith.constant 0 : index
    %c0_9 = arith.constant 0 : index
    %9 = vector.load %arg4[%c0_6, %c0_7, %c0_8, %c0_9] : memref<1x7x8x8xbf16, #tpu.memory_space<vmem>>, vector<1x1x8x8xbf16>
    %10 = vector.shape_cast %9 : vector<1x1x8x8xbf16> to vector<8x8xbf16>
    %cst = arith.constant dense<0.000000e+00> : vector<16x8xf32>
    %11 = tpu.matmul %7, %10, %cst {dimension_numbers = #tpu.dot_dimension_numbers<[1], [0], [0], [1], [0, 0, 1, 1], [], []>} : vector<16x8xbf16>, vector<8x8xbf16>, vector<16x8xf32> -> vector<16x8xf32>
    %12 = arith.addf %8, %11 : vector<16x8xf32>
    %c0_10 = arith.constant 0 : index
    %c0_11 = arith.constant 0 : index
    %13 = vector.load %arg7[%c0_10, %c0_11] : memref<16x8xf32, #tpu.memory_space<vmem>>, vector<16x8xf32>
    tpu.vector_store %arg7[%c0_10, %c0_11], %12 {strides = array<i32>} : memref<16x8xf32, #tpu.memory_space<vmem>>, vector<16x8xf32>,
    %14 = vector.extract_strided_slice %5 {offsets = [1, 0], sizes = [16, 8], strides = [1, 1]} : vector<22x8xf32> to vector<16x8xf32>
    %15 = arith.truncf %14 : vector<16x8xf32> to vector<16x8xbf16>
    %c0_12 = arith.constant 0 : index
    %c0_13 = arith.constant 0 : index
    %16 = vector.load %arg7[%c0_12, %c0_13] : memref<16x8xf32, #tpu.memory_space<vmem>>, vector<16x8xf32>
    %c0_14 = arith.constant 0 : index
    %c1 = arith.constant 1 : index
    %c0_15 = arith.constant 0 : index
    %c0_16 = arith.constant 0 : index
    %17 = vector.load %arg4[%c0_14, %c1, %c0_15, %c0_16] : memref<1x7x8x8xbf16, #tpu.memory_space<vmem>>, vector<1x1x8x8xbf16>
    %18 = vector.shape_cast %17 : vector<1x1x8x8xbf16> to vector<8x8xbf16>
    %cst_17 = arith.constant dense<0.000000e+00> : vector<16x8xf32>
    %19 = tpu.matmul %15, %18, %cst_17 {dimension_numbers = #tpu.dot_dimension_numbers<[1], [0], [0], [1], [0, 0, 1, 1], [], []>} : vector<16x8xbf16>, vector<8x8xbf16>, vector<16x8xf32> -> vector<16x8xf32>
    %20 = arith.addf %16, %19 : vector<16x8xf32>
    %c0_18 = arith.constant 0 : index
    %c0_19 = arith.constant 0 : index
    %21 = vector.load %arg7[%c0_18, %c0_19] : memref<16x8xf32, #tpu.memory_space<vmem>>, vector<16x8xf32>
    tpu.vector_store %arg7[%c0_18, %c0_19], %20 {strides = array<i32>} : memref<16x8xf32, #tpu.memory_space<vmem>>, vector<16x8xf32>,
    %22 = vector.extract_strided_slice %5 {offsets = [2, 0], sizes = [16, 8], strides = [1, 1]} : vector<22x8xf32> to vector<16x8xf32>
    %23 = arith.truncf %22 : vector<16x8xf32> to vector<16x8xbf16>
    %c0_20 = arith.constant 0 : index
    %c0_21 = arith.constant 0 : index
    %24 = vector.load %arg7[%c0_20, %c0_21] : memref<16x8xf32, #tpu.memory_space<vmem>>, vector<16x8xf32>
    %c0_22 = arith.constant 0 : index
    %c2 = arith.constant 2 : index
    %c0_23 = arith.constant 0 : index
    %c0_24 = arith.constant 0 : index
    %25 = vector.load %arg4[%c0_22, %c2, %c0_23, %c0_24] : memref<1x7x8x8xbf16, #tpu.memory_space<vmem>>, vector<1x1x8x8xbf16>
    %26 = vector.shape_cast %25 : vector<1x1x8x8xbf16> to vector<8x8xbf16>
    %cst_25 = arith.constant dense<0.000000e+00> : vector<16x8xf32>
    %27 = tpu.matmul %23, %26, %cst_25 {dimension_numbers = #tpu.dot_dimension_numbers<[1], [0], [0], [1], [0, 0, 1, 1], [], []>} : vector<16x8xbf16>, vector<8x8xbf16>, vector<16x8xf32> -> vector<16x8xf32>
    %28 = arith.addf %24, %27 : vector<16x8xf32>
    %c0_26 = arith.constant 0 : index
    %c0_27 = arith.constant 0 : index
    %29 = vector.load %arg7[%c0_26, %c0_27] : memref<16x8xf32, #tpu.memory_space<vmem>>, vector<16x8xf32>
    tpu.vector_store %arg7[%c0_26, %c0_27], %28 {strides = array<i32>} : memref<16x8xf32, #tpu.memory_space<vmem>>, vector<16x8xf32>,
    %30 = vector.extract_strided_slice %5 {offsets = [3, 0], sizes = [16, 8], strides = [1, 1]} : vector<22x8xf32> to vector<16x8xf32>
    %31 = arith.truncf %30 : vector<16x8xf32> to vector<16x8xbf16>
    %c0_28 = arith.constant 0 : index
    %c0_29 = arith.constant 0 : index
    %32 = vector.load %arg7[%c0_28, %c0_29] : memref<16x8xf32, #tpu.memory_space<vmem>>, vector<16x8xf32>
    %c0_30 = arith.constant 0 : index
    %c3 = arith.constant 3 : index
    %c0_31 = arith.constant 0 : index
    %c0_32 = arith.constant 0 : index
    %33 = vector.load %arg4[%c0_30, %c3, %c0_31, %c0_32] : memref<1x7x8x8xbf16, #tpu.memory_space<vmem>>, vector<1x1x8x8xbf16>
    %34 = vector.shape_cast %33 : vector<1x1x8x8xbf16> to vector<8x8xbf16>
    %cst_33 = arith.constant dense<0.000000e+00> : vector<16x8xf32>
    %35 = tpu.matmul %31, %34, %cst_33 {dimension_numbers = #tpu.dot_dimension_numbers<[1], [0], [0], [1], [0, 0, 1, 1], [], []>} : vector<16x8xbf16>, vector<8x8xbf16>, vector<16x8xf32> -> vector<16x8xf32>
    %36 = arith.addf %32, %35 : vector<16x8xf32>
    %c0_34 = arith.constant 0 : index
    %c0_35 = arith.constant 0 : index
    %37 = vector.load %arg7[%c0_34, %c0_35] : memref<16x8xf32, #tpu.memory_space<vmem>>, vector<16x8xf32>
    tpu.vector_store %arg7[%c0_34, %c0_35], %36 {strides = array<i32>} : memref<16x8xf32, #tpu.memory_space<vmem>>, vector<16x8xf32>,
    %38 = vector.extract_strided_slice %5 {offsets = [4, 0], sizes = [16, 8], strides = [1, 1]} : vector<22x8xf32> to vector<16x8xf32>
    %39 = arith.truncf %38 : vector<16x8xf32> to vector<16x8xbf16>
    %c0_36 = arith.constant 0 : index
    %c0_37 = arith.constant 0 : index
    %40 = vector.load %arg7[%c0_36, %c0_37] : memref<16x8xf32, #tpu.memory_space<vmem>>, vector<16x8xf32>
    %c0_38 = arith.constant 0 : index
    %c4 = arith.constant 4 : index
    %c0_39 = arith.constant 0 : index
    %c0_40 = arith.constant 0 : index
    %41 = vector.load %arg4[%c0_38, %c4, %c0_39, %c0_40] : memref<1x7x8x8xbf16, #tpu.memory_space<vmem>>, vector<1x1x8x8xbf16>
    %42 = vector.shape_cast %41 : vector<1x1x8x8xbf16> to vector<8x8xbf16>
    %cst_41 = arith.constant dense<0.000000e+00> : vector<16x8xf32>
    %43 = tpu.matmul %39, %42, %cst_41 {dimension_numbers = #tpu.dot_dimension_numbers<[1], [0], [0], [1], [0, 0, 1, 1], [], []>} : vector<16x8xbf16>, vector<8x8xbf16>, vector<16x8xf32> -> vector<16x8xf32>
    %44 = arith.addf %40, %43 : vector<16x8xf32>
    %c0_42 = arith.constant 0 : index
    %c0_43 = arith.constant 0 : index
    %45 = vector.load %arg7[%c0_42, %c0_43] : memref<16x8xf32, #tpu.memory_space<vmem>>, vector<16x8xf32>
    tpu.vector_store %arg7[%c0_42, %c0_43], %44 {strides = array<i32>} : memref<16x8xf32, #tpu.memory_space<vmem>>, vector<16x8xf32>,
    %46 = vector.extract_strided_slice %5 {offsets = [5, 0], sizes = [16, 8], strides = [1, 1]} : vector<22x8xf32> to vector<16x8xf32>
    %47 = arith.truncf %46 : vector<16x8xf32> to vector<16x8xbf16>
    %c0_44 = arith.constant 0 : index
    %c0_45 = arith.constant 0 : index
    %48 = vector.load %arg7[%c0_44, %c0_45] : memref<16x8xf32, #tpu.memory_space<vmem>>, vector<16x8xf32>
    %c0_46 = arith.constant 0 : index
    %c5 = arith.constant 5 : index
    %c0_47 = arith.constant 0 : index
    %c0_48 = arith.constant 0 : index
    %49 = vector.load %arg4[%c0_46, %c5, %c0_47, %c0_48] : memref<1x7x8x8xbf16, #tpu.memory_space<vmem>>, vector<1x1x8x8xbf16>
    %50 = vector.shape_cast %49 : vector<1x1x8x8xbf16> to vector<8x8xbf16>
    %cst_49 = arith.constant dense<0.000000e+00> : vector<16x8xf32>
    %51 = tpu.matmul %47, %50, %cst_49 {dimension_numbers = #tpu.dot_dimension_numbers<[1], [0], [0], [1], [0, 0, 1, 1], [], []>} : vector<16x8xbf16>, vector<8x8xbf16>, vector<16x8xf32> -> vector<16x8xf32>
    %52 = arith.addf %48, %51 : vector<16x8xf32>
    %c0_50 = arith.constant 0 : index
    %c0_51 = arith.constant 0 : index
    %53 = vector.load %arg7[%c0_50, %c0_51] : memref<16x8xf32, #tpu.memory_space<vmem>>, vector<16x8xf32>
    tpu.vector_store %arg7[%c0_50, %c0_51], %52 {strides = array<i32>} : memref<16x8xf32, #tpu.memory_space<vmem>>, vector<16x8xf32>,
    %54 = vector.extract_strided_slice %5 {offsets = [6, 0], sizes = [16, 8], strides = [1, 1]} : vector<22x8xf32> to vector<16x8xf32>
    %55 = arith.truncf %54 : vector<16x8xf32> to vector<16x8xbf16>
    %c0_52 = arith.constant 0 : index
    %c0_53 = arith.constant 0 : index
    %56 = vector.load %arg7[%c0_52, %c0_53] : memref<16x8xf32, #tpu.memory_space<vmem>>, vector<16x8xf32>
    %c0_54 = arith.constant 0 : index
    %c6 = arith.constant 6 : index
    %c0_55 = arith.constant 0 : index
    %c0_56 = arith.constant 0 : index
    %57 = vector.load %arg4[%c0_54, %c6, %c0_55, %c0_56] : memref<1x7x8x8xbf16, #tpu.memory_space<vmem>>, vector<1x1x8x8xbf16>
    %58 = vector.shape_cast %57 : vector<1x1x8x8xbf16> to vector<8x8xbf16>
    %cst_57 = arith.constant dense<0.000000e+00> : vector<16x8xf32>
    %59 = tpu.matmul %55, %58, %cst_57 {dimension_numbers = #tpu.dot_dimension_numbers<[1], [0], [0], [1], [0, 0, 1, 1], [], []>} : vector<16x8xbf16>, vector<8x8xbf16>, vector<16x8xf32> -> vector<16x8xf32>
    %60 = arith.addf %56, %59 : vector<16x8xf32>
    %c0_58 = arith.constant 0 : index
    %c0_59 = arith.constant 0 : index
    %61 = vector.load %arg7[%c0_58, %c0_59] : memref<16x8xf32, #tpu.memory_space<vmem>>, vector<16x8xf32>
    tpu.vector_store %arg7[%c0_58, %c0_59], %60 {strides = array<i32>} : memref<16x8xf32, #tpu.memory_space<vmem>>, vector<16x8xf32>,
    %c6_i32 = arith.constant 6 : i32
    %62 = arith.cmpi eq, %arg2, %c6_i32 : i32
    %63 = arith.extui %62 : i1 to i32
    %c0_i32_60 = arith.constant 0 : i32
    %64 = arith.cmpi ne, %63, %c0_i32_60 : i32
    scf.if %64 {
      %c0_61 = arith.constant 0 : index
      %c0_62 = arith.constant 0 : index
      %65 = vector.load %arg7[%c0_61, %c0_62] : memref<16x8xf32, #tpu.memory_space<vmem>>, vector<16x8xf32>
      %c0_63 = arith.constant 0 : index
      %c0_64 = arith.constant 0 : index
      %66 = vector.load %arg5[%c0_63, %c0_64] : memref<1x8xf32, #tpu.memory_space<vmem>>, vector<1x8xf32>
      %67 = vector.broadcast %66 : vector<1x8xf32> to vector<16x8xf32>
      %68 = arith.addf %65, %67 : vector<16x8xf32>
      %cst_65 = arith.constant 0.000000e+00 : f32
      %69 = vector.broadcast %cst_65 : f32 to vector<16x8xf32>
      %70 = arith.maximumf %68, %69 : vector<16x8xf32>
      %71 = arith.truncf %70 : vector<16x8xf32> to vector<16x8xbf16>
      %c0_66 = arith.constant 0 : index
      %c0_67 = arith.constant 0 : index
      %c0_68 = arith.constant 0 : index
      %c0_69 = arith.constant 0 : index
      %72 = vector.load %arg6[%c0_66, %c0_67, %c0_68, %c0_69] : memref<1x1x16x8xbf16, #tpu.memory_space<vmem>>, vector<1x1x16x8xbf16>
      %73 = vector.shape_cast %72 : vector<1x1x16x8xbf16> to vector<16x8xbf16>
      %74 = vector.shape_cast %71 : vector<16x8xbf16> to vector<1x1x16x8xbf16>
      tpu.vector_store %arg6[%c0_66, %c0_67, %c0_68, %c0_69], %74 {strides = array<i32>} : memref<1x1x16x8xbf16, #tpu.memory_space<vmem>>, vector<1x1x16x8xbf16>,
    } else {
    }
    return
  }
  func.func @transform_0(%arg0: i32, %arg1: i32, %arg2: i32) -> (i32, i32, i32, i32) {
    %0 = arith.addi %arg1, %arg2 : i32
    %c0_i32 = arith.constant 0 : i32
    %c0_i32_0 = arith.constant 0 : i32
    %c0_i32_1 = arith.constant 0 : i32
    return %arg0, %0, %c0_i32, %c0_i32_0 : i32, i32, i32, i32
  }
  func.func @transform_1(%arg0: i32, %arg1: i32, %arg2: i32) -> (i32, i32, i32, i32) {
    %c0_i32 = arith.constant 0 : i32
    %c0_i32_0 = arith.constant 0 : i32
    %c0_i32_1 = arith.constant 0 : i32
    %c0_i32_2 = arith.constant 0 : i32
    return %arg2, %c0_i32, %c0_i32_0, %c0_i32_1 : i32, i32, i32, i32
  }
  func.func @transform_2(%arg0: i32, %arg1: i32, %arg2: i32) -> (i32, i32) {
    %c0_i32 = arith.constant 0 : i32
    %c0_i32_0 = arith.constant 0 : i32
    %c0_i32_1 = arith.constant 0 : i32
    return %c0_i32, %c0_i32_0 : i32, i32
  }
  func.func @transform_3(%arg0: i32, %arg1: i32, %arg2: i32) -> (i32, i32, i32, i32) {
    %c0_i32 = arith.constant 0 : i32
    %c0_i32_0 = arith.constant 0 : i32
    %c0_i32_1 = arith.constant 0 : i32
    return %arg0, %arg1, %c0_i32, %c0_i32_0 : i32, i32, i32, i32
  }
}

module attributes {stable_mosaic.version = 11 : i64} {
  func.func @_max4_kernel(%arg0: i32, %arg1: memref<16x128xbf16, #tpu.memory_space<vmem>>, %arg2: memref<16x128xbf16, #tpu.memory_space<vmem>>, %arg3: memref<16x128xbf16, #tpu.memory_space<vmem>>, %arg4: memref<16x128xbf16, #tpu.memory_space<vmem>>, %arg5: memref<16x128xbf16, #tpu.memory_space<vmem>>) attributes {dimension_semantics = [#tpu.dimension_semantics<parallel>], iteration_bounds = array<i64: 1>, scalar_prefetch = 0 : i64, scratch_operands = 0 : i64, tpu.core_type = #tpu.core_type<tc>, window_params = [{transform_indices = @transform_0, window_bounds = array<i64: 16, 128>}, {transform_indices = @transform_1, window_bounds = array<i64: 16, 128>}, {transform_indices = @transform_2, window_bounds = array<i64: 16, 128>}, {transform_indices = @transform_3, window_bounds = array<i64: 16, 128>}, {transform_indices = @transform_4, window_bounds = array<i64: 16, 128>}]} {
    %c0 = arith.constant 0 : index
    %c0_0 = arith.constant 0 : index
    %0 = vector.load %arg1[%c0, %c0_0] : memref<16x128xbf16, #tpu.memory_space<vmem>>, vector<16x128xbf16>
    %c0_1 = arith.constant 0 : index
    %c0_2 = arith.constant 0 : index
    %1 = vector.load %arg2[%c0_1, %c0_2] : memref<16x128xbf16, #tpu.memory_space<vmem>>, vector<16x128xbf16>
    %2 = arith.maximumf %0, %1 : vector<16x128xbf16>
    %c0_3 = arith.constant 0 : index
    %c0_4 = arith.constant 0 : index
    %3 = vector.load %arg3[%c0_3, %c0_4] : memref<16x128xbf16, #tpu.memory_space<vmem>>, vector<16x128xbf16>
    %c0_5 = arith.constant 0 : index
    %c0_6 = arith.constant 0 : index
    %4 = vector.load %arg4[%c0_5, %c0_6] : memref<16x128xbf16, #tpu.memory_space<vmem>>, vector<16x128xbf16>
    %5 = arith.maximumf %3, %4 : vector<16x128xbf16>
    %6 = arith.maximumf %2, %5 : vector<16x128xbf16>
    %c0_7 = arith.constant 0 : index
    %c0_8 = arith.constant 0 : index
    %7 = vector.load %arg5[%c0_7, %c0_8] : memref<16x128xbf16, #tpu.memory_space<vmem>>, vector<16x128xbf16>
    tpu.vector_store %arg5[%c0_7, %c0_8], %6 {strides = array<i32>} : memref<16x128xbf16, #tpu.memory_space<vmem>>, vector<16x128xbf16>,
    return
  }
  func.func @transform_0(%arg0: i32) -> (i32, i32) {
    %c0_i32 = arith.constant 0 : i32
    %c0_i32_0 = arith.constant 0 : i32
    return %arg0, %c0_i32 : i32, i32
  }
  func.func @transform_1(%arg0: i32) -> (i32, i32) {
    %c0_i32 = arith.constant 0 : i32
    %c0_i32_0 = arith.constant 0 : i32
    return %arg0, %c0_i32 : i32, i32
  }
  func.func @transform_2(%arg0: i32) -> (i32, i32) {
    %c0_i32 = arith.constant 0 : i32
    %c0_i32_0 = arith.constant 0 : i32
    return %arg0, %c0_i32 : i32, i32
  }
  func.func @transform_3(%arg0: i32) -> (i32, i32) {
    %c0_i32 = arith.constant 0 : i32
    %c0_i32_0 = arith.constant 0 : i32
    return %arg0, %c0_i32 : i32, i32
  }
  func.func @transform_4(%arg0: i32) -> (i32, i32) {
    %c0_i32 = arith.constant 0 : i32
    %c0_i32_0 = arith.constant 0 : i32
    return %arg0, %c0_i32 : i32, i32
  }
}

module attributes {stable_mosaic.version = 11 : i64} {
  func.func @_conv_row_kernel(%arg0: i32, %arg1: i32, %arg2: i32, %arg3: memref<1x1x14x8xbf16, #tpu.memory_space<vmem>>, %arg4: memref<1x7x8x16xbf16, #tpu.memory_space<vmem>>, %arg5: memref<1x16xf32, #tpu.memory_space<vmem>>, %arg6: memref<1x1x8x16xbf16, #tpu.memory_space<vmem>>, %arg7: memref<8x16xf32, #tpu.memory_space<vmem>>) attributes {dimension_semantics = [#tpu.dimension_semantics<parallel>, #tpu.dimension_semantics<parallel>, #tpu.dimension_semantics<arbitrary>], iteration_bounds = array<i64: 2, 8, 7>, scalar_prefetch = 0 : i64, scratch_operands = 1 : i64, tpu.core_type = #tpu.core_type<tc>, window_params = [{transform_indices = @transform_0, window_bounds = array<i64: 1, 1, 14, 8>}, {transform_indices = @transform_1, window_bounds = array<i64: 1, 7, 8, 16>}, {pipeline_mode = #tpu.pipeline_mode<synchronous>, transform_indices = @transform_2, window_bounds = array<i64: 1, 16>}, {transform_indices = @transform_3, window_bounds = array<i64: 1, 1, 8, 16>}]} {
    %c0_i32 = arith.constant 0 : i32
    %0 = arith.cmpi eq, %arg2, %c0_i32 : i32
    %1 = arith.extui %0 : i1 to i32
    %c0_i32_0 = arith.constant 0 : i32
    %2 = arith.cmpi ne, %1, %c0_i32_0 : i32
    scf.if %2 {
      %cst_61 = arith.constant 0.000000e+00 : f32
      %65 = vector.broadcast %cst_61 : f32 to vector<8x16xf32>
      %c0_62 = arith.constant 0 : index
      %c0_63 = arith.constant 0 : index
      %66 = vector.load %arg7[%c0_62, %c0_63] : memref<8x16xf32, #tpu.memory_space<vmem>>, vector<8x16xf32>
      tpu.vector_store %arg7[%c0_62, %c0_63], %65 {strides = array<i32>} : memref<8x16xf32, #tpu.memory_space<vmem>>, vector<8x16xf32>,
    } else {
    }
    %c0 = arith.constant 0 : index
    %c0_1 = arith.constant 0 : index
    %c0_2 = arith.constant 0 : index
    %c0_3 = arith.constant 0 : index
    %3 = vector.load %arg3[%c0, %c0_1, %c0_2, %c0_3] : memref<1x1x14x8xbf16, #tpu.memory_space<vmem>>, vector<1x1x14x8xbf16>
    %4 = vector.shape_cast %3 : vector<1x1x14x8xbf16> to vector<14x8xbf16>
    %5 = arith.extf %4 : vector<14x8xbf16> to vector<14x8xf32>
    %6 = vector.extract_strided_slice %5 {offsets = [0, 0], sizes = [8, 8], strides = [1, 1]} : vector<14x8xf32> to vector<8x8xf32>
    %7 = arith.truncf %6 : vector<8x8xf32> to vector<8x8xbf16>
    %c0_4 = arith.constant 0 : index
    %c0_5 = arith.constant 0 : index
    %8 = vector.load %arg7[%c0_4, %c0_5] : memref<8x16xf32, #tpu.memory_space<vmem>>, vector<8x16xf32>
    %c0_6 = arith.constant 0 : index
    %c0_7 = arith.constant 0 : index
    %c0_8 = arith.constant 0 : index
    %c0_9 = arith.constant 0 : index
    %9 = vector.load %arg4[%c0_6, %c0_7, %c0_8, %c0_9] : memref<1x7x8x16xbf16, #tpu.memory_space<vmem>>, vector<1x1x8x16xbf16>
    %10 = vector.shape_cast %9 : vector<1x1x8x16xbf16> to vector<8x16xbf16>
    %cst = arith.constant dense<0.000000e+00> : vector<8x16xf32>
    %11 = tpu.matmul %7, %10, %cst {dimension_numbers = #tpu.dot_dimension_numbers<[1], [0], [0], [1], [0, 0, 1, 1], [], []>} : vector<8x8xbf16>, vector<8x16xbf16>, vector<8x16xf32> -> vector<8x16xf32>
    %12 = arith.addf %8, %11 : vector<8x16xf32>
    %c0_10 = arith.constant 0 : index
    %c0_11 = arith.constant 0 : index
    %13 = vector.load %arg7[%c0_10, %c0_11] : memref<8x16xf32, #tpu.memory_space<vmem>>, vector<8x16xf32>
    tpu.vector_store %arg7[%c0_10, %c0_11], %12 {strides = array<i32>} : memref<8x16xf32, #tpu.memory_space<vmem>>, vector<8x16xf32>,
    %14 = vector.extract_strided_slice %5 {offsets = [1, 0], sizes = [8, 8], strides = [1, 1]} : vector<14x8xf32> to vector<8x8xf32>
    %15 = arith.truncf %14 : vector<8x8xf32> to vector<8x8xbf16>
    %c0_12 = arith.constant 0 : index
    %c0_13 = arith.constant 0 : index
    %16 = vector.load %arg7[%c0_12, %c0_13] : memref<8x16xf32, #tpu.memory_space<vmem>>, vector<8x16xf32>
    %c0_14 = arith.constant 0 : index
    %c1 = arith.constant 1 : index
    %c0_15 = arith.constant 0 : index
    %c0_16 = arith.constant 0 : index
    %17 = vector.load %arg4[%c0_14, %c1, %c0_15, %c0_16] : memref<1x7x8x16xbf16, #tpu.memory_space<vmem>>, vector<1x1x8x16xbf16>
    %18 = vector.shape_cast %17 : vector<1x1x8x16xbf16> to vector<8x16xbf16>
    %cst_17 = arith.constant dense<0.000000e+00> : vector<8x16xf32>
    %19 = tpu.matmul %15, %18, %cst_17 {dimension_numbers = #tpu.dot_dimension_numbers<[1], [0], [0], [1], [0, 0, 1, 1], [], []>} : vector<8x8xbf16>, vector<8x16xbf16>, vector<8x16xf32> -> vector<8x16xf32>
    %20 = arith.addf %16, %19 : vector<8x16xf32>
    %c0_18 = arith.constant 0 : index
    %c0_19 = arith.constant 0 : index
    %21 = vector.load %arg7[%c0_18, %c0_19] : memref<8x16xf32, #tpu.memory_space<vmem>>, vector<8x16xf32>
    tpu.vector_store %arg7[%c0_18, %c0_19], %20 {strides = array<i32>} : memref<8x16xf32, #tpu.memory_space<vmem>>, vector<8x16xf32>,
    %22 = vector.extract_strided_slice %5 {offsets = [2, 0], sizes = [8, 8], strides = [1, 1]} : vector<14x8xf32> to vector<8x8xf32>
    %23 = arith.truncf %22 : vector<8x8xf32> to vector<8x8xbf16>
    %c0_20 = arith.constant 0 : index
    %c0_21 = arith.constant 0 : index
    %24 = vector.load %arg7[%c0_20, %c0_21] : memref<8x16xf32, #tpu.memory_space<vmem>>, vector<8x16xf32>
    %c0_22 = arith.constant 0 : index
    %c2 = arith.constant 2 : index
    %c0_23 = arith.constant 0 : index
    %c0_24 = arith.constant 0 : index
    %25 = vector.load %arg4[%c0_22, %c2, %c0_23, %c0_24] : memref<1x7x8x16xbf16, #tpu.memory_space<vmem>>, vector<1x1x8x16xbf16>
    %26 = vector.shape_cast %25 : vector<1x1x8x16xbf16> to vector<8x16xbf16>
    %cst_25 = arith.constant dense<0.000000e+00> : vector<8x16xf32>
    %27 = tpu.matmul %23, %26, %cst_25 {dimension_numbers = #tpu.dot_dimension_numbers<[1], [0], [0], [1], [0, 0, 1, 1], [], []>} : vector<8x8xbf16>, vector<8x16xbf16>, vector<8x16xf32> -> vector<8x16xf32>
    %28 = arith.addf %24, %27 : vector<8x16xf32>
    %c0_26 = arith.constant 0 : index
    %c0_27 = arith.constant 0 : index
    %29 = vector.load %arg7[%c0_26, %c0_27] : memref<8x16xf32, #tpu.memory_space<vmem>>, vector<8x16xf32>
    tpu.vector_store %arg7[%c0_26, %c0_27], %28 {strides = array<i32>} : memref<8x16xf32, #tpu.memory_space<vmem>>, vector<8x16xf32>,
    %30 = vector.extract_strided_slice %5 {offsets = [3, 0], sizes = [8, 8], strides = [1, 1]} : vector<14x8xf32> to vector<8x8xf32>
    %31 = arith.truncf %30 : vector<8x8xf32> to vector<8x8xbf16>
    %c0_28 = arith.constant 0 : index
    %c0_29 = arith.constant 0 : index
    %32 = vector.load %arg7[%c0_28, %c0_29] : memref<8x16xf32, #tpu.memory_space<vmem>>, vector<8x16xf32>
    %c0_30 = arith.constant 0 : index
    %c3 = arith.constant 3 : index
    %c0_31 = arith.constant 0 : index
    %c0_32 = arith.constant 0 : index
    %33 = vector.load %arg4[%c0_30, %c3, %c0_31, %c0_32] : memref<1x7x8x16xbf16, #tpu.memory_space<vmem>>, vector<1x1x8x16xbf16>
    %34 = vector.shape_cast %33 : vector<1x1x8x16xbf16> to vector<8x16xbf16>
    %cst_33 = arith.constant dense<0.000000e+00> : vector<8x16xf32>
    %35 = tpu.matmul %31, %34, %cst_33 {dimension_numbers = #tpu.dot_dimension_numbers<[1], [0], [0], [1], [0, 0, 1, 1], [], []>} : vector<8x8xbf16>, vector<8x16xbf16>, vector<8x16xf32> -> vector<8x16xf32>
    %36 = arith.addf %32, %35 : vector<8x16xf32>
    %c0_34 = arith.constant 0 : index
    %c0_35 = arith.constant 0 : index
    %37 = vector.load %arg7[%c0_34, %c0_35] : memref<8x16xf32, #tpu.memory_space<vmem>>, vector<8x16xf32>
    tpu.vector_store %arg7[%c0_34, %c0_35], %36 {strides = array<i32>} : memref<8x16xf32, #tpu.memory_space<vmem>>, vector<8x16xf32>,
    %38 = vector.extract_strided_slice %5 {offsets = [4, 0], sizes = [8, 8], strides = [1, 1]} : vector<14x8xf32> to vector<8x8xf32>
    %39 = arith.truncf %38 : vector<8x8xf32> to vector<8x8xbf16>
    %c0_36 = arith.constant 0 : index
    %c0_37 = arith.constant 0 : index
    %40 = vector.load %arg7[%c0_36, %c0_37] : memref<8x16xf32, #tpu.memory_space<vmem>>, vector<8x16xf32>
    %c0_38 = arith.constant 0 : index
    %c4 = arith.constant 4 : index
    %c0_39 = arith.constant 0 : index
    %c0_40 = arith.constant 0 : index
    %41 = vector.load %arg4[%c0_38, %c4, %c0_39, %c0_40] : memref<1x7x8x16xbf16, #tpu.memory_space<vmem>>, vector<1x1x8x16xbf16>
    %42 = vector.shape_cast %41 : vector<1x1x8x16xbf16> to vector<8x16xbf16>
    %cst_41 = arith.constant dense<0.000000e+00> : vector<8x16xf32>
    %43 = tpu.matmul %39, %42, %cst_41 {dimension_numbers = #tpu.dot_dimension_numbers<[1], [0], [0], [1], [0, 0, 1, 1], [], []>} : vector<8x8xbf16>, vector<8x16xbf16>, vector<8x16xf32> -> vector<8x16xf32>
    %44 = arith.addf %40, %43 : vector<8x16xf32>
    %c0_42 = arith.constant 0 : index
    %c0_43 = arith.constant 0 : index
    %45 = vector.load %arg7[%c0_42, %c0_43] : memref<8x16xf32, #tpu.memory_space<vmem>>, vector<8x16xf32>
    tpu.vector_store %arg7[%c0_42, %c0_43], %44 {strides = array<i32>} : memref<8x16xf32, #tpu.memory_space<vmem>>, vector<8x16xf32>,
    %46 = vector.extract_strided_slice %5 {offsets = [5, 0], sizes = [8, 8], strides = [1, 1]} : vector<14x8xf32> to vector<8x8xf32>
    %47 = arith.truncf %46 : vector<8x8xf32> to vector<8x8xbf16>
    %c0_44 = arith.constant 0 : index
    %c0_45 = arith.constant 0 : index
    %48 = vector.load %arg7[%c0_44, %c0_45] : memref<8x16xf32, #tpu.memory_space<vmem>>, vector<8x16xf32>
    %c0_46 = arith.constant 0 : index
    %c5 = arith.constant 5 : index
    %c0_47 = arith.constant 0 : index
    %c0_48 = arith.constant 0 : index
    %49 = vector.load %arg4[%c0_46, %c5, %c0_47, %c0_48] : memref<1x7x8x16xbf16, #tpu.memory_space<vmem>>, vector<1x1x8x16xbf16>
    %50 = vector.shape_cast %49 : vector<1x1x8x16xbf16> to vector<8x16xbf16>
    %cst_49 = arith.constant dense<0.000000e+00> : vector<8x16xf32>
    %51 = tpu.matmul %47, %50, %cst_49 {dimension_numbers = #tpu.dot_dimension_numbers<[1], [0], [0], [1], [0, 0, 1, 1], [], []>} : vector<8x8xbf16>, vector<8x16xbf16>, vector<8x16xf32> -> vector<8x16xf32>
    %52 = arith.addf %48, %51 : vector<8x16xf32>
    %c0_50 = arith.constant 0 : index
    %c0_51 = arith.constant 0 : index
    %53 = vector.load %arg7[%c0_50, %c0_51] : memref<8x16xf32, #tpu.memory_space<vmem>>, vector<8x16xf32>
    tpu.vector_store %arg7[%c0_50, %c0_51], %52 {strides = array<i32>} : memref<8x16xf32, #tpu.memory_space<vmem>>, vector<8x16xf32>,
    %54 = vector.extract_strided_slice %5 {offsets = [6, 0], sizes = [8, 8], strides = [1, 1]} : vector<14x8xf32> to vector<8x8xf32>
    %55 = arith.truncf %54 : vector<8x8xf32> to vector<8x8xbf16>
    %c0_52 = arith.constant 0 : index
    %c0_53 = arith.constant 0 : index
    %56 = vector.load %arg7[%c0_52, %c0_53] : memref<8x16xf32, #tpu.memory_space<vmem>>, vector<8x16xf32>
    %c0_54 = arith.constant 0 : index
    %c6 = arith.constant 6 : index
    %c0_55 = arith.constant 0 : index
    %c0_56 = arith.constant 0 : index
    %57 = vector.load %arg4[%c0_54, %c6, %c0_55, %c0_56] : memref<1x7x8x16xbf16, #tpu.memory_space<vmem>>, vector<1x1x8x16xbf16>
    %58 = vector.shape_cast %57 : vector<1x1x8x16xbf16> to vector<8x16xbf16>
    %cst_57 = arith.constant dense<0.000000e+00> : vector<8x16xf32>
    %59 = tpu.matmul %55, %58, %cst_57 {dimension_numbers = #tpu.dot_dimension_numbers<[1], [0], [0], [1], [0, 0, 1, 1], [], []>} : vector<8x8xbf16>, vector<8x16xbf16>, vector<8x16xf32> -> vector<8x16xf32>
    %60 = arith.addf %56, %59 : vector<8x16xf32>
    %c0_58 = arith.constant 0 : index
    %c0_59 = arith.constant 0 : index
    %61 = vector.load %arg7[%c0_58, %c0_59] : memref<8x16xf32, #tpu.memory_space<vmem>>, vector<8x16xf32>
    tpu.vector_store %arg7[%c0_58, %c0_59], %60 {strides = array<i32>} : memref<8x16xf32, #tpu.memory_space<vmem>>, vector<8x16xf32>,
    %c6_i32 = arith.constant 6 : i32
    %62 = arith.cmpi eq, %arg2, %c6_i32 : i32
    %63 = arith.extui %62 : i1 to i32
    %c0_i32_60 = arith.constant 0 : i32
    %64 = arith.cmpi ne, %63, %c0_i32_60 : i32
    scf.if %64 {
      %c0_61 = arith.constant 0 : index
      %c0_62 = arith.constant 0 : index
      %65 = vector.load %arg7[%c0_61, %c0_62] : memref<8x16xf32, #tpu.memory_space<vmem>>, vector<8x16xf32>
      %c0_63 = arith.constant 0 : index
      %c0_64 = arith.constant 0 : index
      %66 = vector.load %arg5[%c0_63, %c0_64] : memref<1x16xf32, #tpu.memory_space<vmem>>, vector<1x16xf32>
      %67 = vector.broadcast %66 : vector<1x16xf32> to vector<8x16xf32>
      %68 = arith.addf %65, %67 : vector<8x16xf32>
      %cst_65 = arith.constant 0.000000e+00 : f32
      %69 = vector.broadcast %cst_65 : f32 to vector<8x16xf32>
      %70 = arith.maximumf %68, %69 : vector<8x16xf32>
      %71 = arith.truncf %70 : vector<8x16xf32> to vector<8x16xbf16>
      %c0_66 = arith.constant 0 : index
      %c0_67 = arith.constant 0 : index
      %c0_68 = arith.constant 0 : index
      %c0_69 = arith.constant 0 : index
      %72 = vector.load %arg6[%c0_66, %c0_67, %c0_68, %c0_69] : memref<1x1x8x16xbf16, #tpu.memory_space<vmem>>, vector<1x1x8x16xbf16>
      %73 = vector.shape_cast %72 : vector<1x1x8x16xbf16> to vector<8x16xbf16>
      %74 = vector.shape_cast %71 : vector<8x16xbf16> to vector<1x1x8x16xbf16>
      tpu.vector_store %arg6[%c0_66, %c0_67, %c0_68, %c0_69], %74 {strides = array<i32>} : memref<1x1x8x16xbf16, #tpu.memory_space<vmem>>, vector<1x1x8x16xbf16>,
    } else {
    }
    return
  }
  func.func @transform_0(%arg0: i32, %arg1: i32, %arg2: i32) -> (i32, i32, i32, i32) {
    %0 = arith.addi %arg1, %arg2 : i32
    %c0_i32 = arith.constant 0 : i32
    %c0_i32_0 = arith.constant 0 : i32
    %c0_i32_1 = arith.constant 0 : i32
    return %arg0, %0, %c0_i32, %c0_i32_0 : i32, i32, i32, i32
  }
  func.func @transform_1(%arg0: i32, %arg1: i32, %arg2: i32) -> (i32, i32, i32, i32) {
    %c0_i32 = arith.constant 0 : i32
    %c0_i32_0 = arith.constant 0 : i32
    %c0_i32_1 = arith.constant 0 : i32
    %c0_i32_2 = arith.constant 0 : i32
    return %arg2, %c0_i32, %c0_i32_0, %c0_i32_1 : i32, i32, i32, i32
  }
  func.func @transform_2(%arg0: i32, %arg1: i32, %arg2: i32) -> (i32, i32) {
    %c0_i32 = arith.constant 0 : i32
    %c0_i32_0 = arith.constant 0 : i32
    %c0_i32_1 = arith.constant 0 : i32
    return %c0_i32, %c0_i32_0 : i32, i32
  }
  func.func @transform_3(%arg0: i32, %arg1: i32, %arg2: i32) -> (i32, i32, i32, i32) {
    %c0_i32 = arith.constant 0 : i32
    %c0_i32_0 = arith.constant 0 : i32
    %c0_i32_1 = arith.constant 0 : i32
    return %arg0, %arg1, %c0_i32, %c0_i32_0 : i32, i32, i32, i32
  }
}

module attributes {stable_mosaic.version = 11 : i64} {
  func.func @_conv_row_kernel(%arg0: i32, %arg1: i32, %arg2: i32, %arg3: memref<1x1x14x16xbf16, #tpu.memory_space<vmem>>, %arg4: memref<1x7x16x16xbf16, #tpu.memory_space<vmem>>, %arg5: memref<1x16xf32, #tpu.memory_space<vmem>>, %arg6: memref<1x1x8x16xbf16, #tpu.memory_space<vmem>>, %arg7: memref<8x16xf32, #tpu.memory_space<vmem>>) attributes {dimension_semantics = [#tpu.dimension_semantics<parallel>, #tpu.dimension_semantics<parallel>, #tpu.dimension_semantics<arbitrary>], iteration_bounds = array<i64: 2, 8, 7>, scalar_prefetch = 0 : i64, scratch_operands = 1 : i64, tpu.core_type = #tpu.core_type<tc>, window_params = [{transform_indices = @transform_0, window_bounds = array<i64: 1, 1, 14, 16>}, {transform_indices = @transform_1, window_bounds = array<i64: 1, 7, 16, 16>}, {pipeline_mode = #tpu.pipeline_mode<synchronous>, transform_indices = @transform_2, window_bounds = array<i64: 1, 16>}, {transform_indices = @transform_3, window_bounds = array<i64: 1, 1, 8, 16>}]} {
    %c0_i32 = arith.constant 0 : i32
    %0 = arith.cmpi eq, %arg2, %c0_i32 : i32
    %1 = arith.extui %0 : i1 to i32
    %c0_i32_0 = arith.constant 0 : i32
    %2 = arith.cmpi ne, %1, %c0_i32_0 : i32
    scf.if %2 {
      %cst_61 = arith.constant 0.000000e+00 : f32
      %65 = vector.broadcast %cst_61 : f32 to vector<8x16xf32>
      %c0_62 = arith.constant 0 : index
      %c0_63 = arith.constant 0 : index
      %66 = vector.load %arg7[%c0_62, %c0_63] : memref<8x16xf32, #tpu.memory_space<vmem>>, vector<8x16xf32>
      tpu.vector_store %arg7[%c0_62, %c0_63], %65 {strides = array<i32>} : memref<8x16xf32, #tpu.memory_space<vmem>>, vector<8x16xf32>,
    } else {
    }
    %c0 = arith.constant 0 : index
    %c0_1 = arith.constant 0 : index
    %c0_2 = arith.constant 0 : index
    %c0_3 = arith.constant 0 : index
    %3 = vector.load %arg3[%c0, %c0_1, %c0_2, %c0_3] : memref<1x1x14x16xbf16, #tpu.memory_space<vmem>>, vector<1x1x14x16xbf16>
    %4 = vector.shape_cast %3 : vector<1x1x14x16xbf16> to vector<14x16xbf16>
    %5 = arith.extf %4 : vector<14x16xbf16> to vector<14x16xf32>
    %6 = vector.extract_strided_slice %5 {offsets = [0, 0], sizes = [8, 16], strides = [1, 1]} : vector<14x16xf32> to vector<8x16xf32>
    %7 = arith.truncf %6 : vector<8x16xf32> to vector<8x16xbf16>
    %c0_4 = arith.constant 0 : index
    %c0_5 = arith.constant 0 : index
    %8 = vector.load %arg7[%c0_4, %c0_5] : memref<8x16xf32, #tpu.memory_space<vmem>>, vector<8x16xf32>
    %c0_6 = arith.constant 0 : index
    %c0_7 = arith.constant 0 : index
    %c0_8 = arith.constant 0 : index
    %c0_9 = arith.constant 0 : index
    %9 = vector.load %arg4[%c0_6, %c0_7, %c0_8, %c0_9] : memref<1x7x16x16xbf16, #tpu.memory_space<vmem>>, vector<1x1x16x16xbf16>
    %10 = vector.shape_cast %9 : vector<1x1x16x16xbf16> to vector<16x16xbf16>
    %cst = arith.constant dense<0.000000e+00> : vector<8x16xf32>
    %11 = tpu.matmul %7, %10, %cst {dimension_numbers = #tpu.dot_dimension_numbers<[1], [0], [0], [1], [0, 0, 1, 1], [], []>} : vector<8x16xbf16>, vector<16x16xbf16>, vector<8x16xf32> -> vector<8x16xf32>
    %12 = arith.addf %8, %11 : vector<8x16xf32>
    %c0_10 = arith.constant 0 : index
    %c0_11 = arith.constant 0 : index
    %13 = vector.load %arg7[%c0_10, %c0_11] : memref<8x16xf32, #tpu.memory_space<vmem>>, vector<8x16xf32>
    tpu.vector_store %arg7[%c0_10, %c0_11], %12 {strides = array<i32>} : memref<8x16xf32, #tpu.memory_space<vmem>>, vector<8x16xf32>,
    %14 = vector.extract_strided_slice %5 {offsets = [1, 0], sizes = [8, 16], strides = [1, 1]} : vector<14x16xf32> to vector<8x16xf32>
    %15 = arith.truncf %14 : vector<8x16xf32> to vector<8x16xbf16>
    %c0_12 = arith.constant 0 : index
    %c0_13 = arith.constant 0 : index
    %16 = vector.load %arg7[%c0_12, %c0_13] : memref<8x16xf32, #tpu.memory_space<vmem>>, vector<8x16xf32>
    %c0_14 = arith.constant 0 : index
    %c1 = arith.constant 1 : index
    %c0_15 = arith.constant 0 : index
    %c0_16 = arith.constant 0 : index
    %17 = vector.load %arg4[%c0_14, %c1, %c0_15, %c0_16] : memref<1x7x16x16xbf16, #tpu.memory_space<vmem>>, vector<1x1x16x16xbf16>
    %18 = vector.shape_cast %17 : vector<1x1x16x16xbf16> to vector<16x16xbf16>
    %cst_17 = arith.constant dense<0.000000e+00> : vector<8x16xf32>
    %19 = tpu.matmul %15, %18, %cst_17 {dimension_numbers = #tpu.dot_dimension_numbers<[1], [0], [0], [1], [0, 0, 1, 1], [], []>} : vector<8x16xbf16>, vector<16x16xbf16>, vector<8x16xf32> -> vector<8x16xf32>
    %20 = arith.addf %16, %19 : vector<8x16xf32>
    %c0_18 = arith.constant 0 : index
    %c0_19 = arith.constant 0 : index
    %21 = vector.load %arg7[%c0_18, %c0_19] : memref<8x16xf32, #tpu.memory_space<vmem>>, vector<8x16xf32>
    tpu.vector_store %arg7[%c0_18, %c0_19], %20 {strides = array<i32>} : memref<8x16xf32, #tpu.memory_space<vmem>>, vector<8x16xf32>,
    %22 = vector.extract_strided_slice %5 {offsets = [2, 0], sizes = [8, 16], strides = [1, 1]} : vector<14x16xf32> to vector<8x16xf32>
    %23 = arith.truncf %22 : vector<8x16xf32> to vector<8x16xbf16>
    %c0_20 = arith.constant 0 : index
    %c0_21 = arith.constant 0 : index
    %24 = vector.load %arg7[%c0_20, %c0_21] : memref<8x16xf32, #tpu.memory_space<vmem>>, vector<8x16xf32>
    %c0_22 = arith.constant 0 : index
    %c2 = arith.constant 2 : index
    %c0_23 = arith.constant 0 : index
    %c0_24 = arith.constant 0 : index
    %25 = vector.load %arg4[%c0_22, %c2, %c0_23, %c0_24] : memref<1x7x16x16xbf16, #tpu.memory_space<vmem>>, vector<1x1x16x16xbf16>
    %26 = vector.shape_cast %25 : vector<1x1x16x16xbf16> to vector<16x16xbf16>
    %cst_25 = arith.constant dense<0.000000e+00> : vector<8x16xf32>
    %27 = tpu.matmul %23, %26, %cst_25 {dimension_numbers = #tpu.dot_dimension_numbers<[1], [0], [0], [1], [0, 0, 1, 1], [], []>} : vector<8x16xbf16>, vector<16x16xbf16>, vector<8x16xf32> -> vector<8x16xf32>
    %28 = arith.addf %24, %27 : vector<8x16xf32>
    %c0_26 = arith.constant 0 : index
    %c0_27 = arith.constant 0 : index
    %29 = vector.load %arg7[%c0_26, %c0_27] : memref<8x16xf32, #tpu.memory_space<vmem>>, vector<8x16xf32>
    tpu.vector_store %arg7[%c0_26, %c0_27], %28 {strides = array<i32>} : memref<8x16xf32, #tpu.memory_space<vmem>>, vector<8x16xf32>,
    %30 = vector.extract_strided_slice %5 {offsets = [3, 0], sizes = [8, 16], strides = [1, 1]} : vector<14x16xf32> to vector<8x16xf32>
    %31 = arith.truncf %30 : vector<8x16xf32> to vector<8x16xbf16>
    %c0_28 = arith.constant 0 : index
    %c0_29 = arith.constant 0 : index
    %32 = vector.load %arg7[%c0_28, %c0_29] : memref<8x16xf32, #tpu.memory_space<vmem>>, vector<8x16xf32>
    %c0_30 = arith.constant 0 : index
    %c3 = arith.constant 3 : index
    %c0_31 = arith.constant 0 : index
    %c0_32 = arith.constant 0 : index
    %33 = vector.load %arg4[%c0_30, %c3, %c0_31, %c0_32] : memref<1x7x16x16xbf16, #tpu.memory_space<vmem>>, vector<1x1x16x16xbf16>
    %34 = vector.shape_cast %33 : vector<1x1x16x16xbf16> to vector<16x16xbf16>
    %cst_33 = arith.constant dense<0.000000e+00> : vector<8x16xf32>
    %35 = tpu.matmul %31, %34, %cst_33 {dimension_numbers = #tpu.dot_dimension_numbers<[1], [0], [0], [1], [0, 0, 1, 1], [], []>} : vector<8x16xbf16>, vector<16x16xbf16>, vector<8x16xf32> -> vector<8x16xf32>
    %36 = arith.addf %32, %35 : vector<8x16xf32>
    %c0_34 = arith.constant 0 : index
    %c0_35 = arith.constant 0 : index
    %37 = vector.load %arg7[%c0_34, %c0_35] : memref<8x16xf32, #tpu.memory_space<vmem>>, vector<8x16xf32>
    tpu.vector_store %arg7[%c0_34, %c0_35], %36 {strides = array<i32>} : memref<8x16xf32, #tpu.memory_space<vmem>>, vector<8x16xf32>,
    %38 = vector.extract_strided_slice %5 {offsets = [4, 0], sizes = [8, 16], strides = [1, 1]} : vector<14x16xf32> to vector<8x16xf32>
    %39 = arith.truncf %38 : vector<8x16xf32> to vector<8x16xbf16>
    %c0_36 = arith.constant 0 : index
    %c0_37 = arith.constant 0 : index
    %40 = vector.load %arg7[%c0_36, %c0_37] : memref<8x16xf32, #tpu.memory_space<vmem>>, vector<8x16xf32>
    %c0_38 = arith.constant 0 : index
    %c4 = arith.constant 4 : index
    %c0_39 = arith.constant 0 : index
    %c0_40 = arith.constant 0 : index
    %41 = vector.load %arg4[%c0_38, %c4, %c0_39, %c0_40] : memref<1x7x16x16xbf16, #tpu.memory_space<vmem>>, vector<1x1x16x16xbf16>
    %42 = vector.shape_cast %41 : vector<1x1x16x16xbf16> to vector<16x16xbf16>
    %cst_41 = arith.constant dense<0.000000e+00> : vector<8x16xf32>
    %43 = tpu.matmul %39, %42, %cst_41 {dimension_numbers = #tpu.dot_dimension_numbers<[1], [0], [0], [1], [0, 0, 1, 1], [], []>} : vector<8x16xbf16>, vector<16x16xbf16>, vector<8x16xf32> -> vector<8x16xf32>
    %44 = arith.addf %40, %43 : vector<8x16xf32>
    %c0_42 = arith.constant 0 : index
    %c0_43 = arith.constant 0 : index
    %45 = vector.load %arg7[%c0_42, %c0_43] : memref<8x16xf32, #tpu.memory_space<vmem>>, vector<8x16xf32>
    tpu.vector_store %arg7[%c0_42, %c0_43], %44 {strides = array<i32>} : memref<8x16xf32, #tpu.memory_space<vmem>>, vector<8x16xf32>,
    %46 = vector.extract_strided_slice %5 {offsets = [5, 0], sizes = [8, 16], strides = [1, 1]} : vector<14x16xf32> to vector<8x16xf32>
    %47 = arith.truncf %46 : vector<8x16xf32> to vector<8x16xbf16>
    %c0_44 = arith.constant 0 : index
    %c0_45 = arith.constant 0 : index
    %48 = vector.load %arg7[%c0_44, %c0_45] : memref<8x16xf32, #tpu.memory_space<vmem>>, vector<8x16xf32>
    %c0_46 = arith.constant 0 : index
    %c5 = arith.constant 5 : index
    %c0_47 = arith.constant 0 : index
    %c0_48 = arith.constant 0 : index
    %49 = vector.load %arg4[%c0_46, %c5, %c0_47, %c0_48] : memref<1x7x16x16xbf16, #tpu.memory_space<vmem>>, vector<1x1x16x16xbf16>
    %50 = vector.shape_cast %49 : vector<1x1x16x16xbf16> to vector<16x16xbf16>
    %cst_49 = arith.constant dense<0.000000e+00> : vector<8x16xf32>
    %51 = tpu.matmul %47, %50, %cst_49 {dimension_numbers = #tpu.dot_dimension_numbers<[1], [0], [0], [1], [0, 0, 1, 1], [], []>} : vector<8x16xbf16>, vector<16x16xbf16>, vector<8x16xf32> -> vector<8x16xf32>
    %52 = arith.addf %48, %51 : vector<8x16xf32>
    %c0_50 = arith.constant 0 : index
    %c0_51 = arith.constant 0 : index
    %53 = vector.load %arg7[%c0_50, %c0_51] : memref<8x16xf32, #tpu.memory_space<vmem>>, vector<8x16xf32>
    tpu.vector_store %arg7[%c0_50, %c0_51], %52 {strides = array<i32>} : memref<8x16xf32, #tpu.memory_space<vmem>>, vector<8x16xf32>,
    %54 = vector.extract_strided_slice %5 {offsets = [6, 0], sizes = [8, 16], strides = [1, 1]} : vector<14x16xf32> to vector<8x16xf32>
    %55 = arith.truncf %54 : vector<8x16xf32> to vector<8x16xbf16>
    %c0_52 = arith.constant 0 : index
    %c0_53 = arith.constant 0 : index
    %56 = vector.load %arg7[%c0_52, %c0_53] : memref<8x16xf32, #tpu.memory_space<vmem>>, vector<8x16xf32>
    %c0_54 = arith.constant 0 : index
    %c6 = arith.constant 6 : index
    %c0_55 = arith.constant 0 : index
    %c0_56 = arith.constant 0 : index
    %57 = vector.load %arg4[%c0_54, %c6, %c0_55, %c0_56] : memref<1x7x16x16xbf16, #tpu.memory_space<vmem>>, vector<1x1x16x16xbf16>
    %58 = vector.shape_cast %57 : vector<1x1x16x16xbf16> to vector<16x16xbf16>
    %cst_57 = arith.constant dense<0.000000e+00> : vector<8x16xf32>
    %59 = tpu.matmul %55, %58, %cst_57 {dimension_numbers = #tpu.dot_dimension_numbers<[1], [0], [0], [1], [0, 0, 1, 1], [], []>} : vector<8x16xbf16>, vector<16x16xbf16>, vector<8x16xf32> -> vector<8x16xf32>
    %60 = arith.addf %56, %59 : vector<8x16xf32>
    %c0_58 = arith.constant 0 : index
    %c0_59 = arith.constant 0 : index
    %61 = vector.load %arg7[%c0_58, %c0_59] : memref<8x16xf32, #tpu.memory_space<vmem>>, vector<8x16xf32>
    tpu.vector_store %arg7[%c0_58, %c0_59], %60 {strides = array<i32>} : memref<8x16xf32, #tpu.memory_space<vmem>>, vector<8x16xf32>,
    %c6_i32 = arith.constant 6 : i32
    %62 = arith.cmpi eq, %arg2, %c6_i32 : i32
    %63 = arith.extui %62 : i1 to i32
    %c0_i32_60 = arith.constant 0 : i32
    %64 = arith.cmpi ne, %63, %c0_i32_60 : i32
    scf.if %64 {
      %c0_61 = arith.constant 0 : index
      %c0_62 = arith.constant 0 : index
      %65 = vector.load %arg7[%c0_61, %c0_62] : memref<8x16xf32, #tpu.memory_space<vmem>>, vector<8x16xf32>
      %c0_63 = arith.constant 0 : index
      %c0_64 = arith.constant 0 : index
      %66 = vector.load %arg5[%c0_63, %c0_64] : memref<1x16xf32, #tpu.memory_space<vmem>>, vector<1x16xf32>
      %67 = vector.broadcast %66 : vector<1x16xf32> to vector<8x16xf32>
      %68 = arith.addf %65, %67 : vector<8x16xf32>
      %cst_65 = arith.constant 0.000000e+00 : f32
      %69 = vector.broadcast %cst_65 : f32 to vector<8x16xf32>
      %70 = arith.maximumf %68, %69 : vector<8x16xf32>
      %71 = arith.truncf %70 : vector<8x16xf32> to vector<8x16xbf16>
      %c0_66 = arith.constant 0 : index
      %c0_67 = arith.constant 0 : index
      %c0_68 = arith.constant 0 : index
      %c0_69 = arith.constant 0 : index
      %72 = vector.load %arg6[%c0_66, %c0_67, %c0_68, %c0_69] : memref<1x1x8x16xbf16, #tpu.memory_space<vmem>>, vector<1x1x8x16xbf16>
      %73 = vector.shape_cast %72 : vector<1x1x8x16xbf16> to vector<8x16xbf16>
      %74 = vector.shape_cast %71 : vector<8x16xbf16> to vector<1x1x8x16xbf16>
      tpu.vector_store %arg6[%c0_66, %c0_67, %c0_68, %c0_69], %74 {strides = array<i32>} : memref<1x1x8x16xbf16, #tpu.memory_space<vmem>>, vector<1x1x8x16xbf16>,
    } else {
    }
    return
  }
  func.func @transform_0(%arg0: i32, %arg1: i32, %arg2: i32) -> (i32, i32, i32, i32) {
    %0 = arith.addi %arg1, %arg2 : i32
    %c0_i32 = arith.constant 0 : i32
    %c0_i32_0 = arith.constant 0 : i32
    %c0_i32_1 = arith.constant 0 : i32
    return %arg0, %0, %c0_i32, %c0_i32_0 : i32, i32, i32, i32
  }
  func.func @transform_1(%arg0: i32, %arg1: i32, %arg2: i32) -> (i32, i32, i32, i32) {
    %c0_i32 = arith.constant 0 : i32
    %c0_i32_0 = arith.constant 0 : i32
    %c0_i32_1 = arith.constant 0 : i32
    %c0_i32_2 = arith.constant 0 : i32
    return %arg2, %c0_i32, %c0_i32_0, %c0_i32_1 : i32, i32, i32, i32
  }
  func.func @transform_2(%arg0: i32, %arg1: i32, %arg2: i32) -> (i32, i32) {
    %c0_i32 = arith.constant 0 : i32
    %c0_i32_0 = arith.constant 0 : i32
    %c0_i32_1 = arith.constant 0 : i32
    return %c0_i32, %c0_i32_0 : i32, i32
  }
  func.func @transform_3(%arg0: i32, %arg1: i32, %arg2: i32) -> (i32, i32, i32, i32) {
    %c0_i32 = arith.constant 0 : i32
    %c0_i32_0 = arith.constant 0 : i32
    %c0_i32_1 = arith.constant 0 : i32
    return %arg0, %arg1, %c0_i32, %c0_i32_0 : i32, i32, i32, i32
  }
}

module attributes {stable_mosaic.version = 11 : i64} {
  func.func @_conv_row_kernel(%arg0: i32, %arg1: i32, %arg2: i32, %arg3: memref<1x1x8x16xbf16, #tpu.memory_space<vmem>>, %arg4: memref<1x5x16x16xbf16, #tpu.memory_space<vmem>>, %arg5: memref<1x16xf32, #tpu.memory_space<vmem>>, %arg6: memref<1x1x4x16xbf16, #tpu.memory_space<vmem>>, %arg7: memref<4x16xf32, #tpu.memory_space<vmem>>) attributes {dimension_semantics = [#tpu.dimension_semantics<parallel>, #tpu.dimension_semantics<parallel>, #tpu.dimension_semantics<arbitrary>], iteration_bounds = array<i64: 2, 4, 5>, scalar_prefetch = 0 : i64, scratch_operands = 1 : i64, tpu.core_type = #tpu.core_type<tc>, window_params = [{transform_indices = @transform_0, window_bounds = array<i64: 1, 1, 8, 16>}, {transform_indices = @transform_1, window_bounds = array<i64: 1, 5, 16, 16>}, {pipeline_mode = #tpu.pipeline_mode<synchronous>, transform_indices = @transform_2, window_bounds = array<i64: 1, 16>}, {transform_indices = @transform_3, window_bounds = array<i64: 1, 1, 4, 16>}]} {
    %c0_i32 = arith.constant 0 : i32
    %0 = arith.cmpi eq, %arg2, %c0_i32 : i32
    %1 = arith.extui %0 : i1 to i32
    %c0_i32_0 = arith.constant 0 : i32
    %2 = arith.cmpi ne, %1, %c0_i32_0 : i32
    scf.if %2 {
      %cst_45 = arith.constant 0.000000e+00 : f32
      %49 = vector.broadcast %cst_45 : f32 to vector<4x16xf32>
      %c0_46 = arith.constant 0 : index
      %c0_47 = arith.constant 0 : index
      %50 = vector.load %arg7[%c0_46, %c0_47] : memref<4x16xf32, #tpu.memory_space<vmem>>, vector<4x16xf32>
      tpu.vector_store %arg7[%c0_46, %c0_47], %49 {strides = array<i32>} : memref<4x16xf32, #tpu.memory_space<vmem>>, vector<4x16xf32>,
    } else {
    }
    %c0 = arith.constant 0 : index
    %c0_1 = arith.constant 0 : index
    %c0_2 = arith.constant 0 : index
    %c0_3 = arith.constant 0 : index
    %3 = vector.load %arg3[%c0, %c0_1, %c0_2, %c0_3] : memref<1x1x8x16xbf16, #tpu.memory_space<vmem>>, vector<1x1x8x16xbf16>
    %4 = vector.shape_cast %3 : vector<1x1x8x16xbf16> to vector<8x16xbf16>
    %5 = arith.extf %4 : vector<8x16xbf16> to vector<8x16xf32>
    %6 = vector.extract_strided_slice %5 {offsets = [0, 0], sizes = [4, 16], strides = [1, 1]} : vector<8x16xf32> to vector<4x16xf32>
    %7 = arith.truncf %6 : vector<4x16xf32> to vector<4x16xbf16>
    %c0_4 = arith.constant 0 : index
    %c0_5 = arith.constant 0 : index
    %8 = vector.load %arg7[%c0_4, %c0_5] : memref<4x16xf32, #tpu.memory_space<vmem>>, vector<4x16xf32>
    %c0_6 = arith.constant 0 : index
    %c0_7 = arith.constant 0 : index
    %c0_8 = arith.constant 0 : index
    %c0_9 = arith.constant 0 : index
    %9 = vector.load %arg4[%c0_6, %c0_7, %c0_8, %c0_9] : memref<1x5x16x16xbf16, #tpu.memory_space<vmem>>, vector<1x1x16x16xbf16>
    %10 = vector.shape_cast %9 : vector<1x1x16x16xbf16> to vector<16x16xbf16>
    %cst = arith.constant dense<0.000000e+00> : vector<4x16xf32>
    %11 = tpu.matmul %7, %10, %cst {dimension_numbers = #tpu.dot_dimension_numbers<[1], [0], [0], [1], [0, 0, 1, 1], [], []>} : vector<4x16xbf16>, vector<16x16xbf16>, vector<4x16xf32> -> vector<4x16xf32>
    %12 = arith.addf %8, %11 : vector<4x16xf32>
    %c0_10 = arith.constant 0 : index
    %c0_11 = arith.constant 0 : index
    %13 = vector.load %arg7[%c0_10, %c0_11] : memref<4x16xf32, #tpu.memory_space<vmem>>, vector<4x16xf32>
    tpu.vector_store %arg7[%c0_10, %c0_11], %12 {strides = array<i32>} : memref<4x16xf32, #tpu.memory_space<vmem>>, vector<4x16xf32>,
    %14 = vector.extract_strided_slice %5 {offsets = [1, 0], sizes = [4, 16], strides = [1, 1]} : vector<8x16xf32> to vector<4x16xf32>
    %15 = arith.truncf %14 : vector<4x16xf32> to vector<4x16xbf16>
    %c0_12 = arith.constant 0 : index
    %c0_13 = arith.constant 0 : index
    %16 = vector.load %arg7[%c0_12, %c0_13] : memref<4x16xf32, #tpu.memory_space<vmem>>, vector<4x16xf32>
    %c0_14 = arith.constant 0 : index
    %c1 = arith.constant 1 : index
    %c0_15 = arith.constant 0 : index
    %c0_16 = arith.constant 0 : index
    %17 = vector.load %arg4[%c0_14, %c1, %c0_15, %c0_16] : memref<1x5x16x16xbf16, #tpu.memory_space<vmem>>, vector<1x1x16x16xbf16>
    %18 = vector.shape_cast %17 : vector<1x1x16x16xbf16> to vector<16x16xbf16>
    %cst_17 = arith.constant dense<0.000000e+00> : vector<4x16xf32>
    %19 = tpu.matmul %15, %18, %cst_17 {dimension_numbers = #tpu.dot_dimension_numbers<[1], [0], [0], [1], [0, 0, 1, 1], [], []>} : vector<4x16xbf16>, vector<16x16xbf16>, vector<4x16xf32> -> vector<4x16xf32>
    %20 = arith.addf %16, %19 : vector<4x16xf32>
    %c0_18 = arith.constant 0 : index
    %c0_19 = arith.constant 0 : index
    %21 = vector.load %arg7[%c0_18, %c0_19] : memref<4x16xf32, #tpu.memory_space<vmem>>, vector<4x16xf32>
    tpu.vector_store %arg7[%c0_18, %c0_19], %20 {strides = array<i32>} : memref<4x16xf32, #tpu.memory_space<vmem>>, vector<4x16xf32>,
    %22 = vector.extract_strided_slice %5 {offsets = [2, 0], sizes = [4, 16], strides = [1, 1]} : vector<8x16xf32> to vector<4x16xf32>
    %23 = arith.truncf %22 : vector<4x16xf32> to vector<4x16xbf16>
    %c0_20 = arith.constant 0 : index
    %c0_21 = arith.constant 0 : index
    %24 = vector.load %arg7[%c0_20, %c0_21] : memref<4x16xf32, #tpu.memory_space<vmem>>, vector<4x16xf32>
    %c0_22 = arith.constant 0 : index
    %c2 = arith.constant 2 : index
    %c0_23 = arith.constant 0 : index
    %c0_24 = arith.constant 0 : index
    %25 = vector.load %arg4[%c0_22, %c2, %c0_23, %c0_24] : memref<1x5x16x16xbf16, #tpu.memory_space<vmem>>, vector<1x1x16x16xbf16>
    %26 = vector.shape_cast %25 : vector<1x1x16x16xbf16> to vector<16x16xbf16>
    %cst_25 = arith.constant dense<0.000000e+00> : vector<4x16xf32>
    %27 = tpu.matmul %23, %26, %cst_25 {dimension_numbers = #tpu.dot_dimension_numbers<[1], [0], [0], [1], [0, 0, 1, 1], [], []>} : vector<4x16xbf16>, vector<16x16xbf16>, vector<4x16xf32> -> vector<4x16xf32>
    %28 = arith.addf %24, %27 : vector<4x16xf32>
    %c0_26 = arith.constant 0 : index
    %c0_27 = arith.constant 0 : index
    %29 = vector.load %arg7[%c0_26, %c0_27] : memref<4x16xf32, #tpu.memory_space<vmem>>, vector<4x16xf32>
    tpu.vector_store %arg7[%c0_26, %c0_27], %28 {strides = array<i32>} : memref<4x16xf32, #tpu.memory_space<vmem>>, vector<4x16xf32>,
    %30 = vector.extract_strided_slice %5 {offsets = [3, 0], sizes = [4, 16], strides = [1, 1]} : vector<8x16xf32> to vector<4x16xf32>
    %31 = arith.truncf %30 : vector<4x16xf32> to vector<4x16xbf16>
    %c0_28 = arith.constant 0 : index
    %c0_29 = arith.constant 0 : index
    %32 = vector.load %arg7[%c0_28, %c0_29] : memref<4x16xf32, #tpu.memory_space<vmem>>, vector<4x16xf32>
    %c0_30 = arith.constant 0 : index
    %c3 = arith.constant 3 : index
    %c0_31 = arith.constant 0 : index
    %c0_32 = arith.constant 0 : index
    %33 = vector.load %arg4[%c0_30, %c3, %c0_31, %c0_32] : memref<1x5x16x16xbf16, #tpu.memory_space<vmem>>, vector<1x1x16x16xbf16>
    %34 = vector.shape_cast %33 : vector<1x1x16x16xbf16> to vector<16x16xbf16>
    %cst_33 = arith.constant dense<0.000000e+00> : vector<4x16xf32>
    %35 = tpu.matmul %31, %34, %cst_33 {dimension_numbers = #tpu.dot_dimension_numbers<[1], [0], [0], [1], [0, 0, 1, 1], [], []>} : vector<4x16xbf16>, vector<16x16xbf16>, vector<4x16xf32> -> vector<4x16xf32>
    %36 = arith.addf %32, %35 : vector<4x16xf32>
    %c0_34 = arith.constant 0 : index
    %c0_35 = arith.constant 0 : index
    %37 = vector.load %arg7[%c0_34, %c0_35] : memref<4x16xf32, #tpu.memory_space<vmem>>, vector<4x16xf32>
    tpu.vector_store %arg7[%c0_34, %c0_35], %36 {strides = array<i32>} : memref<4x16xf32, #tpu.memory_space<vmem>>, vector<4x16xf32>,
    %38 = vector.extract_strided_slice %5 {offsets = [4, 0], sizes = [4, 16], strides = [1, 1]} : vector<8x16xf32> to vector<4x16xf32>
    %39 = arith.truncf %38 : vector<4x16xf32> to vector<4x16xbf16>
    %c0_36 = arith.constant 0 : index
    %c0_37 = arith.constant 0 : index
    %40 = vector.load %arg7[%c0_36, %c0_37] : memref<4x16xf32, #tpu.memory_space<vmem>>, vector<4x16xf32>
    %c0_38 = arith.constant 0 : index
    %c4 = arith.constant 4 : index
    %c0_39 = arith.constant 0 : index
    %c0_40 = arith.constant 0 : index
    %41 = vector.load %arg4[%c0_38, %c4, %c0_39, %c0_40] : memref<1x5x16x16xbf16, #tpu.memory_space<vmem>>, vector<1x1x16x16xbf16>
    %42 = vector.shape_cast %41 : vector<1x1x16x16xbf16> to vector<16x16xbf16>
    %cst_41 = arith.constant dense<0.000000e+00> : vector<4x16xf32>
    %43 = tpu.matmul %39, %42, %cst_41 {dimension_numbers = #tpu.dot_dimension_numbers<[1], [0], [0], [1], [0, 0, 1, 1], [], []>} : vector<4x16xbf16>, vector<16x16xbf16>, vector<4x16xf32> -> vector<4x16xf32>
    %44 = arith.addf %40, %43 : vector<4x16xf32>
    %c0_42 = arith.constant 0 : index
    %c0_43 = arith.constant 0 : index
    %45 = vector.load %arg7[%c0_42, %c0_43] : memref<4x16xf32, #tpu.memory_space<vmem>>, vector<4x16xf32>
    tpu.vector_store %arg7[%c0_42, %c0_43], %44 {strides = array<i32>} : memref<4x16xf32, #tpu.memory_space<vmem>>, vector<4x16xf32>,
    %c4_i32 = arith.constant 4 : i32
    %46 = arith.cmpi eq, %arg2, %c4_i32 : i32
    %47 = arith.extui %46 : i1 to i32
    %c0_i32_44 = arith.constant 0 : i32
    %48 = arith.cmpi ne, %47, %c0_i32_44 : i32
    scf.if %48 {
      %c0_45 = arith.constant 0 : index
      %c0_46 = arith.constant 0 : index
      %49 = vector.load %arg7[%c0_45, %c0_46] : memref<4x16xf32, #tpu.memory_space<vmem>>, vector<4x16xf32>
      %c0_47 = arith.constant 0 : index
      %c0_48 = arith.constant 0 : index
      %50 = vector.load %arg5[%c0_47, %c0_48] : memref<1x16xf32, #tpu.memory_space<vmem>>, vector<1x16xf32>
      %51 = vector.broadcast %50 : vector<1x16xf32> to vector<4x16xf32>
      %52 = arith.addf %49, %51 : vector<4x16xf32>
      %cst_49 = arith.constant 0.000000e+00 : f32
      %53 = vector.broadcast %cst_49 : f32 to vector<4x16xf32>
      %54 = arith.maximumf %52, %53 : vector<4x16xf32>
      %55 = arith.truncf %54 : vector<4x16xf32> to vector<4x16xbf16>
      %c0_50 = arith.constant 0 : index
      %c0_51 = arith.constant 0 : index
      %c0_52 = arith.constant 0 : index
      %c0_53 = arith.constant 0 : index
      %56 = vector.load %arg6[%c0_50, %c0_51, %c0_52, %c0_53] : memref<1x1x4x16xbf16, #tpu.memory_space<vmem>>, vector<1x1x4x16xbf16>
      %57 = vector.shape_cast %56 : vector<1x1x4x16xbf16> to vector<4x16xbf16>
      %58 = vector.shape_cast %55 : vector<4x16xbf16> to vector<1x1x4x16xbf16>
      tpu.vector_store %arg6[%c0_50, %c0_51, %c0_52, %c0_53], %58 {strides = array<i32>} : memref<1x1x4x16xbf16, #tpu.memory_space<vmem>>, vector<1x1x4x16xbf16>,
    } else {
    }
    return
  }
  func.func @transform_0(%arg0: i32, %arg1: i32, %arg2: i32) -> (i32, i32, i32, i32) {
    %0 = arith.addi %arg1, %arg2 : i32
    %c0_i32 = arith.constant 0 : i32
    %c0_i32_0 = arith.constant 0 : i32
    %c0_i32_1 = arith.constant 0 : i32
    return %arg0, %0, %c0_i32, %c0_i32_0 : i32, i32, i32, i32
  }
  func.func @transform_1(%arg0: i32, %arg1: i32, %arg2: i32) -> (i32, i32, i32, i32) {
    %c0_i32 = arith.constant 0 : i32
    %c0_i32_0 = arith.constant 0 : i32
    %c0_i32_1 = arith.constant 0 : i32
    %c0_i32_2 = arith.constant 0 : i32
    return %arg2, %c0_i32, %c0_i32_0, %c0_i32_1 : i32, i32, i32, i32
  }
  func.func @transform_2(%arg0: i32, %arg1: i32, %arg2: i32) -> (i32, i32) {
    %c0_i32 = arith.constant 0 : i32
    %c0_i32_0 = arith.constant 0 : i32
    %c0_i32_1 = arith.constant 0 : i32
    return %c0_i32, %c0_i32_0 : i32, i32
  }
  func.func @transform_3(%arg0: i32, %arg1: i32, %arg2: i32) -> (i32, i32, i32, i32) {
    %c0_i32 = arith.constant 0 : i32
    %c0_i32_0 = arith.constant 0 : i32
    %c0_i32_1 = arith.constant 0 : i32
    return %arg0, %arg1, %c0_i32, %c0_i32_0 : i32, i32, i32, i32
  }
}

module attributes {stable_mosaic.version = 11 : i64} {
  func.func @_conv_row_kernel(%arg0: i32, %arg1: i32, %arg2: i32, %arg3: memref<1x1x4x16xbf16, #tpu.memory_space<vmem>>, %arg4: memref<1x3x16x32xbf16, #tpu.memory_space<vmem>>, %arg5: memref<1x32xf32, #tpu.memory_space<vmem>>, %arg6: memref<1x1x2x32xbf16, #tpu.memory_space<vmem>>, %arg7: memref<2x32xf32, #tpu.memory_space<vmem>>) attributes {dimension_semantics = [#tpu.dimension_semantics<parallel>, #tpu.dimension_semantics<parallel>, #tpu.dimension_semantics<arbitrary>], iteration_bounds = array<i64: 2, 2, 3>, scalar_prefetch = 0 : i64, scratch_operands = 1 : i64, tpu.core_type = #tpu.core_type<tc>, window_params = [{transform_indices = @transform_0, window_bounds = array<i64: 1, 1, 4, 16>}, {transform_indices = @transform_1, window_bounds = array<i64: 1, 3, 16, 32>}, {pipeline_mode = #tpu.pipeline_mode<synchronous>, transform_indices = @transform_2, window_bounds = array<i64: 1, 32>}, {transform_indices = @transform_3, window_bounds = array<i64: 1, 1, 2, 32>}]} {
    %c0_i32 = arith.constant 0 : i32
    %0 = arith.cmpi eq, %arg2, %c0_i32 : i32
    %1 = arith.extui %0 : i1 to i32
    %c0_i32_0 = arith.constant 0 : i32
    %2 = arith.cmpi ne, %1, %c0_i32_0 : i32
    scf.if %2 {
      %cst_29 = arith.constant 0.000000e+00 : f32
      %33 = vector.broadcast %cst_29 : f32 to vector<2x32xf32>
      %c0_30 = arith.constant 0 : index
      %c0_31 = arith.constant 0 : index
      %34 = vector.load %arg7[%c0_30, %c0_31] : memref<2x32xf32, #tpu.memory_space<vmem>>, vector<2x32xf32>
      tpu.vector_store %arg7[%c0_30, %c0_31], %33 {strides = array<i32>} : memref<2x32xf32, #tpu.memory_space<vmem>>, vector<2x32xf32>,
    } else {
    }
    %c0 = arith.constant 0 : index
    %c0_1 = arith.constant 0 : index
    %c0_2 = arith.constant 0 : index
    %c0_3 = arith.constant 0 : index
    %3 = vector.load %arg3[%c0, %c0_1, %c0_2, %c0_3] : memref<1x1x4x16xbf16, #tpu.memory_space<vmem>>, vector<1x1x4x16xbf16>
    %4 = vector.shape_cast %3 : vector<1x1x4x16xbf16> to vector<4x16xbf16>
    %5 = arith.extf %4 : vector<4x16xbf16> to vector<4x16xf32>
    %6 = vector.extract_strided_slice %5 {offsets = [0, 0], sizes = [2, 16], strides = [1, 1]} : vector<4x16xf32> to vector<2x16xf32>
    %7 = arith.truncf %6 : vector<2x16xf32> to vector<2x16xbf16>
    %c0_4 = arith.constant 0 : index
    %c0_5 = arith.constant 0 : index
    %8 = vector.load %arg7[%c0_4, %c0_5] : memref<2x32xf32, #tpu.memory_space<vmem>>, vector<2x32xf32>
    %c0_6 = arith.constant 0 : index
    %c0_7 = arith.constant 0 : index
    %c0_8 = arith.constant 0 : index
    %c0_9 = arith.constant 0 : index
    %9 = vector.load %arg4[%c0_6, %c0_7, %c0_8, %c0_9] : memref<1x3x16x32xbf16, #tpu.memory_space<vmem>>, vector<1x1x16x32xbf16>
    %10 = vector.shape_cast %9 : vector<1x1x16x32xbf16> to vector<16x32xbf16>
    %cst = arith.constant dense<0.000000e+00> : vector<2x32xf32>
    %11 = tpu.matmul %7, %10, %cst {dimension_numbers = #tpu.dot_dimension_numbers<[1], [0], [0], [1], [0, 0, 1, 1], [], []>} : vector<2x16xbf16>, vector<16x32xbf16>, vector<2x32xf32> -> vector<2x32xf32>
    %12 = arith.addf %8, %11 : vector<2x32xf32>
    %c0_10 = arith.constant 0 : index
    %c0_11 = arith.constant 0 : index
    %13 = vector.load %arg7[%c0_10, %c0_11] : memref<2x32xf32, #tpu.memory_space<vmem>>, vector<2x32xf32>
    tpu.vector_store %arg7[%c0_10, %c0_11], %12 {strides = array<i32>} : memref<2x32xf32, #tpu.memory_space<vmem>>, vector<2x32xf32>,
    %14 = vector.extract_strided_slice %5 {offsets = [1, 0], sizes = [2, 16], strides = [1, 1]} : vector<4x16xf32> to vector<2x16xf32>
    %15 = arith.truncf %14 : vector<2x16xf32> to vector<2x16xbf16>
    %c0_12 = arith.constant 0 : index
    %c0_13 = arith.constant 0 : index
    %16 = vector.load %arg7[%c0_12, %c0_13] : memref<2x32xf32, #tpu.memory_space<vmem>>, vector<2x32xf32>
    %c0_14 = arith.constant 0 : index
    %c1 = arith.constant 1 : index
    %c0_15 = arith.constant 0 : index
    %c0_16 = arith.constant 0 : index
    %17 = vector.load %arg4[%c0_14, %c1, %c0_15, %c0_16] : memref<1x3x16x32xbf16, #tpu.memory_space<vmem>>, vector<1x1x16x32xbf16>
    %18 = vector.shape_cast %17 : vector<1x1x16x32xbf16> to vector<16x32xbf16>
    %cst_17 = arith.constant dense<0.000000e+00> : vector<2x32xf32>
    %19 = tpu.matmul %15, %18, %cst_17 {dimension_numbers = #tpu.dot_dimension_numbers<[1], [0], [0], [1], [0, 0, 1, 1], [], []>} : vector<2x16xbf16>, vector<16x32xbf16>, vector<2x32xf32> -> vector<2x32xf32>
    %20 = arith.addf %16, %19 : vector<2x32xf32>
    %c0_18 = arith.constant 0 : index
    %c0_19 = arith.constant 0 : index
    %21 = vector.load %arg7[%c0_18, %c0_19] : memref<2x32xf32, #tpu.memory_space<vmem>>, vector<2x32xf32>
    tpu.vector_store %arg7[%c0_18, %c0_19], %20 {strides = array<i32>} : memref<2x32xf32, #tpu.memory_space<vmem>>, vector<2x32xf32>,
    %22 = vector.extract_strided_slice %5 {offsets = [2, 0], sizes = [2, 16], strides = [1, 1]} : vector<4x16xf32> to vector<2x16xf32>
    %23 = arith.truncf %22 : vector<2x16xf32> to vector<2x16xbf16>
    %c0_20 = arith.constant 0 : index
    %c0_21 = arith.constant 0 : index
    %24 = vector.load %arg7[%c0_20, %c0_21] : memref<2x32xf32, #tpu.memory_space<vmem>>, vector<2x32xf32>
    %c0_22 = arith.constant 0 : index
    %c2 = arith.constant 2 : index
    %c0_23 = arith.constant 0 : index
    %c0_24 = arith.constant 0 : index
    %25 = vector.load %arg4[%c0_22, %c2, %c0_23, %c0_24] : memref<1x3x16x32xbf16, #tpu.memory_space<vmem>>, vector<1x1x16x32xbf16>
    %26 = vector.shape_cast %25 : vector<1x1x16x32xbf16> to vector<16x32xbf16>
    %cst_25 = arith.constant dense<0.000000e+00> : vector<2x32xf32>
    %27 = tpu.matmul %23, %26, %cst_25 {dimension_numbers = #tpu.dot_dimension_numbers<[1], [0], [0], [1], [0, 0, 1, 1], [], []>} : vector<2x16xbf16>, vector<16x32xbf16>, vector<2x32xf32> -> vector<2x32xf32>
    %28 = arith.addf %24, %27 : vector<2x32xf32>
    %c0_26 = arith.constant 0 : index
    %c0_27 = arith.constant 0 : index
    %29 = vector.load %arg7[%c0_26, %c0_27] : memref<2x32xf32, #tpu.memory_space<vmem>>, vector<2x32xf32>
    tpu.vector_store %arg7[%c0_26, %c0_27], %28 {strides = array<i32>} : memref<2x32xf32, #tpu.memory_space<vmem>>, vector<2x32xf32>,
    %c2_i32 = arith.constant 2 : i32
    %30 = arith.cmpi eq, %arg2, %c2_i32 : i32
    %31 = arith.extui %30 : i1 to i32
    %c0_i32_28 = arith.constant 0 : i32
    %32 = arith.cmpi ne, %31, %c0_i32_28 : i32
    scf.if %32 {
      %c0_29 = arith.constant 0 : index
      %c0_30 = arith.constant 0 : index
      %33 = vector.load %arg7[%c0_29, %c0_30] : memref<2x32xf32, #tpu.memory_space<vmem>>, vector<2x32xf32>
      %c0_31 = arith.constant 0 : index
      %c0_32 = arith.constant 0 : index
      %34 = vector.load %arg5[%c0_31, %c0_32] : memref<1x32xf32, #tpu.memory_space<vmem>>, vector<1x32xf32>
      %35 = vector.broadcast %34 : vector<1x32xf32> to vector<2x32xf32>
      %36 = arith.addf %33, %35 : vector<2x32xf32>
      %cst_33 = arith.constant 0.000000e+00 : f32
      %37 = vector.broadcast %cst_33 : f32 to vector<2x32xf32>
      %38 = arith.maximumf %36, %37 : vector<2x32xf32>
      %39 = arith.truncf %38 : vector<2x32xf32> to vector<2x32xbf16>
      %c0_34 = arith.constant 0 : index
      %c0_35 = arith.constant 0 : index
      %c0_36 = arith.constant 0 : index
      %c0_37 = arith.constant 0 : index
      %40 = vector.load %arg6[%c0_34, %c0_35, %c0_36, %c0_37] : memref<1x1x2x32xbf16, #tpu.memory_space<vmem>>, vector<1x1x2x32xbf16>
      %41 = vector.shape_cast %40 : vector<1x1x2x32xbf16> to vector<2x32xbf16>
      %42 = vector.shape_cast %39 : vector<2x32xbf16> to vector<1x1x2x32xbf16>
      tpu.vector_store %arg6[%c0_34, %c0_35, %c0_36, %c0_37], %42 {strides = array<i32>} : memref<1x1x2x32xbf16, #tpu.memory_space<vmem>>, vector<1x1x2x32xbf16>,
    } else {
    }
    return
  }
  func.func @transform_0(%arg0: i32, %arg1: i32, %arg2: i32) -> (i32, i32, i32, i32) {
    %0 = arith.addi %arg1, %arg2 : i32
    %c0_i32 = arith.constant 0 : i32
    %c0_i32_0 = arith.constant 0 : i32
    %c0_i32_1 = arith.constant 0 : i32
    return %arg0, %0, %c0_i32, %c0_i32_0 : i32, i32, i32, i32
  }
  func.func @transform_1(%arg0: i32, %arg1: i32, %arg2: i32) -> (i32, i32, i32, i32) {
    %c0_i32 = arith.constant 0 : i32
    %c0_i32_0 = arith.constant 0 : i32
    %c0_i32_1 = arith.constant 0 : i32
    %c0_i32_2 = arith.constant 0 : i32
    return %arg2, %c0_i32, %c0_i32_0, %c0_i32_1 : i32, i32, i32, i32
  }
  func.func @transform_2(%arg0: i32, %arg1: i32, %arg2: i32) -> (i32, i32) {
    %c0_i32 = arith.constant 0 : i32
    %c0_i32_0 = arith.constant 0 : i32
    %c0_i32_1 = arith.constant 0 : i32
    return %c0_i32, %c0_i32_0 : i32, i32
  }
  func.func @transform_3(%arg0: i32, %arg1: i32, %arg2: i32) -> (i32, i32, i32, i32) {
    %c0_i32 = arith.constant 0 : i32
    %c0_i32_0 = arith.constant 0 : i32
    %c0_i32_1 = arith.constant 0 : i32
    return %arg0, %arg1, %c0_i32, %c0_i32_0 : i32, i32, i32, i32
  }
}

module attributes {stable_mosaic.version = 11 : i64} {
  func.func @_conv_row_kernel(%arg0: i32, %arg1: i32, %arg2: i32, %arg3: memref<1x1x4x32xbf16, #tpu.memory_space<vmem>>, %arg4: memref<1x3x32x32xbf16, #tpu.memory_space<vmem>>, %arg5: memref<1x32xf32, #tpu.memory_space<vmem>>, %arg6: memref<1x1x2x32xbf16, #tpu.memory_space<vmem>>, %arg7: memref<2x32xf32, #tpu.memory_space<vmem>>) attributes {dimension_semantics = [#tpu.dimension_semantics<parallel>, #tpu.dimension_semantics<parallel>, #tpu.dimension_semantics<arbitrary>], iteration_bounds = array<i64: 2, 2, 3>, scalar_prefetch = 0 : i64, scratch_operands = 1 : i64, tpu.core_type = #tpu.core_type<tc>, window_params = [{transform_indices = @transform_0, window_bounds = array<i64: 1, 1, 4, 32>}, {transform_indices = @transform_1, window_bounds = array<i64: 1, 3, 32, 32>}, {pipeline_mode = #tpu.pipeline_mode<synchronous>, transform_indices = @transform_2, window_bounds = array<i64: 1, 32>}, {transform_indices = @transform_3, window_bounds = array<i64: 1, 1, 2, 32>}]} {
    %c0_i32 = arith.constant 0 : i32
    %0 = arith.cmpi eq, %arg2, %c0_i32 : i32
    %1 = arith.extui %0 : i1 to i32
    %c0_i32_0 = arith.constant 0 : i32
    %2 = arith.cmpi ne, %1, %c0_i32_0 : i32
    scf.if %2 {
      %cst_29 = arith.constant 0.000000e+00 : f32
      %33 = vector.broadcast %cst_29 : f32 to vector<2x32xf32>
      %c0_30 = arith.constant 0 : index
      %c0_31 = arith.constant 0 : index
      %34 = vector.load %arg7[%c0_30, %c0_31] : memref<2x32xf32, #tpu.memory_space<vmem>>, vector<2x32xf32>
      tpu.vector_store %arg7[%c0_30, %c0_31], %33 {strides = array<i32>} : memref<2x32xf32, #tpu.memory_space<vmem>>, vector<2x32xf32>,
    } else {
    }
    %c0 = arith.constant 0 : index
    %c0_1 = arith.constant 0 : index
    %c0_2 = arith.constant 0 : index
    %c0_3 = arith.constant 0 : index
    %3 = vector.load %arg3[%c0, %c0_1, %c0_2, %c0_3] : memref<1x1x4x32xbf16, #tpu.memory_space<vmem>>, vector<1x1x4x32xbf16>
    %4 = vector.shape_cast %3 : vector<1x1x4x32xbf16> to vector<4x32xbf16>
    %5 = arith.extf %4 : vector<4x32xbf16> to vector<4x32xf32>
    %6 = vector.extract_strided_slice %5 {offsets = [0, 0], sizes = [2, 32], strides = [1, 1]} : vector<4x32xf32> to vector<2x32xf32>
    %7 = arith.truncf %6 : vector<2x32xf32> to vector<2x32xbf16>
    %c0_4 = arith.constant 0 : index
    %c0_5 = arith.constant 0 : index
    %8 = vector.load %arg7[%c0_4, %c0_5] : memref<2x32xf32, #tpu.memory_space<vmem>>, vector<2x32xf32>
    %c0_6 = arith.constant 0 : index
    %c0_7 = arith.constant 0 : index
    %c0_8 = arith.constant 0 : index
    %c0_9 = arith.constant 0 : index
    %9 = vector.load %arg4[%c0_6, %c0_7, %c0_8, %c0_9] : memref<1x3x32x32xbf16, #tpu.memory_space<vmem>>, vector<1x1x32x32xbf16>
    %10 = vector.shape_cast %9 : vector<1x1x32x32xbf16> to vector<32x32xbf16>
    %cst = arith.constant dense<0.000000e+00> : vector<2x32xf32>
    %11 = tpu.matmul %7, %10, %cst {dimension_numbers = #tpu.dot_dimension_numbers<[1], [0], [0], [1], [0, 0, 1, 1], [], []>} : vector<2x32xbf16>, vector<32x32xbf16>, vector<2x32xf32> -> vector<2x32xf32>
    %12 = arith.addf %8, %11 : vector<2x32xf32>
    %c0_10 = arith.constant 0 : index
    %c0_11 = arith.constant 0 : index
    %13 = vector.load %arg7[%c0_10, %c0_11] : memref<2x32xf32, #tpu.memory_space<vmem>>, vector<2x32xf32>
    tpu.vector_store %arg7[%c0_10, %c0_11], %12 {strides = array<i32>} : memref<2x32xf32, #tpu.memory_space<vmem>>, vector<2x32xf32>,
    %14 = vector.extract_strided_slice %5 {offsets = [1, 0], sizes = [2, 32], strides = [1, 1]} : vector<4x32xf32> to vector<2x32xf32>
    %15 = arith.truncf %14 : vector<2x32xf32> to vector<2x32xbf16>
    %c0_12 = arith.constant 0 : index
    %c0_13 = arith.constant 0 : index
    %16 = vector.load %arg7[%c0_12, %c0_13] : memref<2x32xf32, #tpu.memory_space<vmem>>, vector<2x32xf32>
    %c0_14 = arith.constant 0 : index
    %c1 = arith.constant 1 : index
    %c0_15 = arith.constant 0 : index
    %c0_16 = arith.constant 0 : index
    %17 = vector.load %arg4[%c0_14, %c1, %c0_15, %c0_16] : memref<1x3x32x32xbf16, #tpu.memory_space<vmem>>, vector<1x1x32x32xbf16>
    %18 = vector.shape_cast %17 : vector<1x1x32x32xbf16> to vector<32x32xbf16>
    %cst_17 = arith.constant dense<0.000000e+00> : vector<2x32xf32>
    %19 = tpu.matmul %15, %18, %cst_17 {dimension_numbers = #tpu.dot_dimension_numbers<[1], [0], [0], [1], [0, 0, 1, 1], [], []>} : vector<2x32xbf16>, vector<32x32xbf16>, vector<2x32xf32> -> vector<2x32xf32>
    %20 = arith.addf %16, %19 : vector<2x32xf32>
    %c0_18 = arith.constant 0 : index
    %c0_19 = arith.constant 0 : index
    %21 = vector.load %arg7[%c0_18, %c0_19] : memref<2x32xf32, #tpu.memory_space<vmem>>, vector<2x32xf32>
    tpu.vector_store %arg7[%c0_18, %c0_19], %20 {strides = array<i32>} : memref<2x32xf32, #tpu.memory_space<vmem>>, vector<2x32xf32>,
    %22 = vector.extract_strided_slice %5 {offsets = [2, 0], sizes = [2, 32], strides = [1, 1]} : vector<4x32xf32> to vector<2x32xf32>
    %23 = arith.truncf %22 : vector<2x32xf32> to vector<2x32xbf16>
    %c0_20 = arith.constant 0 : index
    %c0_21 = arith.constant 0 : index
    %24 = vector.load %arg7[%c0_20, %c0_21] : memref<2x32xf32, #tpu.memory_space<vmem>>, vector<2x32xf32>
    %c0_22 = arith.constant 0 : index
    %c2 = arith.constant 2 : index
    %c0_23 = arith.constant 0 : index
    %c0_24 = arith.constant 0 : index
    %25 = vector.load %arg4[%c0_22, %c2, %c0_23, %c0_24] : memref<1x3x32x32xbf16, #tpu.memory_space<vmem>>, vector<1x1x32x32xbf16>
    %26 = vector.shape_cast %25 : vector<1x1x32x32xbf16> to vector<32x32xbf16>
    %cst_25 = arith.constant dense<0.000000e+00> : vector<2x32xf32>
    %27 = tpu.matmul %23, %26, %cst_25 {dimension_numbers = #tpu.dot_dimension_numbers<[1], [0], [0], [1], [0, 0, 1, 1], [], []>} : vector<2x32xbf16>, vector<32x32xbf16>, vector<2x32xf32> -> vector<2x32xf32>
    %28 = arith.addf %24, %27 : vector<2x32xf32>
    %c0_26 = arith.constant 0 : index
    %c0_27 = arith.constant 0 : index
    %29 = vector.load %arg7[%c0_26, %c0_27] : memref<2x32xf32, #tpu.memory_space<vmem>>, vector<2x32xf32>
    tpu.vector_store %arg7[%c0_26, %c0_27], %28 {strides = array<i32>} : memref<2x32xf32, #tpu.memory_space<vmem>>, vector<2x32xf32>,
    %c2_i32 = arith.constant 2 : i32
    %30 = arith.cmpi eq, %arg2, %c2_i32 : i32
    %31 = arith.extui %30 : i1 to i32
    %c0_i32_28 = arith.constant 0 : i32
    %32 = arith.cmpi ne, %31, %c0_i32_28 : i32
    scf.if %32 {
      %c0_29 = arith.constant 0 : index
      %c0_30 = arith.constant 0 : index
      %33 = vector.load %arg7[%c0_29, %c0_30] : memref<2x32xf32, #tpu.memory_space<vmem>>, vector<2x32xf32>
      %c0_31 = arith.constant 0 : index
      %c0_32 = arith.constant 0 : index
      %34 = vector.load %arg5[%c0_31, %c0_32] : memref<1x32xf32, #tpu.memory_space<vmem>>, vector<1x32xf32>
      %35 = vector.broadcast %34 : vector<1x32xf32> to vector<2x32xf32>
      %36 = arith.addf %33, %35 : vector<2x32xf32>
      %cst_33 = arith.constant 0.000000e+00 : f32
      %37 = vector.broadcast %cst_33 : f32 to vector<2x32xf32>
      %38 = arith.maximumf %36, %37 : vector<2x32xf32>
      %39 = arith.truncf %38 : vector<2x32xf32> to vector<2x32xbf16>
      %c0_34 = arith.constant 0 : index
      %c0_35 = arith.constant 0 : index
      %c0_36 = arith.constant 0 : index
      %c0_37 = arith.constant 0 : index
      %40 = vector.load %arg6[%c0_34, %c0_35, %c0_36, %c0_37] : memref<1x1x2x32xbf16, #tpu.memory_space<vmem>>, vector<1x1x2x32xbf16>
      %41 = vector.shape_cast %40 : vector<1x1x2x32xbf16> to vector<2x32xbf16>
      %42 = vector.shape_cast %39 : vector<2x32xbf16> to vector<1x1x2x32xbf16>
      tpu.vector_store %arg6[%c0_34, %c0_35, %c0_36, %c0_37], %42 {strides = array<i32>} : memref<1x1x2x32xbf16, #tpu.memory_space<vmem>>, vector<1x1x2x32xbf16>,
    } else {
    }
    return
  }
  func.func @transform_0(%arg0: i32, %arg1: i32, %arg2: i32) -> (i32, i32, i32, i32) {
    %0 = arith.addi %arg1, %arg2 : i32
    %c0_i32 = arith.constant 0 : i32
    %c0_i32_0 = arith.constant 0 : i32
    %c0_i32_1 = arith.constant 0 : i32
    return %arg0, %0, %c0_i32, %c0_i32_0 : i32, i32, i32, i32
  }
  func.func @transform_1(%arg0: i32, %arg1: i32, %arg2: i32) -> (i32, i32, i32, i32) {
    %c0_i32 = arith.constant 0 : i32
    %c0_i32_0 = arith.constant 0 : i32
    %c0_i32_1 = arith.constant 0 : i32
    %c0_i32_2 = arith.constant 0 : i32
    return %arg2, %c0_i32, %c0_i32_0, %c0_i32_1 : i32, i32, i32, i32
  }
  func.func @transform_2(%arg0: i32, %arg1: i32, %arg2: i32) -> (i32, i32) {
    %c0_i32 = arith.constant 0 : i32
    %c0_i32_0 = arith.constant 0 : i32
    %c0_i32_1 = arith.constant 0 : i32
    return %c0_i32, %c0_i32_0 : i32, i32
  }
  func.func @transform_3(%arg0: i32, %arg1: i32, %arg2: i32) -> (i32, i32, i32, i32) {
    %c0_i32 = arith.constant 0 : i32
    %c0_i32_0 = arith.constant 0 : i32
    %c0_i32_1 = arith.constant 0 : i32
    return %arg0, %arg1, %c0_i32, %c0_i32_0 : i32, i32, i32, i32
  }
}

module attributes {stable_mosaic.version = 11 : i64} {
  func.func @_conv_row_kernel(%arg0: i32, %arg1: i32, %arg2: i32, %arg3: memref<1x1x6x32xbf16, #tpu.memory_space<vmem>>, %arg4: memref<1x3x32x16xbf16, #tpu.memory_space<vmem>>, %arg5: memref<1x16xf32, #tpu.memory_space<vmem>>, %arg6: memref<1x1x4x16xbf16, #tpu.memory_space<vmem>>, %arg7: memref<4x16xf32, #tpu.memory_space<vmem>>) attributes {dimension_semantics = [#tpu.dimension_semantics<parallel>, #tpu.dimension_semantics<parallel>, #tpu.dimension_semantics<arbitrary>], iteration_bounds = array<i64: 2, 4, 3>, scalar_prefetch = 0 : i64, scratch_operands = 1 : i64, tpu.core_type = #tpu.core_type<tc>, window_params = [{transform_indices = @transform_0, window_bounds = array<i64: 1, 1, 6, 32>}, {transform_indices = @transform_1, window_bounds = array<i64: 1, 3, 32, 16>}, {pipeline_mode = #tpu.pipeline_mode<synchronous>, transform_indices = @transform_2, window_bounds = array<i64: 1, 16>}, {transform_indices = @transform_3, window_bounds = array<i64: 1, 1, 4, 16>}]} {
    %c0_i32 = arith.constant 0 : i32
    %0 = arith.cmpi eq, %arg2, %c0_i32 : i32
    %1 = arith.extui %0 : i1 to i32
    %c0_i32_0 = arith.constant 0 : i32
    %2 = arith.cmpi ne, %1, %c0_i32_0 : i32
    scf.if %2 {
      %cst_29 = arith.constant 0.000000e+00 : f32
      %33 = vector.broadcast %cst_29 : f32 to vector<4x16xf32>
      %c0_30 = arith.constant 0 : index
      %c0_31 = arith.constant 0 : index
      %34 = vector.load %arg7[%c0_30, %c0_31] : memref<4x16xf32, #tpu.memory_space<vmem>>, vector<4x16xf32>
      tpu.vector_store %arg7[%c0_30, %c0_31], %33 {strides = array<i32>} : memref<4x16xf32, #tpu.memory_space<vmem>>, vector<4x16xf32>,
    } else {
    }
    %c0 = arith.constant 0 : index
    %c0_1 = arith.constant 0 : index
    %c0_2 = arith.constant 0 : index
    %c0_3 = arith.constant 0 : index
    %3 = vector.load %arg3[%c0, %c0_1, %c0_2, %c0_3] : memref<1x1x6x32xbf16, #tpu.memory_space<vmem>>, vector<1x1x6x32xbf16>
    %4 = vector.shape_cast %3 : vector<1x1x6x32xbf16> to vector<6x32xbf16>
    %5 = arith.extf %4 : vector<6x32xbf16> to vector<6x32xf32>
    %6 = vector.extract_strided_slice %5 {offsets = [0, 0], sizes = [4, 32], strides = [1, 1]} : vector<6x32xf32> to vector<4x32xf32>
    %7 = arith.truncf %6 : vector<4x32xf32> to vector<4x32xbf16>
    %c0_4 = arith.constant 0 : index
    %c0_5 = arith.constant 0 : index
    %8 = vector.load %arg7[%c0_4, %c0_5] : memref<4x16xf32, #tpu.memory_space<vmem>>, vector<4x16xf32>
    %c0_6 = arith.constant 0 : index
    %c0_7 = arith.constant 0 : index
    %c0_8 = arith.constant 0 : index
    %c0_9 = arith.constant 0 : index
    %9 = vector.load %arg4[%c0_6, %c0_7, %c0_8, %c0_9] : memref<1x3x32x16xbf16, #tpu.memory_space<vmem>>, vector<1x1x32x16xbf16>
    %10 = vector.shape_cast %9 : vector<1x1x32x16xbf16> to vector<32x16xbf16>
    %cst = arith.constant dense<0.000000e+00> : vector<4x16xf32>
    %11 = tpu.matmul %7, %10, %cst {dimension_numbers = #tpu.dot_dimension_numbers<[1], [0], [0], [1], [0, 0, 1, 1], [], []>} : vector<4x32xbf16>, vector<32x16xbf16>, vector<4x16xf32> -> vector<4x16xf32>
    %12 = arith.addf %8, %11 : vector<4x16xf32>
    %c0_10 = arith.constant 0 : index
    %c0_11 = arith.constant 0 : index
    %13 = vector.load %arg7[%c0_10, %c0_11] : memref<4x16xf32, #tpu.memory_space<vmem>>, vector<4x16xf32>
    tpu.vector_store %arg7[%c0_10, %c0_11], %12 {strides = array<i32>} : memref<4x16xf32, #tpu.memory_space<vmem>>, vector<4x16xf32>,
    %14 = vector.extract_strided_slice %5 {offsets = [1, 0], sizes = [4, 32], strides = [1, 1]} : vector<6x32xf32> to vector<4x32xf32>
    %15 = arith.truncf %14 : vector<4x32xf32> to vector<4x32xbf16>
    %c0_12 = arith.constant 0 : index
    %c0_13 = arith.constant 0 : index
    %16 = vector.load %arg7[%c0_12, %c0_13] : memref<4x16xf32, #tpu.memory_space<vmem>>, vector<4x16xf32>
    %c0_14 = arith.constant 0 : index
    %c1 = arith.constant 1 : index
    %c0_15 = arith.constant 0 : index
    %c0_16 = arith.constant 0 : index
    %17 = vector.load %arg4[%c0_14, %c1, %c0_15, %c0_16] : memref<1x3x32x16xbf16, #tpu.memory_space<vmem>>, vector<1x1x32x16xbf16>
    %18 = vector.shape_cast %17 : vector<1x1x32x16xbf16> to vector<32x16xbf16>
    %cst_17 = arith.constant dense<0.000000e+00> : vector<4x16xf32>
    %19 = tpu.matmul %15, %18, %cst_17 {dimension_numbers = #tpu.dot_dimension_numbers<[1], [0], [0], [1], [0, 0, 1, 1], [], []>} : vector<4x32xbf16>, vector<32x16xbf16>, vector<4x16xf32> -> vector<4x16xf32>
    %20 = arith.addf %16, %19 : vector<4x16xf32>
    %c0_18 = arith.constant 0 : index
    %c0_19 = arith.constant 0 : index
    %21 = vector.load %arg7[%c0_18, %c0_19] : memref<4x16xf32, #tpu.memory_space<vmem>>, vector<4x16xf32>
    tpu.vector_store %arg7[%c0_18, %c0_19], %20 {strides = array<i32>} : memref<4x16xf32, #tpu.memory_space<vmem>>, vector<4x16xf32>,
    %22 = vector.extract_strided_slice %5 {offsets = [2, 0], sizes = [4, 32], strides = [1, 1]} : vector<6x32xf32> to vector<4x32xf32>
    %23 = arith.truncf %22 : vector<4x32xf32> to vector<4x32xbf16>
    %c0_20 = arith.constant 0 : index
    %c0_21 = arith.constant 0 : index
    %24 = vector.load %arg7[%c0_20, %c0_21] : memref<4x16xf32, #tpu.memory_space<vmem>>, vector<4x16xf32>
    %c0_22 = arith.constant 0 : index
    %c2 = arith.constant 2 : index
    %c0_23 = arith.constant 0 : index
    %c0_24 = arith.constant 0 : index
    %25 = vector.load %arg4[%c0_22, %c2, %c0_23, %c0_24] : memref<1x3x32x16xbf16, #tpu.memory_space<vmem>>, vector<1x1x32x16xbf16>
    %26 = vector.shape_cast %25 : vector<1x1x32x16xbf16> to vector<32x16xbf16>
    %cst_25 = arith.constant dense<0.000000e+00> : vector<4x16xf32>
    %27 = tpu.matmul %23, %26, %cst_25 {dimension_numbers = #tpu.dot_dimension_numbers<[1], [0], [0], [1], [0, 0, 1, 1], [], []>} : vector<4x32xbf16>, vector<32x16xbf16>, vector<4x16xf32> -> vector<4x16xf32>
    %28 = arith.addf %24, %27 : vector<4x16xf32>
    %c0_26 = arith.constant 0 : index
    %c0_27 = arith.constant 0 : index
    %29 = vector.load %arg7[%c0_26, %c0_27] : memref<4x16xf32, #tpu.memory_space<vmem>>, vector<4x16xf32>
    tpu.vector_store %arg7[%c0_26, %c0_27], %28 {strides = array<i32>} : memref<4x16xf32, #tpu.memory_space<vmem>>, vector<4x16xf32>,
    %c2_i32 = arith.constant 2 : i32
    %30 = arith.cmpi eq, %arg2, %c2_i32 : i32
    %31 = arith.extui %30 : i1 to i32
    %c0_i32_28 = arith.constant 0 : i32
    %32 = arith.cmpi ne, %31, %c0_i32_28 : i32
    scf.if %32 {
      %c0_29 = arith.constant 0 : index
      %c0_30 = arith.constant 0 : index
      %33 = vector.load %arg7[%c0_29, %c0_30] : memref<4x16xf32, #tpu.memory_space<vmem>>, vector<4x16xf32>
      %c0_31 = arith.constant 0 : index
      %c0_32 = arith.constant 0 : index
      %34 = vector.load %arg5[%c0_31, %c0_32] : memref<1x16xf32, #tpu.memory_space<vmem>>, vector<1x16xf32>
      %35 = vector.broadcast %34 : vector<1x16xf32> to vector<4x16xf32>
      %36 = arith.addf %33, %35 : vector<4x16xf32>
      %cst_33 = arith.constant 0.000000e+00 : f32
      %37 = vector.broadcast %cst_33 : f32 to vector<4x16xf32>
      %38 = arith.maximumf %36, %37 : vector<4x16xf32>
      %39 = arith.truncf %38 : vector<4x16xf32> to vector<4x16xbf16>
      %c0_34 = arith.constant 0 : index
      %c0_35 = arith.constant 0 : index
      %c0_36 = arith.constant 0 : index
      %c0_37 = arith.constant 0 : index
      %40 = vector.load %arg6[%c0_34, %c0_35, %c0_36, %c0_37] : memref<1x1x4x16xbf16, #tpu.memory_space<vmem>>, vector<1x1x4x16xbf16>
      %41 = vector.shape_cast %40 : vector<1x1x4x16xbf16> to vector<4x16xbf16>
      %42 = vector.shape_cast %39 : vector<4x16xbf16> to vector<1x1x4x16xbf16>
      tpu.vector_store %arg6[%c0_34, %c0_35, %c0_36, %c0_37], %42 {strides = array<i32>} : memref<1x1x4x16xbf16, #tpu.memory_space<vmem>>, vector<1x1x4x16xbf16>,
    } else {
    }
    return
  }
  func.func @transform_0(%arg0: i32, %arg1: i32, %arg2: i32) -> (i32, i32, i32, i32) {
    %0 = arith.addi %arg1, %arg2 : i32
    %c0_i32 = arith.constant 0 : i32
    %c0_i32_0 = arith.constant 0 : i32
    %c0_i32_1 = arith.constant 0 : i32
    return %arg0, %0, %c0_i32, %c0_i32_0 : i32, i32, i32, i32
  }
  func.func @transform_1(%arg0: i32, %arg1: i32, %arg2: i32) -> (i32, i32, i32, i32) {
    %c0_i32 = arith.constant 0 : i32
    %c0_i32_0 = arith.constant 0 : i32
    %c0_i32_1 = arith.constant 0 : i32
    %c0_i32_2 = arith.constant 0 : i32
    return %arg2, %c0_i32, %c0_i32_0, %c0_i32_1 : i32, i32, i32, i32
  }
  func.func @transform_2(%arg0: i32, %arg1: i32, %arg2: i32) -> (i32, i32) {
    %c0_i32 = arith.constant 0 : i32
    %c0_i32_0 = arith.constant 0 : i32
    %c0_i32_1 = arith.constant 0 : i32
    return %c0_i32, %c0_i32_0 : i32, i32
  }
  func.func @transform_3(%arg0: i32, %arg1: i32, %arg2: i32) -> (i32, i32, i32, i32) {
    %c0_i32 = arith.constant 0 : i32
    %c0_i32_0 = arith.constant 0 : i32
    %c0_i32_1 = arith.constant 0 : i32
    return %arg0, %arg1, %c0_i32, %c0_i32_0 : i32, i32, i32, i32
  }
}

module attributes {stable_mosaic.version = 11 : i64} {
  func.func @_conv_row_kernel(%arg0: i32, %arg1: i32, %arg2: i32, %arg3: memref<1x1x6x16xbf16, #tpu.memory_space<vmem>>, %arg4: memref<1x3x16x16xbf16, #tpu.memory_space<vmem>>, %arg5: memref<1x16xf32, #tpu.memory_space<vmem>>, %arg6: memref<1x1x4x16xbf16, #tpu.memory_space<vmem>>, %arg7: memref<4x16xf32, #tpu.memory_space<vmem>>) attributes {dimension_semantics = [#tpu.dimension_semantics<parallel>, #tpu.dimension_semantics<parallel>, #tpu.dimension_semantics<arbitrary>], iteration_bounds = array<i64: 2, 4, 3>, scalar_prefetch = 0 : i64, scratch_operands = 1 : i64, tpu.core_type = #tpu.core_type<tc>, window_params = [{transform_indices = @transform_0, window_bounds = array<i64: 1, 1, 6, 16>}, {transform_indices = @transform_1, window_bounds = array<i64: 1, 3, 16, 16>}, {pipeline_mode = #tpu.pipeline_mode<synchronous>, transform_indices = @transform_2, window_bounds = array<i64: 1, 16>}, {transform_indices = @transform_3, window_bounds = array<i64: 1, 1, 4, 16>}]} {
    %c0_i32 = arith.constant 0 : i32
    %0 = arith.cmpi eq, %arg2, %c0_i32 : i32
    %1 = arith.extui %0 : i1 to i32
    %c0_i32_0 = arith.constant 0 : i32
    %2 = arith.cmpi ne, %1, %c0_i32_0 : i32
    scf.if %2 {
      %cst_29 = arith.constant 0.000000e+00 : f32
      %33 = vector.broadcast %cst_29 : f32 to vector<4x16xf32>
      %c0_30 = arith.constant 0 : index
      %c0_31 = arith.constant 0 : index
      %34 = vector.load %arg7[%c0_30, %c0_31] : memref<4x16xf32, #tpu.memory_space<vmem>>, vector<4x16xf32>
      tpu.vector_store %arg7[%c0_30, %c0_31], %33 {strides = array<i32>} : memref<4x16xf32, #tpu.memory_space<vmem>>, vector<4x16xf32>,
    } else {
    }
    %c0 = arith.constant 0 : index
    %c0_1 = arith.constant 0 : index
    %c0_2 = arith.constant 0 : index
    %c0_3 = arith.constant 0 : index
    %3 = vector.load %arg3[%c0, %c0_1, %c0_2, %c0_3] : memref<1x1x6x16xbf16, #tpu.memory_space<vmem>>, vector<1x1x6x16xbf16>
    %4 = vector.shape_cast %3 : vector<1x1x6x16xbf16> to vector<6x16xbf16>
    %5 = arith.extf %4 : vector<6x16xbf16> to vector<6x16xf32>
    %6 = vector.extract_strided_slice %5 {offsets = [0, 0], sizes = [4, 16], strides = [1, 1]} : vector<6x16xf32> to vector<4x16xf32>
    %7 = arith.truncf %6 : vector<4x16xf32> to vector<4x16xbf16>
    %c0_4 = arith.constant 0 : index
    %c0_5 = arith.constant 0 : index
    %8 = vector.load %arg7[%c0_4, %c0_5] : memref<4x16xf32, #tpu.memory_space<vmem>>, vector<4x16xf32>
    %c0_6 = arith.constant 0 : index
    %c0_7 = arith.constant 0 : index
    %c0_8 = arith.constant 0 : index
    %c0_9 = arith.constant 0 : index
    %9 = vector.load %arg4[%c0_6, %c0_7, %c0_8, %c0_9] : memref<1x3x16x16xbf16, #tpu.memory_space<vmem>>, vector<1x1x16x16xbf16>
    %10 = vector.shape_cast %9 : vector<1x1x16x16xbf16> to vector<16x16xbf16>
    %cst = arith.constant dense<0.000000e+00> : vector<4x16xf32>
    %11 = tpu.matmul %7, %10, %cst {dimension_numbers = #tpu.dot_dimension_numbers<[1], [0], [0], [1], [0, 0, 1, 1], [], []>} : vector<4x16xbf16>, vector<16x16xbf16>, vector<4x16xf32> -> vector<4x16xf32>
    %12 = arith.addf %8, %11 : vector<4x16xf32>
    %c0_10 = arith.constant 0 : index
    %c0_11 = arith.constant 0 : index
    %13 = vector.load %arg7[%c0_10, %c0_11] : memref<4x16xf32, #tpu.memory_space<vmem>>, vector<4x16xf32>
    tpu.vector_store %arg7[%c0_10, %c0_11], %12 {strides = array<i32>} : memref<4x16xf32, #tpu.memory_space<vmem>>, vector<4x16xf32>,
    %14 = vector.extract_strided_slice %5 {offsets = [1, 0], sizes = [4, 16], strides = [1, 1]} : vector<6x16xf32> to vector<4x16xf32>
    %15 = arith.truncf %14 : vector<4x16xf32> to vector<4x16xbf16>
    %c0_12 = arith.constant 0 : index
    %c0_13 = arith.constant 0 : index
    %16 = vector.load %arg7[%c0_12, %c0_13] : memref<4x16xf32, #tpu.memory_space<vmem>>, vector<4x16xf32>
    %c0_14 = arith.constant 0 : index
    %c1 = arith.constant 1 : index
    %c0_15 = arith.constant 0 : index
    %c0_16 = arith.constant 0 : index
    %17 = vector.load %arg4[%c0_14, %c1, %c0_15, %c0_16] : memref<1x3x16x16xbf16, #tpu.memory_space<vmem>>, vector<1x1x16x16xbf16>
    %18 = vector.shape_cast %17 : vector<1x1x16x16xbf16> to vector<16x16xbf16>
    %cst_17 = arith.constant dense<0.000000e+00> : vector<4x16xf32>
    %19 = tpu.matmul %15, %18, %cst_17 {dimension_numbers = #tpu.dot_dimension_numbers<[1], [0], [0], [1], [0, 0, 1, 1], [], []>} : vector<4x16xbf16>, vector<16x16xbf16>, vector<4x16xf32> -> vector<4x16xf32>
    %20 = arith.addf %16, %19 : vector<4x16xf32>
    %c0_18 = arith.constant 0 : index
    %c0_19 = arith.constant 0 : index
    %21 = vector.load %arg7[%c0_18, %c0_19] : memref<4x16xf32, #tpu.memory_space<vmem>>, vector<4x16xf32>
    tpu.vector_store %arg7[%c0_18, %c0_19], %20 {strides = array<i32>} : memref<4x16xf32, #tpu.memory_space<vmem>>, vector<4x16xf32>,
    %22 = vector.extract_strided_slice %5 {offsets = [2, 0], sizes = [4, 16], strides = [1, 1]} : vector<6x16xf32> to vector<4x16xf32>
    %23 = arith.truncf %22 : vector<4x16xf32> to vector<4x16xbf16>
    %c0_20 = arith.constant 0 : index
    %c0_21 = arith.constant 0 : index
    %24 = vector.load %arg7[%c0_20, %c0_21] : memref<4x16xf32, #tpu.memory_space<vmem>>, vector<4x16xf32>
    %c0_22 = arith.constant 0 : index
    %c2 = arith.constant 2 : index
    %c0_23 = arith.constant 0 : index
    %c0_24 = arith.constant 0 : index
    %25 = vector.load %arg4[%c0_22, %c2, %c0_23, %c0_24] : memref<1x3x16x16xbf16, #tpu.memory_space<vmem>>, vector<1x1x16x16xbf16>
    %26 = vector.shape_cast %25 : vector<1x1x16x16xbf16> to vector<16x16xbf16>
    %cst_25 = arith.constant dense<0.000000e+00> : vector<4x16xf32>
    %27 = tpu.matmul %23, %26, %cst_25 {dimension_numbers = #tpu.dot_dimension_numbers<[1], [0], [0], [1], [0, 0, 1, 1], [], []>} : vector<4x16xbf16>, vector<16x16xbf16>, vector<4x16xf32> -> vector<4x16xf32>
    %28 = arith.addf %24, %27 : vector<4x16xf32>
    %c0_26 = arith.constant 0 : index
    %c0_27 = arith.constant 0 : index
    %29 = vector.load %arg7[%c0_26, %c0_27] : memref<4x16xf32, #tpu.memory_space<vmem>>, vector<4x16xf32>
    tpu.vector_store %arg7[%c0_26, %c0_27], %28 {strides = array<i32>} : memref<4x16xf32, #tpu.memory_space<vmem>>, vector<4x16xf32>,
    %c2_i32 = arith.constant 2 : i32
    %30 = arith.cmpi eq, %arg2, %c2_i32 : i32
    %31 = arith.extui %30 : i1 to i32
    %c0_i32_28 = arith.constant 0 : i32
    %32 = arith.cmpi ne, %31, %c0_i32_28 : i32
    scf.if %32 {
      %c0_29 = arith.constant 0 : index
      %c0_30 = arith.constant 0 : index
      %33 = vector.load %arg7[%c0_29, %c0_30] : memref<4x16xf32, #tpu.memory_space<vmem>>, vector<4x16xf32>
      %c0_31 = arith.constant 0 : index
      %c0_32 = arith.constant 0 : index
      %34 = vector.load %arg5[%c0_31, %c0_32] : memref<1x16xf32, #tpu.memory_space<vmem>>, vector<1x16xf32>
      %35 = vector.broadcast %34 : vector<1x16xf32> to vector<4x16xf32>
      %36 = arith.addf %33, %35 : vector<4x16xf32>
      %cst_33 = arith.constant 0.000000e+00 : f32
      %37 = vector.broadcast %cst_33 : f32 to vector<4x16xf32>
      %38 = arith.maximumf %36, %37 : vector<4x16xf32>
      %39 = arith.truncf %38 : vector<4x16xf32> to vector<4x16xbf16>
      %c0_34 = arith.constant 0 : index
      %c0_35 = arith.constant 0 : index
      %c0_36 = arith.constant 0 : index
      %c0_37 = arith.constant 0 : index
      %40 = vector.load %arg6[%c0_34, %c0_35, %c0_36, %c0_37] : memref<1x1x4x16xbf16, #tpu.memory_space<vmem>>, vector<1x1x4x16xbf16>
      %41 = vector.shape_cast %40 : vector<1x1x4x16xbf16> to vector<4x16xbf16>
      %42 = vector.shape_cast %39 : vector<4x16xbf16> to vector<1x1x4x16xbf16>
      tpu.vector_store %arg6[%c0_34, %c0_35, %c0_36, %c0_37], %42 {strides = array<i32>} : memref<1x1x4x16xbf16, #tpu.memory_space<vmem>>, vector<1x1x4x16xbf16>,
    } else {
    }
    return
  }
  func.func @transform_0(%arg0: i32, %arg1: i32, %arg2: i32) -> (i32, i32, i32, i32) {
    %0 = arith.addi %arg1, %arg2 : i32
    %c0_i32 = arith.constant 0 : i32
    %c0_i32_0 = arith.constant 0 : i32
    %c0_i32_1 = arith.constant 0 : i32
    return %arg0, %0, %c0_i32, %c0_i32_0 : i32, i32, i32, i32
  }
  func.func @transform_1(%arg0: i32, %arg1: i32, %arg2: i32) -> (i32, i32, i32, i32) {
    %c0_i32 = arith.constant 0 : i32
    %c0_i32_0 = arith.constant 0 : i32
    %c0_i32_1 = arith.constant 0 : i32
    %c0_i32_2 = arith.constant 0 : i32
    return %arg2, %c0_i32, %c0_i32_0, %c0_i32_1 : i32, i32, i32, i32
  }
  func.func @transform_2(%arg0: i32, %arg1: i32, %arg2: i32) -> (i32, i32) {
    %c0_i32 = arith.constant 0 : i32
    %c0_i32_0 = arith.constant 0 : i32
    %c0_i32_1 = arith.constant 0 : i32
    return %c0_i32, %c0_i32_0 : i32, i32
  }
  func.func @transform_3(%arg0: i32, %arg1: i32, %arg2: i32) -> (i32, i32, i32, i32) {
    %c0_i32 = arith.constant 0 : i32
    %c0_i32_0 = arith.constant 0 : i32
    %c0_i32_1 = arith.constant 0 : i32
    return %arg0, %arg1, %c0_i32, %c0_i32_0 : i32, i32, i32, i32
  }
}

module attributes {stable_mosaic.version = 11 : i64} {
  func.func @_conv_row_kernel(%arg0: i32, %arg1: i32, %arg2: i32, %arg3: memref<1x1x10x32xbf16, #tpu.memory_space<vmem>>, %arg4: memref<1x3x32x16xbf16, #tpu.memory_space<vmem>>, %arg5: memref<1x16xf32, #tpu.memory_space<vmem>>, %arg6: memref<1x1x8x16xbf16, #tpu.memory_space<vmem>>, %arg7: memref<8x16xf32, #tpu.memory_space<vmem>>) attributes {dimension_semantics = [#tpu.dimension_semantics<parallel>, #tpu.dimension_semantics<parallel>, #tpu.dimension_semantics<arbitrary>], iteration_bounds = array<i64: 2, 8, 3>, scalar_prefetch = 0 : i64, scratch_operands = 1 : i64, tpu.core_type = #tpu.core_type<tc>, window_params = [{transform_indices = @transform_0, window_bounds = array<i64: 1, 1, 10, 32>}, {transform_indices = @transform_1, window_bounds = array<i64: 1, 3, 32, 16>}, {pipeline_mode = #tpu.pipeline_mode<synchronous>, transform_indices = @transform_2, window_bounds = array<i64: 1, 16>}, {transform_indices = @transform_3, window_bounds = array<i64: 1, 1, 8, 16>}]} {
    %c0_i32 = arith.constant 0 : i32
    %0 = arith.cmpi eq, %arg2, %c0_i32 : i32
    %1 = arith.extui %0 : i1 to i32
    %c0_i32_0 = arith.constant 0 : i32
    %2 = arith.cmpi ne, %1, %c0_i32_0 : i32
    scf.if %2 {
      %cst_29 = arith.constant 0.000000e+00 : f32
      %33 = vector.broadcast %cst_29 : f32 to vector<8x16xf32>
      %c0_30 = arith.constant 0 : index
      %c0_31 = arith.constant 0 : index
      %34 = vector.load %arg7[%c0_30, %c0_31] : memref<8x16xf32, #tpu.memory_space<vmem>>, vector<8x16xf32>
      tpu.vector_store %arg7[%c0_30, %c0_31], %33 {strides = array<i32>} : memref<8x16xf32, #tpu.memory_space<vmem>>, vector<8x16xf32>,
    } else {
    }
    %c0 = arith.constant 0 : index
    %c0_1 = arith.constant 0 : index
    %c0_2 = arith.constant 0 : index
    %c0_3 = arith.constant 0 : index
    %3 = vector.load %arg3[%c0, %c0_1, %c0_2, %c0_3] : memref<1x1x10x32xbf16, #tpu.memory_space<vmem>>, vector<1x1x10x32xbf16>
    %4 = vector.shape_cast %3 : vector<1x1x10x32xbf16> to vector<10x32xbf16>
    %5 = arith.extf %4 : vector<10x32xbf16> to vector<10x32xf32>
    %6 = vector.extract_strided_slice %5 {offsets = [0, 0], sizes = [8, 32], strides = [1, 1]} : vector<10x32xf32> to vector<8x32xf32>
    %7 = arith.truncf %6 : vector<8x32xf32> to vector<8x32xbf16>
    %c0_4 = arith.constant 0 : index
    %c0_5 = arith.constant 0 : index
    %8 = vector.load %arg7[%c0_4, %c0_5] : memref<8x16xf32, #tpu.memory_space<vmem>>, vector<8x16xf32>
    %c0_6 = arith.constant 0 : index
    %c0_7 = arith.constant 0 : index
    %c0_8 = arith.constant 0 : index
    %c0_9 = arith.constant 0 : index
    %9 = vector.load %arg4[%c0_6, %c0_7, %c0_8, %c0_9] : memref<1x3x32x16xbf16, #tpu.memory_space<vmem>>, vector<1x1x32x16xbf16>
    %10 = vector.shape_cast %9 : vector<1x1x32x16xbf16> to vector<32x16xbf16>
    %cst = arith.constant dense<0.000000e+00> : vector<8x16xf32>
    %11 = tpu.matmul %7, %10, %cst {dimension_numbers = #tpu.dot_dimension_numbers<[1], [0], [0], [1], [0, 0, 1, 1], [], []>} : vector<8x32xbf16>, vector<32x16xbf16>, vector<8x16xf32> -> vector<8x16xf32>
    %12 = arith.addf %8, %11 : vector<8x16xf32>
    %c0_10 = arith.constant 0 : index
    %c0_11 = arith.constant 0 : index
    %13 = vector.load %arg7[%c0_10, %c0_11] : memref<8x16xf32, #tpu.memory_space<vmem>>, vector<8x16xf32>
    tpu.vector_store %arg7[%c0_10, %c0_11], %12 {strides = array<i32>} : memref<8x16xf32, #tpu.memory_space<vmem>>, vector<8x16xf32>,
    %14 = vector.extract_strided_slice %5 {offsets = [1, 0], sizes = [8, 32], strides = [1, 1]} : vector<10x32xf32> to vector<8x32xf32>
    %15 = arith.truncf %14 : vector<8x32xf32> to vector<8x32xbf16>
    %c0_12 = arith.constant 0 : index
    %c0_13 = arith.constant 0 : index
    %16 = vector.load %arg7[%c0_12, %c0_13] : memref<8x16xf32, #tpu.memory_space<vmem>>, vector<8x16xf32>
    %c0_14 = arith.constant 0 : index
    %c1 = arith.constant 1 : index
    %c0_15 = arith.constant 0 : index
    %c0_16 = arith.constant 0 : index
    %17 = vector.load %arg4[%c0_14, %c1, %c0_15, %c0_16] : memref<1x3x32x16xbf16, #tpu.memory_space<vmem>>, vector<1x1x32x16xbf16>
    %18 = vector.shape_cast %17 : vector<1x1x32x16xbf16> to vector<32x16xbf16>
    %cst_17 = arith.constant dense<0.000000e+00> : vector<8x16xf32>
    %19 = tpu.matmul %15, %18, %cst_17 {dimension_numbers = #tpu.dot_dimension_numbers<[1], [0], [0], [1], [0, 0, 1, 1], [], []>} : vector<8x32xbf16>, vector<32x16xbf16>, vector<8x16xf32> -> vector<8x16xf32>
    %20 = arith.addf %16, %19 : vector<8x16xf32>
    %c0_18 = arith.constant 0 : index
    %c0_19 = arith.constant 0 : index
    %21 = vector.load %arg7[%c0_18, %c0_19] : memref<8x16xf32, #tpu.memory_space<vmem>>, vector<8x16xf32>
    tpu.vector_store %arg7[%c0_18, %c0_19], %20 {strides = array<i32>} : memref<8x16xf32, #tpu.memory_space<vmem>>, vector<8x16xf32>,
    %22 = vector.extract_strided_slice %5 {offsets = [2, 0], sizes = [8, 32], strides = [1, 1]} : vector<10x32xf32> to vector<8x32xf32>
    %23 = arith.truncf %22 : vector<8x32xf32> to vector<8x32xbf16>
    %c0_20 = arith.constant 0 : index
    %c0_21 = arith.constant 0 : index
    %24 = vector.load %arg7[%c0_20, %c0_21] : memref<8x16xf32, #tpu.memory_space<vmem>>, vector<8x16xf32>
    %c0_22 = arith.constant 0 : index
    %c2 = arith.constant 2 : index
    %c0_23 = arith.constant 0 : index
    %c0_24 = arith.constant 0 : index
    %25 = vector.load %arg4[%c0_22, %c2, %c0_23, %c0_24] : memref<1x3x32x16xbf16, #tpu.memory_space<vmem>>, vector<1x1x32x16xbf16>
    %26 = vector.shape_cast %25 : vector<1x1x32x16xbf16> to vector<32x16xbf16>
    %cst_25 = arith.constant dense<0.000000e+00> : vector<8x16xf32>
    %27 = tpu.matmul %23, %26, %cst_25 {dimension_numbers = #tpu.dot_dimension_numbers<[1], [0], [0], [1], [0, 0, 1, 1], [], []>} : vector<8x32xbf16>, vector<32x16xbf16>, vector<8x16xf32> -> vector<8x16xf32>
    %28 = arith.addf %24, %27 : vector<8x16xf32>
    %c0_26 = arith.constant 0 : index
    %c0_27 = arith.constant 0 : index
    %29 = vector.load %arg7[%c0_26, %c0_27] : memref<8x16xf32, #tpu.memory_space<vmem>>, vector<8x16xf32>
    tpu.vector_store %arg7[%c0_26, %c0_27], %28 {strides = array<i32>} : memref<8x16xf32, #tpu.memory_space<vmem>>, vector<8x16xf32>,
    %c2_i32 = arith.constant 2 : i32
    %30 = arith.cmpi eq, %arg2, %c2_i32 : i32
    %31 = arith.extui %30 : i1 to i32
    %c0_i32_28 = arith.constant 0 : i32
    %32 = arith.cmpi ne, %31, %c0_i32_28 : i32
    scf.if %32 {
      %c0_29 = arith.constant 0 : index
      %c0_30 = arith.constant 0 : index
      %33 = vector.load %arg7[%c0_29, %c0_30] : memref<8x16xf32, #tpu.memory_space<vmem>>, vector<8x16xf32>
      %c0_31 = arith.constant 0 : index
      %c0_32 = arith.constant 0 : index
      %34 = vector.load %arg5[%c0_31, %c0_32] : memref<1x16xf32, #tpu.memory_space<vmem>>, vector<1x16xf32>
      %35 = vector.broadcast %34 : vector<1x16xf32> to vector<8x16xf32>
      %36 = arith.addf %33, %35 : vector<8x16xf32>
      %cst_33 = arith.constant 0.000000e+00 : f32
      %37 = vector.broadcast %cst_33 : f32 to vector<8x16xf32>
      %38 = arith.maximumf %36, %37 : vector<8x16xf32>
      %39 = arith.truncf %38 : vector<8x16xf32> to vector<8x16xbf16>
      %c0_34 = arith.constant 0 : index
      %c0_35 = arith.constant 0 : index
      %c0_36 = arith.constant 0 : index
      %c0_37 = arith.constant 0 : index
      %40 = vector.load %arg6[%c0_34, %c0_35, %c0_36, %c0_37] : memref<1x1x8x16xbf16, #tpu.memory_space<vmem>>, vector<1x1x8x16xbf16>
      %41 = vector.shape_cast %40 : vector<1x1x8x16xbf16> to vector<8x16xbf16>
      %42 = vector.shape_cast %39 : vector<8x16xbf16> to vector<1x1x8x16xbf16>
      tpu.vector_store %arg6[%c0_34, %c0_35, %c0_36, %c0_37], %42 {strides = array<i32>} : memref<1x1x8x16xbf16, #tpu.memory_space<vmem>>, vector<1x1x8x16xbf16>,
    } else {
    }
    return
  }
  func.func @transform_0(%arg0: i32, %arg1: i32, %arg2: i32) -> (i32, i32, i32, i32) {
    %0 = arith.addi %arg1, %arg2 : i32
    %c0_i32 = arith.constant 0 : i32
    %c0_i32_0 = arith.constant 0 : i32
    %c0_i32_1 = arith.constant 0 : i32
    return %arg0, %0, %c0_i32, %c0_i32_0 : i32, i32, i32, i32
  }
  func.func @transform_1(%arg0: i32, %arg1: i32, %arg2: i32) -> (i32, i32, i32, i32) {
    %c0_i32 = arith.constant 0 : i32
    %c0_i32_0 = arith.constant 0 : i32
    %c0_i32_1 = arith.constant 0 : i32
    %c0_i32_2 = arith.constant 0 : i32
    return %arg2, %c0_i32, %c0_i32_0, %c0_i32_1 : i32, i32, i32, i32
  }
  func.func @transform_2(%arg0: i32, %arg1: i32, %arg2: i32) -> (i32, i32) {
    %c0_i32 = arith.constant 0 : i32
    %c0_i32_0 = arith.constant 0 : i32
    %c0_i32_1 = arith.constant 0 : i32
    return %c0_i32, %c0_i32_0 : i32, i32
  }
  func.func @transform_3(%arg0: i32, %arg1: i32, %arg2: i32) -> (i32, i32, i32, i32) {
    %c0_i32 = arith.constant 0 : i32
    %c0_i32_0 = arith.constant 0 : i32
    %c0_i32_1 = arith.constant 0 : i32
    return %arg0, %arg1, %c0_i32, %c0_i32_0 : i32, i32, i32, i32
  }
}

module attributes {stable_mosaic.version = 11 : i64} {
  func.func @_conv_row_kernel(%arg0: i32, %arg1: i32, %arg2: i32, %arg3: memref<1x1x10x16xbf16, #tpu.memory_space<vmem>>, %arg4: memref<1x3x16x16xbf16, #tpu.memory_space<vmem>>, %arg5: memref<1x16xf32, #tpu.memory_space<vmem>>, %arg6: memref<1x1x8x16xbf16, #tpu.memory_space<vmem>>, %arg7: memref<8x16xf32, #tpu.memory_space<vmem>>) attributes {dimension_semantics = [#tpu.dimension_semantics<parallel>, #tpu.dimension_semantics<parallel>, #tpu.dimension_semantics<arbitrary>], iteration_bounds = array<i64: 2, 8, 3>, scalar_prefetch = 0 : i64, scratch_operands = 1 : i64, tpu.core_type = #tpu.core_type<tc>, window_params = [{transform_indices = @transform_0, window_bounds = array<i64: 1, 1, 10, 16>}, {transform_indices = @transform_1, window_bounds = array<i64: 1, 3, 16, 16>}, {pipeline_mode = #tpu.pipeline_mode<synchronous>, transform_indices = @transform_2, window_bounds = array<i64: 1, 16>}, {transform_indices = @transform_3, window_bounds = array<i64: 1, 1, 8, 16>}]} {
    %c0_i32 = arith.constant 0 : i32
    %0 = arith.cmpi eq, %arg2, %c0_i32 : i32
    %1 = arith.extui %0 : i1 to i32
    %c0_i32_0 = arith.constant 0 : i32
    %2 = arith.cmpi ne, %1, %c0_i32_0 : i32
    scf.if %2 {
      %cst_29 = arith.constant 0.000000e+00 : f32
      %33 = vector.broadcast %cst_29 : f32 to vector<8x16xf32>
      %c0_30 = arith.constant 0 : index
      %c0_31 = arith.constant 0 : index
      %34 = vector.load %arg7[%c0_30, %c0_31] : memref<8x16xf32, #tpu.memory_space<vmem>>, vector<8x16xf32>
      tpu.vector_store %arg7[%c0_30, %c0_31], %33 {strides = array<i32>} : memref<8x16xf32, #tpu.memory_space<vmem>>, vector<8x16xf32>,
    } else {
    }
    %c0 = arith.constant 0 : index
    %c0_1 = arith.constant 0 : index
    %c0_2 = arith.constant 0 : index
    %c0_3 = arith.constant 0 : index
    %3 = vector.load %arg3[%c0, %c0_1, %c0_2, %c0_3] : memref<1x1x10x16xbf16, #tpu.memory_space<vmem>>, vector<1x1x10x16xbf16>
    %4 = vector.shape_cast %3 : vector<1x1x10x16xbf16> to vector<10x16xbf16>
    %5 = arith.extf %4 : vector<10x16xbf16> to vector<10x16xf32>
    %6 = vector.extract_strided_slice %5 {offsets = [0, 0], sizes = [8, 16], strides = [1, 1]} : vector<10x16xf32> to vector<8x16xf32>
    %7 = arith.truncf %6 : vector<8x16xf32> to vector<8x16xbf16>
    %c0_4 = arith.constant 0 : index
    %c0_5 = arith.constant 0 : index
    %8 = vector.load %arg7[%c0_4, %c0_5] : memref<8x16xf32, #tpu.memory_space<vmem>>, vector<8x16xf32>
    %c0_6 = arith.constant 0 : index
    %c0_7 = arith.constant 0 : index
    %c0_8 = arith.constant 0 : index
    %c0_9 = arith.constant 0 : index
    %9 = vector.load %arg4[%c0_6, %c0_7, %c0_8, %c0_9] : memref<1x3x16x16xbf16, #tpu.memory_space<vmem>>, vector<1x1x16x16xbf16>
    %10 = vector.shape_cast %9 : vector<1x1x16x16xbf16> to vector<16x16xbf16>
    %cst = arith.constant dense<0.000000e+00> : vector<8x16xf32>
    %11 = tpu.matmul %7, %10, %cst {dimension_numbers = #tpu.dot_dimension_numbers<[1], [0], [0], [1], [0, 0, 1, 1], [], []>} : vector<8x16xbf16>, vector<16x16xbf16>, vector<8x16xf32> -> vector<8x16xf32>
    %12 = arith.addf %8, %11 : vector<8x16xf32>
    %c0_10 = arith.constant 0 : index
    %c0_11 = arith.constant 0 : index
    %13 = vector.load %arg7[%c0_10, %c0_11] : memref<8x16xf32, #tpu.memory_space<vmem>>, vector<8x16xf32>
    tpu.vector_store %arg7[%c0_10, %c0_11], %12 {strides = array<i32>} : memref<8x16xf32, #tpu.memory_space<vmem>>, vector<8x16xf32>,
    %14 = vector.extract_strided_slice %5 {offsets = [1, 0], sizes = [8, 16], strides = [1, 1]} : vector<10x16xf32> to vector<8x16xf32>
    %15 = arith.truncf %14 : vector<8x16xf32> to vector<8x16xbf16>
    %c0_12 = arith.constant 0 : index
    %c0_13 = arith.constant 0 : index
    %16 = vector.load %arg7[%c0_12, %c0_13] : memref<8x16xf32, #tpu.memory_space<vmem>>, vector<8x16xf32>
    %c0_14 = arith.constant 0 : index
    %c1 = arith.constant 1 : index
    %c0_15 = arith.constant 0 : index
    %c0_16 = arith.constant 0 : index
    %17 = vector.load %arg4[%c0_14, %c1, %c0_15, %c0_16] : memref<1x3x16x16xbf16, #tpu.memory_space<vmem>>, vector<1x1x16x16xbf16>
    %18 = vector.shape_cast %17 : vector<1x1x16x16xbf16> to vector<16x16xbf16>
    %cst_17 = arith.constant dense<0.000000e+00> : vector<8x16xf32>
    %19 = tpu.matmul %15, %18, %cst_17 {dimension_numbers = #tpu.dot_dimension_numbers<[1], [0], [0], [1], [0, 0, 1, 1], [], []>} : vector<8x16xbf16>, vector<16x16xbf16>, vector<8x16xf32> -> vector<8x16xf32>
    %20 = arith.addf %16, %19 : vector<8x16xf32>
    %c0_18 = arith.constant 0 : index
    %c0_19 = arith.constant 0 : index
    %21 = vector.load %arg7[%c0_18, %c0_19] : memref<8x16xf32, #tpu.memory_space<vmem>>, vector<8x16xf32>
    tpu.vector_store %arg7[%c0_18, %c0_19], %20 {strides = array<i32>} : memref<8x16xf32, #tpu.memory_space<vmem>>, vector<8x16xf32>,
    %22 = vector.extract_strided_slice %5 {offsets = [2, 0], sizes = [8, 16], strides = [1, 1]} : vector<10x16xf32> to vector<8x16xf32>
    %23 = arith.truncf %22 : vector<8x16xf32> to vector<8x16xbf16>
    %c0_20 = arith.constant 0 : index
    %c0_21 = arith.constant 0 : index
    %24 = vector.load %arg7[%c0_20, %c0_21] : memref<8x16xf32, #tpu.memory_space<vmem>>, vector<8x16xf32>
    %c0_22 = arith.constant 0 : index
    %c2 = arith.constant 2 : index
    %c0_23 = arith.constant 0 : index
    %c0_24 = arith.constant 0 : index
    %25 = vector.load %arg4[%c0_22, %c2, %c0_23, %c0_24] : memref<1x3x16x16xbf16, #tpu.memory_space<vmem>>, vector<1x1x16x16xbf16>
    %26 = vector.shape_cast %25 : vector<1x1x16x16xbf16> to vector<16x16xbf16>
    %cst_25 = arith.constant dense<0.000000e+00> : vector<8x16xf32>
    %27 = tpu.matmul %23, %26, %cst_25 {dimension_numbers = #tpu.dot_dimension_numbers<[1], [0], [0], [1], [0, 0, 1, 1], [], []>} : vector<8x16xbf16>, vector<16x16xbf16>, vector<8x16xf32> -> vector<8x16xf32>
    %28 = arith.addf %24, %27 : vector<8x16xf32>
    %c0_26 = arith.constant 0 : index
    %c0_27 = arith.constant 0 : index
    %29 = vector.load %arg7[%c0_26, %c0_27] : memref<8x16xf32, #tpu.memory_space<vmem>>, vector<8x16xf32>
    tpu.vector_store %arg7[%c0_26, %c0_27], %28 {strides = array<i32>} : memref<8x16xf32, #tpu.memory_space<vmem>>, vector<8x16xf32>,
    %c2_i32 = arith.constant 2 : i32
    %30 = arith.cmpi eq, %arg2, %c2_i32 : i32
    %31 = arith.extui %30 : i1 to i32
    %c0_i32_28 = arith.constant 0 : i32
    %32 = arith.cmpi ne, %31, %c0_i32_28 : i32
    scf.if %32 {
      %c0_29 = arith.constant 0 : index
      %c0_30 = arith.constant 0 : index
      %33 = vector.load %arg7[%c0_29, %c0_30] : memref<8x16xf32, #tpu.memory_space<vmem>>, vector<8x16xf32>
      %c0_31 = arith.constant 0 : index
      %c0_32 = arith.constant 0 : index
      %34 = vector.load %arg5[%c0_31, %c0_32] : memref<1x16xf32, #tpu.memory_space<vmem>>, vector<1x16xf32>
      %35 = vector.broadcast %34 : vector<1x16xf32> to vector<8x16xf32>
      %36 = arith.addf %33, %35 : vector<8x16xf32>
      %cst_33 = arith.constant 0.000000e+00 : f32
      %37 = vector.broadcast %cst_33 : f32 to vector<8x16xf32>
      %38 = arith.maximumf %36, %37 : vector<8x16xf32>
      %39 = arith.truncf %38 : vector<8x16xf32> to vector<8x16xbf16>
      %c0_34 = arith.constant 0 : index
      %c0_35 = arith.constant 0 : index
      %c0_36 = arith.constant 0 : index
      %c0_37 = arith.constant 0 : index
      %40 = vector.load %arg6[%c0_34, %c0_35, %c0_36, %c0_37] : memref<1x1x8x16xbf16, #tpu.memory_space<vmem>>, vector<1x1x8x16xbf16>
      %41 = vector.shape_cast %40 : vector<1x1x8x16xbf16> to vector<8x16xbf16>
      %42 = vector.shape_cast %39 : vector<8x16xbf16> to vector<1x1x8x16xbf16>
      tpu.vector_store %arg6[%c0_34, %c0_35, %c0_36, %c0_37], %42 {strides = array<i32>} : memref<1x1x8x16xbf16, #tpu.memory_space<vmem>>, vector<1x1x8x16xbf16>,
    } else {
    }
    return
  }
  func.func @transform_0(%arg0: i32, %arg1: i32, %arg2: i32) -> (i32, i32, i32, i32) {
    %0 = arith.addi %arg1, %arg2 : i32
    %c0_i32 = arith.constant 0 : i32
    %c0_i32_0 = arith.constant 0 : i32
    %c0_i32_1 = arith.constant 0 : i32
    return %arg0, %0, %c0_i32, %c0_i32_0 : i32, i32, i32, i32
  }
  func.func @transform_1(%arg0: i32, %arg1: i32, %arg2: i32) -> (i32, i32, i32, i32) {
    %c0_i32 = arith.constant 0 : i32
    %c0_i32_0 = arith.constant 0 : i32
    %c0_i32_1 = arith.constant 0 : i32
    %c0_i32_2 = arith.constant 0 : i32
    return %arg2, %c0_i32, %c0_i32_0, %c0_i32_1 : i32, i32, i32, i32
  }
  func.func @transform_2(%arg0: i32, %arg1: i32, %arg2: i32) -> (i32, i32) {
    %c0_i32 = arith.constant 0 : i32
    %c0_i32_0 = arith.constant 0 : i32
    %c0_i32_1 = arith.constant 0 : i32
    return %c0_i32, %c0_i32_0 : i32, i32
  }
  func.func @transform_3(%arg0: i32, %arg1: i32, %arg2: i32) -> (i32, i32, i32, i32) {
    %c0_i32 = arith.constant 0 : i32
    %c0_i32_0 = arith.constant 0 : i32
    %c0_i32_1 = arith.constant 0 : i32
    return %arg0, %arg1, %c0_i32, %c0_i32_0 : i32, i32, i32, i32
  }
}

module attributes {stable_mosaic.version = 11 : i64} {
  func.func @_conv_row_kernel(%arg0: i32, %arg1: i32, %arg2: i32, %arg3: memref<1x1x18x32xbf16, #tpu.memory_space<vmem>>, %arg4: memref<1x3x32x8xbf16, #tpu.memory_space<vmem>>, %arg5: memref<1x8xf32, #tpu.memory_space<vmem>>, %arg6: memref<1x1x16x8xbf16, #tpu.memory_space<vmem>>, %arg7: memref<16x8xf32, #tpu.memory_space<vmem>>) attributes {dimension_semantics = [#tpu.dimension_semantics<parallel>, #tpu.dimension_semantics<parallel>, #tpu.dimension_semantics<arbitrary>], iteration_bounds = array<i64: 2, 16, 3>, scalar_prefetch = 0 : i64, scratch_operands = 1 : i64, tpu.core_type = #tpu.core_type<tc>, window_params = [{transform_indices = @transform_0, window_bounds = array<i64: 1, 1, 18, 32>}, {transform_indices = @transform_1, window_bounds = array<i64: 1, 3, 32, 8>}, {pipeline_mode = #tpu.pipeline_mode<synchronous>, transform_indices = @transform_2, window_bounds = array<i64: 1, 8>}, {transform_indices = @transform_3, window_bounds = array<i64: 1, 1, 16, 8>}]} {
    %c0_i32 = arith.constant 0 : i32
    %0 = arith.cmpi eq, %arg2, %c0_i32 : i32
    %1 = arith.extui %0 : i1 to i32
    %c0_i32_0 = arith.constant 0 : i32
    %2 = arith.cmpi ne, %1, %c0_i32_0 : i32
    scf.if %2 {
      %cst_29 = arith.constant 0.000000e+00 : f32
      %33 = vector.broadcast %cst_29 : f32 to vector<16x8xf32>
      %c0_30 = arith.constant 0 : index
      %c0_31 = arith.constant 0 : index
      %34 = vector.load %arg7[%c0_30, %c0_31] : memref<16x8xf32, #tpu.memory_space<vmem>>, vector<16x8xf32>
      tpu.vector_store %arg7[%c0_30, %c0_31], %33 {strides = array<i32>} : memref<16x8xf32, #tpu.memory_space<vmem>>, vector<16x8xf32>,
    } else {
    }
    %c0 = arith.constant 0 : index
    %c0_1 = arith.constant 0 : index
    %c0_2 = arith.constant 0 : index
    %c0_3 = arith.constant 0 : index
    %3 = vector.load %arg3[%c0, %c0_1, %c0_2, %c0_3] : memref<1x1x18x32xbf16, #tpu.memory_space<vmem>>, vector<1x1x18x32xbf16>
    %4 = vector.shape_cast %3 : vector<1x1x18x32xbf16> to vector<18x32xbf16>
    %5 = arith.extf %4 : vector<18x32xbf16> to vector<18x32xf32>
    %6 = vector.extract_strided_slice %5 {offsets = [0, 0], sizes = [16, 32], strides = [1, 1]} : vector<18x32xf32> to vector<16x32xf32>
    %7 = arith.truncf %6 : vector<16x32xf32> to vector<16x32xbf16>
    %c0_4 = arith.constant 0 : index
    %c0_5 = arith.constant 0 : index
    %8 = vector.load %arg7[%c0_4, %c0_5] : memref<16x8xf32, #tpu.memory_space<vmem>>, vector<16x8xf32>
    %c0_6 = arith.constant 0 : index
    %c0_7 = arith.constant 0 : index
    %c0_8 = arith.constant 0 : index
    %c0_9 = arith.constant 0 : index
    %9 = vector.load %arg4[%c0_6, %c0_7, %c0_8, %c0_9] : memref<1x3x32x8xbf16, #tpu.memory_space<vmem>>, vector<1x1x32x8xbf16>
    %10 = vector.shape_cast %9 : vector<1x1x32x8xbf16> to vector<32x8xbf16>
    %cst = arith.constant dense<0.000000e+00> : vector<16x8xf32>
    %11 = tpu.matmul %7, %10, %cst {dimension_numbers = #tpu.dot_dimension_numbers<[1], [0], [0], [1], [0, 0, 1, 1], [], []>} : vector<16x32xbf16>, vector<32x8xbf16>, vector<16x8xf32> -> vector<16x8xf32>
    %12 = arith.addf %8, %11 : vector<16x8xf32>
    %c0_10 = arith.constant 0 : index
    %c0_11 = arith.constant 0 : index
    %13 = vector.load %arg7[%c0_10, %c0_11] : memref<16x8xf32, #tpu.memory_space<vmem>>, vector<16x8xf32>
    tpu.vector_store %arg7[%c0_10, %c0_11], %12 {strides = array<i32>} : memref<16x8xf32, #tpu.memory_space<vmem>>, vector<16x8xf32>,
    %14 = vector.extract_strided_slice %5 {offsets = [1, 0], sizes = [16, 32], strides = [1, 1]} : vector<18x32xf32> to vector<16x32xf32>
    %15 = arith.truncf %14 : vector<16x32xf32> to vector<16x32xbf16>
    %c0_12 = arith.constant 0 : index
    %c0_13 = arith.constant 0 : index
    %16 = vector.load %arg7[%c0_12, %c0_13] : memref<16x8xf32, #tpu.memory_space<vmem>>, vector<16x8xf32>
    %c0_14 = arith.constant 0 : index
    %c1 = arith.constant 1 : index
    %c0_15 = arith.constant 0 : index
    %c0_16 = arith.constant 0 : index
    %17 = vector.load %arg4[%c0_14, %c1, %c0_15, %c0_16] : memref<1x3x32x8xbf16, #tpu.memory_space<vmem>>, vector<1x1x32x8xbf16>
    %18 = vector.shape_cast %17 : vector<1x1x32x8xbf16> to vector<32x8xbf16>
    %cst_17 = arith.constant dense<0.000000e+00> : vector<16x8xf32>
    %19 = tpu.matmul %15, %18, %cst_17 {dimension_numbers = #tpu.dot_dimension_numbers<[1], [0], [0], [1], [0, 0, 1, 1], [], []>} : vector<16x32xbf16>, vector<32x8xbf16>, vector<16x8xf32> -> vector<16x8xf32>
    %20 = arith.addf %16, %19 : vector<16x8xf32>
    %c0_18 = arith.constant 0 : index
    %c0_19 = arith.constant 0 : index
    %21 = vector.load %arg7[%c0_18, %c0_19] : memref<16x8xf32, #tpu.memory_space<vmem>>, vector<16x8xf32>
    tpu.vector_store %arg7[%c0_18, %c0_19], %20 {strides = array<i32>} : memref<16x8xf32, #tpu.memory_space<vmem>>, vector<16x8xf32>,
    %22 = vector.extract_strided_slice %5 {offsets = [2, 0], sizes = [16, 32], strides = [1, 1]} : vector<18x32xf32> to vector<16x32xf32>
    %23 = arith.truncf %22 : vector<16x32xf32> to vector<16x32xbf16>
    %c0_20 = arith.constant 0 : index
    %c0_21 = arith.constant 0 : index
    %24 = vector.load %arg7[%c0_20, %c0_21] : memref<16x8xf32, #tpu.memory_space<vmem>>, vector<16x8xf32>
    %c0_22 = arith.constant 0 : index
    %c2 = arith.constant 2 : index
    %c0_23 = arith.constant 0 : index
    %c0_24 = arith.constant 0 : index
    %25 = vector.load %arg4[%c0_22, %c2, %c0_23, %c0_24] : memref<1x3x32x8xbf16, #tpu.memory_space<vmem>>, vector<1x1x32x8xbf16>
    %26 = vector.shape_cast %25 : vector<1x1x32x8xbf16> to vector<32x8xbf16>
    %cst_25 = arith.constant dense<0.000000e+00> : vector<16x8xf32>
    %27 = tpu.matmul %23, %26, %cst_25 {dimension_numbers = #tpu.dot_dimension_numbers<[1], [0], [0], [1], [0, 0, 1, 1], [], []>} : vector<16x32xbf16>, vector<32x8xbf16>, vector<16x8xf32> -> vector<16x8xf32>
    %28 = arith.addf %24, %27 : vector<16x8xf32>
    %c0_26 = arith.constant 0 : index
    %c0_27 = arith.constant 0 : index
    %29 = vector.load %arg7[%c0_26, %c0_27] : memref<16x8xf32, #tpu.memory_space<vmem>>, vector<16x8xf32>
    tpu.vector_store %arg7[%c0_26, %c0_27], %28 {strides = array<i32>} : memref<16x8xf32, #tpu.memory_space<vmem>>, vector<16x8xf32>,
    %c2_i32 = arith.constant 2 : i32
    %30 = arith.cmpi eq, %arg2, %c2_i32 : i32
    %31 = arith.extui %30 : i1 to i32
    %c0_i32_28 = arith.constant 0 : i32
    %32 = arith.cmpi ne, %31, %c0_i32_28 : i32
    scf.if %32 {
      %c0_29 = arith.constant 0 : index
      %c0_30 = arith.constant 0 : index
      %33 = vector.load %arg7[%c0_29, %c0_30] : memref<16x8xf32, #tpu.memory_space<vmem>>, vector<16x8xf32>
      %c0_31 = arith.constant 0 : index
      %c0_32 = arith.constant 0 : index
      %34 = vector.load %arg5[%c0_31, %c0_32] : memref<1x8xf32, #tpu.memory_space<vmem>>, vector<1x8xf32>
      %35 = vector.broadcast %34 : vector<1x8xf32> to vector<16x8xf32>
      %36 = arith.addf %33, %35 : vector<16x8xf32>
      %cst_33 = arith.constant 0.000000e+00 : f32
      %37 = vector.broadcast %cst_33 : f32 to vector<16x8xf32>
      %38 = arith.maximumf %36, %37 : vector<16x8xf32>
      %39 = arith.truncf %38 : vector<16x8xf32> to vector<16x8xbf16>
      %c0_34 = arith.constant 0 : index
      %c0_35 = arith.constant 0 : index
      %c0_36 = arith.constant 0 : index
      %c0_37 = arith.constant 0 : index
      %40 = vector.load %arg6[%c0_34, %c0_35, %c0_36, %c0_37] : memref<1x1x16x8xbf16, #tpu.memory_space<vmem>>, vector<1x1x16x8xbf16>
      %41 = vector.shape_cast %40 : vector<1x1x16x8xbf16> to vector<16x8xbf16>
      %42 = vector.shape_cast %39 : vector<16x8xbf16> to vector<1x1x16x8xbf16>
      tpu.vector_store %arg6[%c0_34, %c0_35, %c0_36, %c0_37], %42 {strides = array<i32>} : memref<1x1x16x8xbf16, #tpu.memory_space<vmem>>, vector<1x1x16x8xbf16>,
    } else {
    }
    return
  }
  func.func @transform_0(%arg0: i32, %arg1: i32, %arg2: i32) -> (i32, i32, i32, i32) {
    %0 = arith.addi %arg1, %arg2 : i32
    %c0_i32 = arith.constant 0 : i32
    %c0_i32_0 = arith.constant 0 : i32
    %c0_i32_1 = arith.constant 0 : i32
    return %arg0, %0, %c0_i32, %c0_i32_0 : i32, i32, i32, i32
  }
  func.func @transform_1(%arg0: i32, %arg1: i32, %arg2: i32) -> (i32, i32, i32, i32) {
    %c0_i32 = arith.constant 0 : i32
    %c0_i32_0 = arith.constant 0 : i32
    %c0_i32_1 = arith.constant 0 : i32
    %c0_i32_2 = arith.constant 0 : i32
    return %arg2, %c0_i32, %c0_i32_0, %c0_i32_1 : i32, i32, i32, i32
  }
  func.func @transform_2(%arg0: i32, %arg1: i32, %arg2: i32) -> (i32, i32) {
    %c0_i32 = arith.constant 0 : i32
    %c0_i32_0 = arith.constant 0 : i32
    %c0_i32_1 = arith.constant 0 : i32
    return %c0_i32, %c0_i32_0 : i32, i32
  }
  func.func @transform_3(%arg0: i32, %arg1: i32, %arg2: i32) -> (i32, i32, i32, i32) {
    %c0_i32 = arith.constant 0 : i32
    %c0_i32_0 = arith.constant 0 : i32
    %c0_i32_1 = arith.constant 0 : i32
    return %arg0, %arg1, %c0_i32, %c0_i32_0 : i32, i32, i32, i32
  }
}

module attributes {stable_mosaic.version = 11 : i64} {
  func.func @_conv_row_kernel(%arg0: i32, %arg1: i32, %arg2: i32, %arg3: memref<1x1x18x8xbf16, #tpu.memory_space<vmem>>, %arg4: memref<1x3x8x8xbf16, #tpu.memory_space<vmem>>, %arg5: memref<1x8xf32, #tpu.memory_space<vmem>>, %arg6: memref<1x1x16x8xbf16, #tpu.memory_space<vmem>>, %arg7: memref<16x8xf32, #tpu.memory_space<vmem>>) attributes {dimension_semantics = [#tpu.dimension_semantics<parallel>, #tpu.dimension_semantics<parallel>, #tpu.dimension_semantics<arbitrary>], iteration_bounds = array<i64: 2, 16, 3>, scalar_prefetch = 0 : i64, scratch_operands = 1 : i64, tpu.core_type = #tpu.core_type<tc>, window_params = [{transform_indices = @transform_0, window_bounds = array<i64: 1, 1, 18, 8>}, {transform_indices = @transform_1, window_bounds = array<i64: 1, 3, 8, 8>}, {pipeline_mode = #tpu.pipeline_mode<synchronous>, transform_indices = @transform_2, window_bounds = array<i64: 1, 8>}, {transform_indices = @transform_3, window_bounds = array<i64: 1, 1, 16, 8>}]} {
    %c0_i32 = arith.constant 0 : i32
    %0 = arith.cmpi eq, %arg2, %c0_i32 : i32
    %1 = arith.extui %0 : i1 to i32
    %c0_i32_0 = arith.constant 0 : i32
    %2 = arith.cmpi ne, %1, %c0_i32_0 : i32
    scf.if %2 {
      %cst_29 = arith.constant 0.000000e+00 : f32
      %33 = vector.broadcast %cst_29 : f32 to vector<16x8xf32>
      %c0_30 = arith.constant 0 : index
      %c0_31 = arith.constant 0 : index
      %34 = vector.load %arg7[%c0_30, %c0_31] : memref<16x8xf32, #tpu.memory_space<vmem>>, vector<16x8xf32>
      tpu.vector_store %arg7[%c0_30, %c0_31], %33 {strides = array<i32>} : memref<16x8xf32, #tpu.memory_space<vmem>>, vector<16x8xf32>,
    } else {
    }
    %c0 = arith.constant 0 : index
    %c0_1 = arith.constant 0 : index
    %c0_2 = arith.constant 0 : index
    %c0_3 = arith.constant 0 : index
    %3 = vector.load %arg3[%c0, %c0_1, %c0_2, %c0_3] : memref<1x1x18x8xbf16, #tpu.memory_space<vmem>>, vector<1x1x18x8xbf16>
    %4 = vector.shape_cast %3 : vector<1x1x18x8xbf16> to vector<18x8xbf16>
    %5 = arith.extf %4 : vector<18x8xbf16> to vector<18x8xf32>
    %6 = vector.extract_strided_slice %5 {offsets = [0, 0], sizes = [16, 8], strides = [1, 1]} : vector<18x8xf32> to vector<16x8xf32>
    %7 = arith.truncf %6 : vector<16x8xf32> to vector<16x8xbf16>
    %c0_4 = arith.constant 0 : index
    %c0_5 = arith.constant 0 : index
    %8 = vector.load %arg7[%c0_4, %c0_5] : memref<16x8xf32, #tpu.memory_space<vmem>>, vector<16x8xf32>
    %c0_6 = arith.constant 0 : index
    %c0_7 = arith.constant 0 : index
    %c0_8 = arith.constant 0 : index
    %c0_9 = arith.constant 0 : index
    %9 = vector.load %arg4[%c0_6, %c0_7, %c0_8, %c0_9] : memref<1x3x8x8xbf16, #tpu.memory_space<vmem>>, vector<1x1x8x8xbf16>
    %10 = vector.shape_cast %9 : vector<1x1x8x8xbf16> to vector<8x8xbf16>
    %cst = arith.constant dense<0.000000e+00> : vector<16x8xf32>
    %11 = tpu.matmul %7, %10, %cst {dimension_numbers = #tpu.dot_dimension_numbers<[1], [0], [0], [1], [0, 0, 1, 1], [], []>} : vector<16x8xbf16>, vector<8x8xbf16>, vector<16x8xf32> -> vector<16x8xf32>
    %12 = arith.addf %8, %11 : vector<16x8xf32>
    %c0_10 = arith.constant 0 : index
    %c0_11 = arith.constant 0 : index
    %13 = vector.load %arg7[%c0_10, %c0_11] : memref<16x8xf32, #tpu.memory_space<vmem>>, vector<16x8xf32>
    tpu.vector_store %arg7[%c0_10, %c0_11], %12 {strides = array<i32>} : memref<16x8xf32, #tpu.memory_space<vmem>>, vector<16x8xf32>,
    %14 = vector.extract_strided_slice %5 {offsets = [1, 0], sizes = [16, 8], strides = [1, 1]} : vector<18x8xf32> to vector<16x8xf32>
    %15 = arith.truncf %14 : vector<16x8xf32> to vector<16x8xbf16>
    %c0_12 = arith.constant 0 : index
    %c0_13 = arith.constant 0 : index
    %16 = vector.load %arg7[%c0_12, %c0_13] : memref<16x8xf32, #tpu.memory_space<vmem>>, vector<16x8xf32>
    %c0_14 = arith.constant 0 : index
    %c1 = arith.constant 1 : index
    %c0_15 = arith.constant 0 : index
    %c0_16 = arith.constant 0 : index
    %17 = vector.load %arg4[%c0_14, %c1, %c0_15, %c0_16] : memref<1x3x8x8xbf16, #tpu.memory_space<vmem>>, vector<1x1x8x8xbf16>
    %18 = vector.shape_cast %17 : vector<1x1x8x8xbf16> to vector<8x8xbf16>
    %cst_17 = arith.constant dense<0.000000e+00> : vector<16x8xf32>
    %19 = tpu.matmul %15, %18, %cst_17 {dimension_numbers = #tpu.dot_dimension_numbers<[1], [0], [0], [1], [0, 0, 1, 1], [], []>} : vector<16x8xbf16>, vector<8x8xbf16>, vector<16x8xf32> -> vector<16x8xf32>
    %20 = arith.addf %16, %19 : vector<16x8xf32>
    %c0_18 = arith.constant 0 : index
    %c0_19 = arith.constant 0 : index
    %21 = vector.load %arg7[%c0_18, %c0_19] : memref<16x8xf32, #tpu.memory_space<vmem>>, vector<16x8xf32>
    tpu.vector_store %arg7[%c0_18, %c0_19], %20 {strides = array<i32>} : memref<16x8xf32, #tpu.memory_space<vmem>>, vector<16x8xf32>,
    %22 = vector.extract_strided_slice %5 {offsets = [2, 0], sizes = [16, 8], strides = [1, 1]} : vector<18x8xf32> to vector<16x8xf32>
    %23 = arith.truncf %22 : vector<16x8xf32> to vector<16x8xbf16>
    %c0_20 = arith.constant 0 : index
    %c0_21 = arith.constant 0 : index
    %24 = vector.load %arg7[%c0_20, %c0_21] : memref<16x8xf32, #tpu.memory_space<vmem>>, vector<16x8xf32>
    %c0_22 = arith.constant 0 : index
    %c2 = arith.constant 2 : index
    %c0_23 = arith.constant 0 : index
    %c0_24 = arith.constant 0 : index
    %25 = vector.load %arg4[%c0_22, %c2, %c0_23, %c0_24] : memref<1x3x8x8xbf16, #tpu.memory_space<vmem>>, vector<1x1x8x8xbf16>
    %26 = vector.shape_cast %25 : vector<1x1x8x8xbf16> to vector<8x8xbf16>
    %cst_25 = arith.constant dense<0.000000e+00> : vector<16x8xf32>
    %27 = tpu.matmul %23, %26, %cst_25 {dimension_numbers = #tpu.dot_dimension_numbers<[1], [0], [0], [1], [0, 0, 1, 1], [], []>} : vector<16x8xbf16>, vector<8x8xbf16>, vector<16x8xf32> -> vector<16x8xf32>
    %28 = arith.addf %24, %27 : vector<16x8xf32>
    %c0_26 = arith.constant 0 : index
    %c0_27 = arith.constant 0 : index
    %29 = vector.load %arg7[%c0_26, %c0_27] : memref<16x8xf32, #tpu.memory_space<vmem>>, vector<16x8xf32>
    tpu.vector_store %arg7[%c0_26, %c0_27], %28 {strides = array<i32>} : memref<16x8xf32, #tpu.memory_space<vmem>>, vector<16x8xf32>,
    %c2_i32 = arith.constant 2 : i32
    %30 = arith.cmpi eq, %arg2, %c2_i32 : i32
    %31 = arith.extui %30 : i1 to i32
    %c0_i32_28 = arith.constant 0 : i32
    %32 = arith.cmpi ne, %31, %c0_i32_28 : i32
    scf.if %32 {
      %c0_29 = arith.constant 0 : index
      %c0_30 = arith.constant 0 : index
      %33 = vector.load %arg7[%c0_29, %c0_30] : memref<16x8xf32, #tpu.memory_space<vmem>>, vector<16x8xf32>
      %c0_31 = arith.constant 0 : index
      %c0_32 = arith.constant 0 : index
      %34 = vector.load %arg5[%c0_31, %c0_32] : memref<1x8xf32, #tpu.memory_space<vmem>>, vector<1x8xf32>
      %35 = vector.broadcast %34 : vector<1x8xf32> to vector<16x8xf32>
      %36 = arith.addf %33, %35 : vector<16x8xf32>
      %cst_33 = arith.constant 0.000000e+00 : f32
      %37 = vector.broadcast %cst_33 : f32 to vector<16x8xf32>
      %38 = arith.maximumf %36, %37 : vector<16x8xf32>
      %39 = arith.truncf %38 : vector<16x8xf32> to vector<16x8xbf16>
      %c0_34 = arith.constant 0 : index
      %c0_35 = arith.constant 0 : index
      %c0_36 = arith.constant 0 : index
      %c0_37 = arith.constant 0 : index
      %40 = vector.load %arg6[%c0_34, %c0_35, %c0_36, %c0_37] : memref<1x1x16x8xbf16, #tpu.memory_space<vmem>>, vector<1x1x16x8xbf16>
      %41 = vector.shape_cast %40 : vector<1x1x16x8xbf16> to vector<16x8xbf16>
      %42 = vector.shape_cast %39 : vector<16x8xbf16> to vector<1x1x16x8xbf16>
      tpu.vector_store %arg6[%c0_34, %c0_35, %c0_36, %c0_37], %42 {strides = array<i32>} : memref<1x1x16x8xbf16, #tpu.memory_space<vmem>>, vector<1x1x16x8xbf16>,
    } else {
    }
    return
  }
  func.func @transform_0(%arg0: i32, %arg1: i32, %arg2: i32) -> (i32, i32, i32, i32) {
    %0 = arith.addi %arg1, %arg2 : i32
    %c0_i32 = arith.constant 0 : i32
    %c0_i32_0 = arith.constant 0 : i32
    %c0_i32_1 = arith.constant 0 : i32
    return %arg0, %0, %c0_i32, %c0_i32_0 : i32, i32, i32, i32
  }
  func.func @transform_1(%arg0: i32, %arg1: i32, %arg2: i32) -> (i32, i32, i32, i32) {
    %c0_i32 = arith.constant 0 : i32
    %c0_i32_0 = arith.constant 0 : i32
    %c0_i32_1 = arith.constant 0 : i32
    %c0_i32_2 = arith.constant 0 : i32
    return %arg2, %c0_i32, %c0_i32_0, %c0_i32_1 : i32, i32, i32, i32
  }
  func.func @transform_2(%arg0: i32, %arg1: i32, %arg2: i32) -> (i32, i32) {
    %c0_i32 = arith.constant 0 : i32
    %c0_i32_0 = arith.constant 0 : i32
    %c0_i32_1 = arith.constant 0 : i32
    return %c0_i32, %c0_i32_0 : i32, i32
  }
  func.func @transform_3(%arg0: i32, %arg1: i32, %arg2: i32) -> (i32, i32, i32, i32) {
    %c0_i32 = arith.constant 0 : i32
    %c0_i32_0 = arith.constant 0 : i32
    %c0_i32_1 = arith.constant 0 : i32
    return %arg0, %arg1, %c0_i32, %c0_i32_0 : i32, i32, i32, i32
  }
}

module attributes {stable_mosaic.version = 11 : i64} {
  func.func @_conv_row_kernel(%arg0: i32, %arg1: i32, %arg2: i32, %arg3: memref<1x1x16x16xbf16, #tpu.memory_space<vmem>>, %arg4: memref<1x1x16x16xbf16, #tpu.memory_space<vmem>>, %arg5: memref<1x16xf32, #tpu.memory_space<vmem>>, %arg6: memref<1x1x16x16xbf16, #tpu.memory_space<vmem>>, %arg7: memref<16x16xf32, #tpu.memory_space<vmem>>) attributes {dimension_semantics = [#tpu.dimension_semantics<parallel>, #tpu.dimension_semantics<parallel>, #tpu.dimension_semantics<arbitrary>], iteration_bounds = array<i64: 2, 16, 1>, scalar_prefetch = 0 : i64, scratch_operands = 1 : i64, tpu.core_type = #tpu.core_type<tc>, window_params = [{transform_indices = @transform_0, window_bounds = array<i64: 1, 1, 16, 16>}, {transform_indices = @transform_1, window_bounds = array<i64: 1, 1, 16, 16>}, {pipeline_mode = #tpu.pipeline_mode<synchronous>, transform_indices = @transform_2, window_bounds = array<i64: 1, 16>}, {transform_indices = @transform_3, window_bounds = array<i64: 1, 1, 16, 16>}]} {
    %c0_i32 = arith.constant 0 : i32
    %0 = arith.cmpi eq, %arg2, %c0_i32 : i32
    %1 = arith.extui %0 : i1 to i32
    %c0_i32_0 = arith.constant 0 : i32
    %2 = arith.cmpi ne, %1, %c0_i32_0 : i32
    scf.if %2 {
      %cst_14 = arith.constant 0.000000e+00 : f32
      %16 = vector.broadcast %cst_14 : f32 to vector<16x16xf32>
      %c0_15 = arith.constant 0 : index
      %c0_16 = arith.constant 0 : index
      %17 = vector.load %arg7[%c0_15, %c0_16] : memref<16x16xf32, #tpu.memory_space<vmem>>, vector<16x16xf32>
      tpu.vector_store %arg7[%c0_15, %c0_16], %16 {strides = array<i32>} : memref<16x16xf32, #tpu.memory_space<vmem>>, vector<16x16xf32>,
    } else {
    }
    %c0 = arith.constant 0 : index
    %c0_1 = arith.constant 0 : index
    %c0_2 = arith.constant 0 : index
    %c0_3 = arith.constant 0 : index
    %3 = vector.load %arg3[%c0, %c0_1, %c0_2, %c0_3] : memref<1x1x16x16xbf16, #tpu.memory_space<vmem>>, vector<1x1x16x16xbf16>
    %4 = vector.shape_cast %3 : vector<1x1x16x16xbf16> to vector<16x16xbf16>
    %5 = arith.extf %4 : vector<16x16xbf16> to vector<16x16xf32>
    %6 = arith.truncf %5 : vector<16x16xf32> to vector<16x16xbf16>
    %c0_4 = arith.constant 0 : index
    %c0_5 = arith.constant 0 : index
    %7 = vector.load %arg7[%c0_4, %c0_5] : memref<16x16xf32, #tpu.memory_space<vmem>>, vector<16x16xf32>
    %c0_6 = arith.constant 0 : index
    %c0_7 = arith.constant 0 : index
    %c0_8 = arith.constant 0 : index
    %c0_9 = arith.constant 0 : index
    %8 = vector.load %arg4[%c0_6, %c0_7, %c0_8, %c0_9] : memref<1x1x16x16xbf16, #tpu.memory_space<vmem>>, vector<1x1x16x16xbf16>
    %9 = vector.shape_cast %8 : vector<1x1x16x16xbf16> to vector<16x16xbf16>
    %cst = arith.constant dense<0.000000e+00> : vector<16x16xf32>
    %10 = tpu.matmul %6, %9, %cst {dimension_numbers = #tpu.dot_dimension_numbers<[1], [0], [0], [1], [0, 0, 1, 1], [], []>} : vector<16x16xbf16>, vector<16x16xbf16>, vector<16x16xf32> -> vector<16x16xf32>
    %11 = arith.addf %7, %10 : vector<16x16xf32>
    %c0_10 = arith.constant 0 : index
    %c0_11 = arith.constant 0 : index
    %12 = vector.load %arg7[%c0_10, %c0_11] : memref<16x16xf32, #tpu.memory_space<vmem>>, vector<16x16xf32>
    tpu.vector_store %arg7[%c0_10, %c0_11], %11 {strides = array<i32>} : memref<16x16xf32, #tpu.memory_space<vmem>>, vector<16x16xf32>,
    %c0_i32_12 = arith.constant 0 : i32
    %13 = arith.cmpi eq, %arg2, %c0_i32_12 : i32
    %14 = arith.extui %13 : i1 to i32
    %c0_i32_13 = arith.constant 0 : i32
    %15 = arith.cmpi ne, %14, %c0_i32_13 : i32
    scf.if %15 {
      %c0_14 = arith.constant 0 : index
      %c0_15 = arith.constant 0 : index
      %16 = vector.load %arg7[%c0_14, %c0_15] : memref<16x16xf32, #tpu.memory_space<vmem>>, vector<16x16xf32>
      %c0_16 = arith.constant 0 : index
      %c0_17 = arith.constant 0 : index
      %17 = vector.load %arg5[%c0_16, %c0_17] : memref<1x16xf32, #tpu.memory_space<vmem>>, vector<1x16xf32>
      %18 = vector.broadcast %17 : vector<1x16xf32> to vector<16x16xf32>
      %19 = arith.addf %16, %18 : vector<16x16xf32>
      %cst_18 = arith.constant 0.000000e+00 : f32
      %20 = vector.broadcast %cst_18 : f32 to vector<16x16xf32>
      %21 = arith.maximumf %19, %20 : vector<16x16xf32>
      %22 = arith.truncf %21 : vector<16x16xf32> to vector<16x16xbf16>
      %c0_19 = arith.constant 0 : index
      %c0_20 = arith.constant 0 : index
      %c0_21 = arith.constant 0 : index
      %c0_22 = arith.constant 0 : index
      %23 = vector.load %arg6[%c0_19, %c0_20, %c0_21, %c0_22] : memref<1x1x16x16xbf16, #tpu.memory_space<vmem>>, vector<1x1x16x16xbf16>
      %24 = vector.shape_cast %23 : vector<1x1x16x16xbf16> to vector<16x16xbf16>
      %25 = vector.shape_cast %22 : vector<16x16xbf16> to vector<1x1x16x16xbf16>
      tpu.vector_store %arg6[%c0_19, %c0_20, %c0_21, %c0_22], %25 {strides = array<i32>} : memref<1x1x16x16xbf16, #tpu.memory_space<vmem>>, vector<1x1x16x16xbf16>,
    } else {
    }
    return
  }
  func.func @transform_0(%arg0: i32, %arg1: i32, %arg2: i32) -> (i32, i32, i32, i32) {
    %0 = arith.addi %arg1, %arg2 : i32
    %c0_i32 = arith.constant 0 : i32
    %c0_i32_0 = arith.constant 0 : i32
    %c0_i32_1 = arith.constant 0 : i32
    return %arg0, %0, %c0_i32, %c0_i32_0 : i32, i32, i32, i32
  }
  func.func @transform_1(%arg0: i32, %arg1: i32, %arg2: i32) -> (i32, i32, i32, i32) {
    %c0_i32 = arith.constant 0 : i32
    %c0_i32_0 = arith.constant 0 : i32
    %c0_i32_1 = arith.constant 0 : i32
    %c0_i32_2 = arith.constant 0 : i32
    return %arg2, %c0_i32, %c0_i32_0, %c0_i32_1 : i32, i32, i32, i32
  }
  func.func @transform_2(%arg0: i32, %arg1: i32, %arg2: i32) -> (i32, i32) {
    %c0_i32 = arith.constant 0 : i32
    %c0_i32_0 = arith.constant 0 : i32
    %c0_i32_1 = arith.constant 0 : i32
    return %c0_i32, %c0_i32_0 : i32, i32
  }
  func.func @transform_3(%arg0: i32, %arg1: i32, %arg2: i32) -> (i32, i32, i32, i32) {
    %c0_i32 = arith.constant 0 : i32
    %c0_i32_0 = arith.constant 0 : i32
    %c0_i32_1 = arith.constant 0 : i32
    return %arg0, %arg1, %c0_i32, %c0_i32_0 : i32, i32, i32, i32
  }
}

module attributes {stable_mosaic.version = 11 : i64} {
  func.func @_conv_row_kernel(%arg0: i32, %arg1: i32, %arg2: i32, %arg3: memref<1x1x16x16xbf16, #tpu.memory_space<vmem>>, %arg4: memref<1x1x16x3xbf16, #tpu.memory_space<vmem>>, %arg5: memref<1x3xf32, #tpu.memory_space<vmem>>, %arg6: memref<1x1x16x3xf32, #tpu.memory_space<vmem>>, %arg7: memref<16x3xf32, #tpu.memory_space<vmem>>) attributes {dimension_semantics = [#tpu.dimension_semantics<parallel>, #tpu.dimension_semantics<parallel>, #tpu.dimension_semantics<arbitrary>], iteration_bounds = array<i64: 2, 16, 1>, scalar_prefetch = 0 : i64, scratch_operands = 1 : i64, tpu.core_type = #tpu.core_type<tc>, window_params = [{transform_indices = @transform_0, window_bounds = array<i64: 1, 1, 16, 16>}, {transform_indices = @transform_1, window_bounds = array<i64: 1, 1, 16, 3>}, {pipeline_mode = #tpu.pipeline_mode<synchronous>, transform_indices = @transform_2, window_bounds = array<i64: 1, 3>}, {transform_indices = @transform_3, window_bounds = array<i64: 1, 1, 16, 3>}]} {
    %c0_i32 = arith.constant 0 : i32
    %0 = arith.cmpi eq, %arg2, %c0_i32 : i32
    %1 = arith.extui %0 : i1 to i32
    %c0_i32_0 = arith.constant 0 : i32
    %2 = arith.cmpi ne, %1, %c0_i32_0 : i32
    scf.if %2 {
      %cst_14 = arith.constant 0.000000e+00 : f32
      %16 = vector.broadcast %cst_14 : f32 to vector<16x3xf32>
      %c0_15 = arith.constant 0 : index
      %c0_16 = arith.constant 0 : index
      %17 = vector.load %arg7[%c0_15, %c0_16] : memref<16x3xf32, #tpu.memory_space<vmem>>, vector<16x3xf32>
      tpu.vector_store %arg7[%c0_15, %c0_16], %16 {strides = array<i32>} : memref<16x3xf32, #tpu.memory_space<vmem>>, vector<16x3xf32>,
    } else {
    }
    %c0 = arith.constant 0 : index
    %c0_1 = arith.constant 0 : index
    %c0_2 = arith.constant 0 : index
    %c0_3 = arith.constant 0 : index
    %3 = vector.load %arg3[%c0, %c0_1, %c0_2, %c0_3] : memref<1x1x16x16xbf16, #tpu.memory_space<vmem>>, vector<1x1x16x16xbf16>
    %4 = vector.shape_cast %3 : vector<1x1x16x16xbf16> to vector<16x16xbf16>
    %5 = arith.extf %4 : vector<16x16xbf16> to vector<16x16xf32>
    %6 = arith.truncf %5 : vector<16x16xf32> to vector<16x16xbf16>
    %c0_4 = arith.constant 0 : index
    %c0_5 = arith.constant 0 : index
    %7 = vector.load %arg7[%c0_4, %c0_5] : memref<16x3xf32, #tpu.memory_space<vmem>>, vector<16x3xf32>
    %c0_6 = arith.constant 0 : index
    %c0_7 = arith.constant 0 : index
    %c0_8 = arith.constant 0 : index
    %c0_9 = arith.constant 0 : index
    %8 = vector.load %arg4[%c0_6, %c0_7, %c0_8, %c0_9] : memref<1x1x16x3xbf16, #tpu.memory_space<vmem>>, vector<1x1x16x3xbf16>
    %9 = vector.shape_cast %8 : vector<1x1x16x3xbf16> to vector<16x3xbf16>
    %cst = arith.constant dense<0.000000e+00> : vector<16x3xf32>
    %10 = tpu.matmul %6, %9, %cst {dimension_numbers = #tpu.dot_dimension_numbers<[1], [0], [0], [1], [0, 0, 1, 1], [], []>} : vector<16x16xbf16>, vector<16x3xbf16>, vector<16x3xf32> -> vector<16x3xf32>
    %11 = arith.addf %7, %10 : vector<16x3xf32>
    %c0_10 = arith.constant 0 : index
    %c0_11 = arith.constant 0 : index
    %12 = vector.load %arg7[%c0_10, %c0_11] : memref<16x3xf32, #tpu.memory_space<vmem>>, vector<16x3xf32>
    tpu.vector_store %arg7[%c0_10, %c0_11], %11 {strides = array<i32>} : memref<16x3xf32, #tpu.memory_space<vmem>>, vector<16x3xf32>,
    %c0_i32_12 = arith.constant 0 : i32
    %13 = arith.cmpi eq, %arg2, %c0_i32_12 : i32
    %14 = arith.extui %13 : i1 to i32
    %c0_i32_13 = arith.constant 0 : i32
    %15 = arith.cmpi ne, %14, %c0_i32_13 : i32
    scf.if %15 {
      %c0_14 = arith.constant 0 : index
      %c0_15 = arith.constant 0 : index
      %16 = vector.load %arg7[%c0_14, %c0_15] : memref<16x3xf32, #tpu.memory_space<vmem>>, vector<16x3xf32>
      %c0_16 = arith.constant 0 : index
      %c0_17 = arith.constant 0 : index
      %17 = vector.load %arg5[%c0_16, %c0_17] : memref<1x3xf32, #tpu.memory_space<vmem>>, vector<1x3xf32>
      %18 = vector.broadcast %17 : vector<1x3xf32> to vector<16x3xf32>
      %19 = arith.addf %16, %18 : vector<16x3xf32>
      %c0_18 = arith.constant 0 : index
      %c0_19 = arith.constant 0 : index
      %c0_20 = arith.constant 0 : index
      %c0_21 = arith.constant 0 : index
      %20 = vector.load %arg6[%c0_18, %c0_19, %c0_20, %c0_21] : memref<1x1x16x3xf32, #tpu.memory_space<vmem>>, vector<1x1x16x3xf32>
      %21 = vector.shape_cast %20 : vector<1x1x16x3xf32> to vector<16x3xf32>
      %22 = vector.shape_cast %19 : vector<16x3xf32> to vector<1x1x16x3xf32>
      tpu.vector_store %arg6[%c0_18, %c0_19, %c0_20, %c0_21], %22 {strides = array<i32>} : memref<1x1x16x3xf32, #tpu.memory_space<vmem>>, vector<1x1x16x3xf32>,
    } else {
    }
    return
  }
  func.func @transform_0(%arg0: i32, %arg1: i32, %arg2: i32) -> (i32, i32, i32, i32) {
    %0 = arith.addi %arg1, %arg2 : i32
    %c0_i32 = arith.constant 0 : i32
    %c0_i32_0 = arith.constant 0 : i32
    %c0_i32_1 = arith.constant 0 : i32
    return %arg0, %0, %c0_i32, %c0_i32_0 : i32, i32, i32, i32
  }
  func.func @transform_1(%arg0: i32, %arg1: i32, %arg2: i32) -> (i32, i32, i32, i32) {
    %c0_i32 = arith.constant 0 : i32
    %c0_i32_0 = arith.constant 0 : i32
    %c0_i32_1 = arith.constant 0 : i32
    %c0_i32_2 = arith.constant 0 : i32
    return %arg2, %c0_i32, %c0_i32_0, %c0_i32_1 : i32, i32, i32, i32
  }
  func.func @transform_2(%arg0: i32, %arg1: i32, %arg2: i32) -> (i32, i32) {
    %c0_i32 = arith.constant 0 : i32
    %c0_i32_0 = arith.constant 0 : i32
    %c0_i32_1 = arith.constant 0 : i32
    return %c0_i32, %c0_i32_0 : i32, i32
  }
  func.func @transform_3(%arg0: i32, %arg1: i32, %arg2: i32) -> (i32, i32, i32, i32) {
    %c0_i32 = arith.constant 0 : i32
    %c0_i32_0 = arith.constant 0 : i32
    %c0_i32_1 = arith.constant 0 : i32
    return %arg0, %arg1, %c0_i32, %c0_i32_0 : i32, i32, i32, i32
  }
}

</mosaic_0001>

<bundles_post_ra>
// kernel: unet_forward.19
= control target key start
LH: loop header
LB: loop body
LE: loop exit
PB: predicated region body
PF: predicated region fallthrough
CT: control target
= control target key end

     0   :  { %s1061_s12 = smov 0   ;;  %s1063_s13 = smov 0   ;;  %s1226_s0 = inlined_call_operand.vmem [shape: bf16[2,22,22,8], index: 0, kind: input, shape index: {}]   ;;  %s1227_s1 = inlined_call_operand.vmem [shape: bf16[7,7,8,8], index: 1, kind: input, shape index: {}]   ;;  %s1228_s2 = inlined_call_operand.vmem [shape: f32[1,8], index: 2, kind: input, shape index: {}]   ;;  %s1229_s3 = inlined_call_operand.vmem [shape: bf16[2,16,16,8], index: 3, kind: output, shape index: {}]  }
   0x1   :  { %s1065_s14 = smov 0   ;;  %s1067_s15 = smov 0  }
   0x2   :  { %s1069_s16 = smov 0   ;;  %s1071_s17 = smov 0  }
   0x3   :  { %s1073_s18 = smov 0  }
   0x4 LB: > { %s25_s19 = sadd.s32 1, %s1024_s15  ;;  %s28_s20 = sadd.s32 1, %s1028_s16  ;;  %s1036_s18 = sphi %s1073_s18, %s13_s18   ;;  %s1032_s17 = sphi %s1071_s17, %s1237_s17   ;;  %s1028_s16 = sphi %s1069_s16, %s1236_s16   ;;  %s1024_s15 = sphi %s1067_s15, %s1235_s15   ;;  %s1020_s14 = sphi %s1065_s14, %s1234_s14   ;;  %s1016_s13 = sphi %s1063_s13, %s1233_s13   ;;  %s1012_s12 = sphi %s1061_s12, %s1232_s12  }
   0x5   : > { %p26_p0 = scmp.ge.s32.totalorder %s25_s19, 7  ;;  %p832_p1 = scmp.ge.s32.totalorder %s1036_s18, 1 }
   0x6   : > { %p178_p2 = scmp.lt.s32.totalorder %s1036_s18, 225  ;;  %s32_s21 = sadd.s32 1, %s1032_s17 }
   0x7   : > { %s1239_s19 = smov (%p26_p0, %s25_s19), 0  ;;  %s1241_s20 = smov (!%p26_p0, %s28_s20), %s1028_s16 }
   0x8   : > { %p179_p3 = pnand %p832_p1, %p178_p2  ;;  %p30_p4 = scmp.ge.s32.totalorder %s1241_s20, 16 }
   0x9   : > { %s216_s22 = sadd.s32 (!%p179_p3), %s1012_s12, %s1016_s13  ;;  %p217_p6 = scmp.lt.s32.totalorder (!%p179_p3), %s1020_s14, 1 }
   0xa   : > { %s1243_s20 = smov (%p30_p4, %s1241_s20), 0  ;;  %s1245_s21 = smov (!%p30_p4, %s32_s21), %s1032_s17 }
   0xb   : > { %p34_p5 = scmp.ge.s32.totalorder %s1245_s21, 2  ;;  %182 = sbr.rel (%p179_p3) target bundleno = 329 (0x149), region = 32 }
   0xc   : > { %p219_p7 = scmp.lt.s32.totalorder (!%p179_p3), %s216_s22, 21  ;;  %p227_p8 = scmp.lt.s32.totalorder (!%p179_p3), %s1012_s12, 6 }
   0xd   : > { %s1247_s21 = smov (%p34_p5, %s1245_s21), 0  ;;  %p234_p9 = scmp.lt.s32.totalorder (!%p179_p3), %s1016_s13, 15 }
   0xe   : > { %1230 = sst [smem:[#allocation3_spill]] %s1247_s21  ;;  %p838_p10 = scmp.ne.s32.totalorder (!%p179_p3), %s1012_s12, 0 }
  0x12   : > { %s1249_s14 = smov (!%p217_p6, %s1020_s14), 1  ;;  %s1251_s22 = smov (!%p219_p7, %s216_s22), 21 }
  0x13   : > { %s919_s23 = smul.u32 66, %s1249_s14  ;;  %s836_s8 = sshll.u32 %s1249_s14, 5  ;;  %vm246_vm0 = vcmask (!%p838_p10), 64512   ;;  %v1038_v0 = vmov (!%p838_p10), 0.0  }
  0x14   : > { %s918_s24 = smul.u32 3, %s1251_s22  ;;  %s1253_s13 = smov (!%p234_p9, %s1016_s13), 15  ;;  %247 = vst.msk [vmem:[#allocation2] sm:$0xff] (!%p838_p10), %vm246_vm0, %v1038_v0  ;;  %248 = vst.msk [vmem:[#allocation2 + $0x8] sm:$0xff] (!%p838_p10), %vm246_vm0, %v1038_v0 }
  0x15   : > { %s228_s25 = scalar_select %p227_p8, %s1012_s12, 6 }
  0x16   : > { %s223_s26 = sadd.s32 %s919_s23, %s918_s24  ;;  %s835_s9 = sshll.u32 %s1253_s13, 1 }
  0x17   : > { %s833_s27 = sshll.u32 %s223_s26, 2  ;;  %s920_s28 = smul.u32 28, %s228_s25 }
  0x18   : > { %s225_s4 = scalar_lea.vmem %s1226_s0, %s833_s27  ;;  %s238_s10 = sadd.s32 %s836_s8, %s835_s9 }
  0x19   : > { %s1118_s7 = scalar_lea.vmem %s1227_s1, %s920_s28  ;;  %s837_s11 = sshll.u32 %s238_s10, 2 }
  0x1a   : > { %s1124_s23 = scalar_lea.vmem %s1229_s3, %s837_s11  ;;  %245 = sbr.rel (%p838_p10) target bundleno = 33 (0x21), region = 36 }
  0x21 PF: > { %v258_v1 = vld [vmem:[%s1118_s7] sm:$0xf]  ;;  %vm263_vm1 = vcmask 1043456   ;;  %v1039_v3 = vmov 0.0   ;;  %vm1040_vm2 = vmmov 0   ;;  %vm259_vm3 = vcmask 64512  }
  0x22   : > { %v1128_v2 = vld [vmem:[%s225_s4] sm:$0xff]   ;;  %876 = vmatprep.subr.bf16.mxu0 %v1039_v3  ;;  %v265_v4 = vsel %vm263_vm1, %v258_v1, 0  ;;  %878 = vmatprep.mubr.msk.bf16.mxu0 %vm1040_vm2, %v1039_v3  ;;  %v1139_v7 = vld [vmem:[%s225_s4 + $0x8] ss:$0 sps:$4 sm:$0x77]   ;;  %vm386_vm5 = vcmask 1046528  }
  0x23   : > { %877 = vmatpush3.bf16.msra.mxu0 %v265_v4  ;;  %882 = vmatprep.subr.bf16.mxu1 %v1039_v3  ;;  %v842_v5 = vld [vmem:[%s1118_s7 + $0x4] sm:$0xf]  ;;  %v318_v8 = vshrl.u32 %v1128_v2, 16  ;;  %v320_v9 = vshll.u32 %v1128_v2, 16  ;;  %vm317_vm4 = vsmask.f32 7424 }
  0x24   : > { %v333_v6 = vsel %vm263_vm1, %v842_v5, 0  ;;  %884 = vmatprep.mubr.msk.bf16.mxu1 %vm1040_vm2, %v1039_v3  ;;  %888 = vmatprep.subr.bf16.mxu0 %v1039_v3  ;;  %v844_v10 = vld [vmem:[%s1118_s7 + $0x8] sm:$0xf]  ;;  %v325_v12 = vshll.u32 %v1139_v7, 16  ;;  %v846_v14 = vld [vmem:[%s1118_s7 + $0xc] sm:$0xf] }
  0x25   : > { %883 = vmatpush3.bf16.msra.mxu1 %v333_v6  ;;  %v322_v11 = vrot.slane %v320_v9, 1  ;;  %v394_v13 = vsel %vm263_vm1, %v844_v10, 0  ;;  %v387_v15 = vrot.slane %v1128_v2, 1  ;;  %v388_v16 = vrot.slane %v1139_v7, 1  ;;  %v848_v24 = vld [vmem:[%s1118_s7 + $0x10] sm:$0xf] }
  0x26   : > { %879 = vmatmul.mubr.msk.bf16.vlgmr.msra.gmra.mrb[0].mxu0 %vm259_vm3, %v1128_v2  ;;  %894 = vmatprep.subr.bf16.mxu1 %v1039_v3  ;;  %v446_v17 = vrot.slane %v318_v8, 1  ;;  %v327_v19 = vrot.slane %v325_v12, 1  ;;  %v447_v20 = vrot.slane %v320_v9, 2  ;;  %v449_v21 = vshrl.u32 %v1139_v7, 16  ;;  %v850_v31 = vld [vmem:[%s1118_s7 + $0x14] sm:$0xf] }
  0x27   : > { %889 = vmatpush3.bf16.msra.mxu0 %v394_v13  ;;  %890 = vmatprep.mubr.msk.bf16.mxu0 %vm1040_vm2, %v1039_v3  ;;  %v323_v18 = vor.u32 %v322_v11, %v318_v8  ;;  %v459_v22 = vsel %vm263_vm1, %v846_v14, 0  ;;  %v452_v23 = vrot.slane %v325_v12, 2  ;;  %v389_v27 = vsel %vm386_vm5, %v387_v15, %v388_v16  ;;  %v852_v40 = vld [vmem:[%s1118_s7 + $0x18] sm:$0xf]  ;;  %v256_v49 = vld [vmem:[#allocation2] sm:$0xff]  ;;  %v257_v51 = vld [vmem:[#allocation2 + $0x8] sm:$0xff] }
  0x28   : > { %900 = vmatprep.subr.bf16.mxu0 %v1039_v3  ;;  %v451_v26 = vrot.slane %v449_v21, 1  ;;  %v448_v28 = vor.u32 %v447_v20, %v446_v17  ;;  %v518_v30 = vsel %vm263_vm1, %v848_v24, 0  ;;  %vm445_vm6 = vsmask.f32 6400  ;;  %p854_p11 = scmp.ne.s32.totalorder %s1012_s12, 6 }
  0x29   : > { %v328_v25 = vsel %vm317_vm4, %v323_v18, %v327_v19  ;;  %vm510_vm7 = vcmask 1045504   ;;  %v511_v32 = vrot.slane %v1128_v2, 2  ;;  %v512_v33 = vrot.slane %v1139_v7, 2 }
  0x2a   : > { %885 = vmatmul.mubr.msk.bf16.vlgmr.msra.gmra.mrb[0].mxu1 %vm259_vm3, %v328_v25  ;;  %v453_v29 = vor.u32 %v452_v23, %v451_v26  ;;  %v570_v34 = vrot.slane %v318_v8, 2  ;;  %v571_v36 = vrot.slane %v320_v9, 3  ;;  %v573_v37 = vrot.slane %v449_v21, 2 }
  0x2b   : > { %895 = vmatpush3.bf16.msra.mxu1 %v459_v22  ;;  %896 = vmatprep.mubr.msk.bf16.mxu1 %vm1040_vm2, %v1039_v3  ;;  %v574_v38 = vrot.slane %v325_v12, 3  ;;  %v581_v39 = vsel %vm263_vm1, %v850_v31, 0  ;;  %v513_v41 = vsel %vm510_vm7, %v511_v32, %v512_v33  ;;  %v640_v44 = vsel %vm263_vm1, %v852_v40, 0 }
  0x2c   : > { %906 = vmatprep.subr.bf16.mxu1 %v1039_v3  ;;  %v454_v35 = vsel %vm445_vm6, %v448_v28, %v453_v29  ;;  %v572_v42 = vor.u32 %v571_v36, %v570_v34  ;;  %vm569_vm8 = vsmask.f32 5376  ;;  %v633_v45 = vrot.slane %v1128_v2, 3 }
  0x2d   : > { %v575_v43 = vor.u32 %v574_v38, %v573_v37  ;;  %v634_v46 = vrot.slane %v1139_v7, 3  ;;  %vm632_vm9 = vcmask 1044480   ;;  %vm712_vm10 = vcmask (!%p854_p11), 60416  }
  0x2e   : > { %891 = vmatmul.mubr.msk.bf16.vlgmr.msra.gmra.mrb[4].mxu0 %vm259_vm3, %v389_v27 }
  0x2f   : > { %901 = vmatpush3.bf16.msra.mxu0 %v518_v30  ;;  %902 = vmatprep.mubr.msk.bf16.mxu0 %vm1040_vm2, %v1039_v3  ;;  %v576_v47 = vsel %vm569_vm8, %v572_v42, %v575_v43  ;;  %v635_v48 = vsel %vm632_vm9, %v633_v45, %v634_v46  ;;  %v855_v42 = vld [vmem:[%s1228_s2] ss:$0 sm:$0xff] (!%p854_p11) }
  0x30   : > { %912 = vmatprep.subr.bf16.mxu0 %v1039_v3 }
  0x32   : > { %897 = vmatmul.mubr.msk.bf16.vlgmr.msra.gmra.mrb[4].mxu1 %vm259_vm3, %v454_v35 }
  0x33   : > { %907 = vmatpush3.bf16.msra.mxu1 %v581_v39  ;;  %908 = vmatprep.mubr.msk.bf16.mxu1 %vm1040_vm2, %v1039_v3 }
  0x36   : > { %903 = vmatmul.mubr.msk.bf16.vlgmr.msra.gmra.mrb[8].mxu0 %vm259_vm3, %v513_v41 }
  0x37   : > { %913 = vmatpush3.bf16.msra.mxu0 %v640_v44  ;;  %914 = vmatprep.mubr.msk.bf16.mxu0 %vm1040_vm2, %v1039_v3 }
  0x3a   : > { %909 = vmatmul.mubr.msk.bf16.vlgmr.msra.gmra.mrb[8].mxu1 %vm259_vm3, %v576_v47 }
  0x3e   : > { %915 = vmatmul.mubr.msk.bf16.vlgmr.msra.gmra.mrb[12].mxu0 %vm259_vm3, %v635_v48 }
  0xf9   : > { %v301_v50 = vpop.f32.mrb[0].mxu0 }
  0xfa   : > { %v308_v52 = vadd.f32 %v301_v50, %v256_v49  ;;  %v880_v53 = vpop.f32.mrb[1].mxu0 }
  0xfb   : > { %v304_v54 = vpop.f32.mrb[2].mxu0 }
  0xfc   : > { %310 = vst.msk [vmem:[#allocation2] sm:$0xff] %vm259_vm3, %v308_v52  ;;  %v309_v55 = vadd.f32 %v304_v54, %v257_v51  ;;  %v881_v56 = vpop.f32.mrb[3].mxu0 }
  0xfd   : > { %v369_v57 = vpop.f32.mrb[0].mxu1 }
  0xfe   : > { %311 = vst.msk [vmem:[#allocation2 + $0x8] sm:$0xff] %vm259_vm3, %v309_v55  ;;  %v886_v58 = vpop.f32.mrb[1].mxu1 }
  0xff   : > { %v372_v59 = vpop.f32.mrb[2].mxu1 }
 0x100   : > { %v887_v60 = vpop.f32.mrb[3].mxu1 }
 0x101   : > { %v430_v61 = vpop.f32.mrb[4].mxu0 }
 0x102   : > { %v892_v62 = vpop.f32.mrb[5].mxu0 }
 0x103   : > { %v313_v63 = vld [vmem:[#allocation2] sm:$0xff]  ;;  %v433_v0 = vpop.f32.mrb[6].mxu0 }
 0x104   : > { %v376_v1 = vadd.f32 %v369_v57, %v313_v63  ;;  %v893_v2 = vpop.f32.mrb[7].mxu0 }
 0x105   : > { %v314_v3 = vld [vmem:[#allocation2 + $0x8] sm:$0xff]  ;;  %v495_v5 = vpop.f32.mrb[4].mxu1 }
 0x106   : > { %378 = vst.msk [vmem:[#allocation2] sm:$0xff] %vm259_vm3, %v376_v1  ;;  %v377_v4 = vadd.f32 %v372_v59, %v314_v3  ;;  %v898_v6 = vpop.f32.mrb[5].mxu1 }
 0x107   : > { %v498_v7 = vpop.f32.mrb[6].mxu1 }
 0x108   : > { %379 = vst.msk [vmem:[#allocation2 + $0x8] sm:$0xff] %vm259_vm3, %v377_v4  ;;  %v899_v8 = vpop.f32.mrb[7].mxu1 }
 0x109   : > { %v554_v9 = vpop.f32.mrb[8].mxu0 }
 0x10a   : > { %v904_v10 = vpop.f32.mrb[9].mxu0 }
 0x10b   : > { %v557_v11 = vpop.f32.mrb[10].mxu0 }
 0x10c   : > { %v905_v12 = vpop.f32.mrb[11].mxu0 }
 0x10d   : > { %v380_v13 = vld [vmem:[#allocation2] sm:$0xff]  ;;  %v617_v15 = vpop.f32.mrb[8].mxu1 }
 0x10e   : > { %v437_v14 = vadd.f32 %v430_v61, %v380_v13  ;;  %v910_v17 = vpop.f32.mrb[9].mxu1 }
 0x10f   : > { %v381_v16 = vld [vmem:[#allocation2 + $0x8] sm:$0xff]  ;;  %v620_v19 = vpop.f32.mrb[10].mxu1 }
 0x110   : > { %439 = vst.msk [vmem:[#allocation2] sm:$0xff] %vm259_vm3, %v437_v14  ;;  %v438_v18 = vadd.f32 %v433_v0, %v381_v16  ;;  %v911_v20 = vpop.f32.mrb[11].mxu1 }
 0x111   : > { %v676_v21 = vpop.f32.mrb[12].mxu0 }
 0x112   : > { %440 = vst.msk [vmem:[#allocation2 + $0x8] sm:$0xff] %vm259_vm3, %v438_v18  ;;  %v916_v22 = vpop.f32.mrb[13].mxu0 }
 0x113   : > { %v679_v23 = vpop.f32.mrb[14].mxu0 }
 0x114   : > { %v917_v24 = vpop.f32.mrb[15].mxu0 }
 0x117   : > { %v441_v25 = vld [vmem:[#allocation2] sm:$0xff] }
 0x118   : > { %v502_v26 = vadd.f32 %v495_v5, %v441_v25 }
 0x119   : > { %v442_v27 = vld [vmem:[#allocation2 + $0x8] sm:$0xff] }
 0x11a   : > { %504 = vst.msk [vmem:[#allocation2] sm:$0xff] %vm259_vm3, %v502_v26  ;;  %v503_v28 = vadd.f32 %v498_v7, %v442_v27 }
 0x11c   : > { %505 = vst.msk [vmem:[#allocation2 + $0x8] sm:$0xff] %vm259_vm3, %v503_v28 }
 0x121   : > { %v506_v29 = vld [vmem:[#allocation2] sm:$0xff] }
 0x122   : > { %v561_v30 = vadd.f32 %v554_v9, %v506_v29 }
 0x123   : > { %v507_v31 = vld [vmem:[#allocation2 + $0x8] sm:$0xff] }
 0x124   : > { %563 = vst.msk [vmem:[#allocation2] sm:$0xff] %vm259_vm3, %v561_v30  ;;  %v562_v32 = vadd.f32 %v557_v11, %v507_v31 }
 0x126   : > { %564 = vst.msk [vmem:[#allocation2 + $0x8] sm:$0xff] %vm259_vm3, %v562_v32 }
 0x12b   : > { %v565_v33 = vld [vmem:[#allocation2] sm:$0xff] }
 0x12c   : > { %v624_v34 = vadd.f32 %v617_v15, %v565_v33 }
 0x12d   : > { %v566_v35 = vld [vmem:[#allocation2 + $0x8] sm:$0xff] }
 0x12e   : > { %626 = vst.msk [vmem:[#allocation2] sm:$0xff] %vm259_vm3, %v624_v34  ;;  %v625_v36 = vadd.f32 %v620_v19, %v566_v35 }
 0x130   : > { %627 = vst.msk [vmem:[#allocation2 + $0x8] sm:$0xff] %vm259_vm3, %v625_v36 }
 0x134   : > { %690 = sbr.rel (%p854_p11) target bundleno = 329 (0x149), region = 40 }
 0x135   : > { %v628_v37 = vld [vmem:[#allocation2] sm:$0xff] }
 0x136   : > { %v683_v38 = vadd.f32 %v676_v21, %v628_v37 }
 0x137   : > { %v629_v39 = vld [vmem:[#allocation2 + $0x8] sm:$0xff] }
 0x138   : > { %685 = vst.msk [vmem:[#allocation2] sm:$0xff] %vm259_vm3, %v683_v38  ;;  %v684_v40 = vadd.f32 %v679_v23, %v629_v39 }
 0x13a   : > { %686 = vst.msk [vmem:[#allocation2 + $0x8] sm:$0xff] %vm259_vm3, %v684_v40 }
 0x13f   : > { %v691_v41 = vld [vmem:[#allocation2] sm:$0xff] }
 0x140   : > { %v700_v44 = vadd.f32 %v855_v42, %v691_v41 }
 0x141   : > { %v692_v43 = vld [vmem:[#allocation2 + $0x8] sm:$0xff] }
 0x142   : > { %v701_v45 = vadd.f32 %v855_v42, %v692_v43  ;;  %v702_v46 = vmax.f32 %v700_v44, 0.0 }
 0x144   : > { %v703_v47 = vmax.f32 %v701_v45, 0.0  ;;  %v860_v48 = vpack.c.bf16 %v702_v46, %v702_v46 }
 0x146   : > { %v861_v49 = vpack.c.bf16 %v703_v47, %v703_v47  ;;  %713 = vst.msk [vmem:[%s1124_s23] sm:$0xf] %vm712_vm10, %v860_v48 }
 0x148   : > { %714 = vst.msk [vmem:[%s1124_s23 + $0x4] sm:$0xf] %vm712_vm10, %v861_v49 }
 0x149 PF: > { %s13_s18 = sadd.s32 1, %s1036_s18   ;;  %s1231_s21 = sld [smem:[#allocation3_spill]] }
 0x14a   : > { %p10_p12 = scmp.ge.s32.totalorder %s13_s18, 226   ;;  %s1232_s12 = smov %s1024_s15 }
 0x14b   : > { %s1233_s13 = smov %s1028_s16  ;;  %s1234_s14 = smov %s1032_s17 }
 0x14c   : > { %s1235_s15 = smov %s1239_s19  ;;  %s1236_s16 = smov %s1243_s20 }
 0x14d   :  { %12 = sbr.rel (!%p10_p12) target bundleno = 4 (0x4), region = 79 }
 0x14f   : > { %s1237_s17 = smov %s1231_s21 }

// kernel: unet_forward.21
= control target key start
LH: loop header
LB: loop body
LE: loop exit
PB: predicated region body
PF: predicated region fallthrough
CT: control target
= control target key end

     0   :  { %s95_s0 = inlined_call_operand.vmem [shape: bf16[16,128], index: 0, kind: input, shape index: {}]   ;;  %s96_s1 = inlined_call_operand.vmem [shape: bf16[16,128], index: 1, kind: input, shape index: {}]   ;;  %s97_s2 = inlined_call_operand.vmem [shape: bf16[16,128], index: 2, kind: input, shape index: {}]   ;;  %s98_s3 = inlined_call_operand.vmem [shape: bf16[16,128], index: 3, kind: input, shape index: {}]   ;;  %s99_s4 = inlined_call_operand.vmem [shape: bf16[16,128], index: 4, kind: output, shape index: {}]  }
   0x1   :  { %v17_v0 = vld [vmem:[%s95_s0] sm:$0xf]  ;;  %v18_v1 = vld [vmem:[%s95_s0 + $0x4] sm:$0xf] }
   0x2   :  { %v19_v2 = vld [vmem:[%s96_s1] sm:$0xf]  ;;  %v20_v3 = vld [vmem:[%s96_s1 + $0x4] sm:$0xf] }
   0x3   :  { %v21_v4 = vmax.bf16 %v19_v2, %v17_v0  ;;  %v23_v5 = vld [vmem:[%s97_s2] sm:$0xf]  ;;  %v24_v6 = vld [vmem:[%s97_s2 + $0x4] sm:$0xf]  ;;  %v22_v7 = vmax.bf16 %v20_v3, %v18_v1 }
   0x4   :  { %v25_v8 = vld [vmem:[%s98_s3] sm:$0xf]  ;;  %v26_v9 = vld [vmem:[%s98_s3 + $0x4] sm:$0xf] }
   0x5   :  { %v27_v10 = vmax.bf16 %v25_v8, %v23_v5  ;;  %v28_v11 = vmax.bf16 %v26_v9, %v24_v6 }
   0x7   :  { %v29_v12 = vmax.bf16 %v27_v10, %v21_v4  ;;  %v30_v13 = vmax.bf16 %v28_v11, %v22_v7 }
   0x9   :  { %v42_v14 = vcombine.low %v29_v12, %v30_v13 }
   0xb   :  { %41 = vst [vmem:[%s99_s4] sm:$0xff] %v42_v14  }

// kernel: unet_forward.22
= control target key start
LH: loop header
LB: loop body
LE: loop exit
PB: predicated region body
PF: predicated region fallthrough
CT: control target
= control target key end

     0   :  { %s980_s12 = smov 0   ;;  %s982_s13 = smov 0   ;;  %s1107_s0 = inlined_call_operand.vmem [shape: bf16[2,14,14,8], index: 0, kind: input, shape index: {}]   ;;  %s1108_s1 = inlined_call_operand.vmem [shape: bf16[7,7,8,16], index: 1, kind: input, shape index: {}]   ;;  %s1109_s2 = inlined_call_operand.vmem [shape: f32[1,16], index: 2, kind: input, shape index: {}]   ;;  %s1110_s3 = inlined_call_operand.vmem [shape: bf16[2,8,8,16], index: 3, kind: output, shape index: {}]  }
   0x1   :  { %s984_s14 = smov 0   ;;  %s986_s15 = smov 0  }
   0x2   :  { %s988_s16 = smov 0   ;;  %s990_s17 = smov 0  }
   0x3   :  { %s992_s18 = smov 0  }
   0x4 LB: > { %s25_s19 = sadd.s32 1, %s943_s15  ;;  %s28_s20 = sadd.s32 1, %s947_s16  ;;  %s955_s18 = sphi %s992_s18, %s13_s18   ;;  %s951_s17 = sphi %s990_s17, %s1116_s17   ;;  %s947_s16 = sphi %s988_s16, %s1115_s16   ;;  %s943_s15 = sphi %s986_s15, %s1114_s15   ;;  %s939_s14 = sphi %s984_s14, %s1113_s14   ;;  %s935_s13 = sphi %s982_s13, %s1112_s13   ;;  %s931_s12 = sphi %s980_s12, %s1111_s12  }
   0x5   : > { %p26_p0 = scmp.ge.s32.totalorder %s25_s19, 7  ;;  %p756_p1 = scmp.ge.s32.totalorder %s955_s18, 1 }
   0x6   : > { %p178_p2 = scmp.lt.s32.totalorder %s955_s18, 113  ;;  %s32_s21 = sadd.s32 1, %s951_s17 }
   0x7   : > { %s1118_s19 = smov (%p26_p0, %s25_s19), 0  ;;  %s1120_s20 = smov (!%p26_p0, %s28_s20), %s947_s16 }
   0x8   : > { %p179_p3 = pnand %p756_p1, %p178_p2  ;;  %p30_p4 = scmp.ge.s32.totalorder %s1120_s20, 8 }
   0x9   : > { %s215_s22 = sadd.s32 (!%p179_p3), %s931_s12, %s935_s13  ;;  %p216_p6 = scmp.lt.s32.totalorder (!%p179_p3), %s939_s14, 1 }
   0xa   : > { %s1122_s20 = smov (%p30_p4, %s1120_s20), 0  ;;  %s1124_s21 = smov (!%p30_p4, %s32_s21), %s951_s17 }
   0xb   : > { %p34_p5 = scmp.ge.s32.totalorder %s1124_s21, 2  ;;  %182 = sbr.rel (%p179_p3) target bundleno = 326 (0x146), region = 32 }
   0xc   : > { %p218_p7 = scmp.lt.s32.totalorder (!%p179_p3), %s215_s22, 13  ;;  %p226_p8 = scmp.lt.s32.totalorder (!%p179_p3), %s931_s12, 6 }
   0xd   : > { %s1126_s21 = smov (%p34_p5, %s1124_s21), 0  ;;  %p233_p9 = scmp.lt.s32.totalorder (!%p179_p3), %s935_s13, 7 }
   0xe   : > { %p762_p10 = scmp.ne.s32.totalorder (!%p179_p3), %s931_s12, 0 }
  0x12   : > { %s1128_s14 = smov (!%p216_p6, %s939_s14), 1  ;;  %s1130_s22 = smov (!%p218_p7, %s215_s22), 13 }
  0x13   : > { %s838_s23 = smul.u32 28, %s1128_s14  ;;  %s757_s24 = sshll.u32 %s1130_s22, 1  ;;  %vm244_vm0 = vcmask (!%p762_p10), 130048   ;;  %v957_v0 = vmov (!%p762_p10), 0.0  }
  0x14   : > { %s760_s30 = sshll.u32 %s1128_s14, 3  ;;  %s1132_s13 = smov (!%p233_p9, %s935_s13), 7  ;;  %245 = vst.msk [vmem:[#allocation2] sm:$0xff] (!%p762_p10), %vm244_vm0, %v957_v0 }
  0x15   : > { %s222_s25 = sadd.s32 %s838_s23, %s757_s24  ;;  %s236_s6 = sadd.s32 %s760_s30, %s1132_s13 }
  0x16   : > { %s758_s26 = sshll.u32 %s222_s25, 2  ;;  %s761_s10 = sshll.u32 %s236_s6, 2 }
  0x17   : > { %s224_s29 = scalar_lea.vmem %s1107_s0, %s758_s26  ;;  %s1043_s23 = scalar_lea.vmem %s1110_s3, %s761_s10 }
  0x18   : > { %s227_s4 = scalar_select %p226_p8, %s931_s12, 6 }
  0x19   : > { %243 = sbr.rel (%p762_p10) target bundleno = 32 (0x20), region = 36 }
  0x1a   : > { %s839_s5 = smul.u32 28, %s227_s4 }
  0x1c   : > { %s1038_s9 = scalar_lea.vmem %s1108_s1, %s839_s5 }
  0x20 PF: > { %v252_v1 = vld [vmem:[%s1038_s9] sm:$0xf]  ;;  %vm257_vm1 = vcmask 1043456   ;;  %v958_v2 = vmov 0.0   ;;  %vm959_vm2 = vmmov 0   ;;  %vm253_vm3 = vcmask 64512  }
  0x21   : > { %796 = vmatprep.subr.bf16.mxu0 %v958_v2  ;;  %v259_v3 = vsel %vm257_vm1, %v252_v1, 0  ;;  %798 = vmatprep.mubr.msk.bf16.mxu0 %vm959_vm2, %v958_v2  ;;  %v246_v4 = vld [vmem:[%s224_s29] sm:$0xf]  ;;  %v247_v5 = vld [vmem:[%s224_s29 + $0x4] sm:$0x7]  ;;  %vm302_vm4 = vcmask 130048  }
  0x22   : > { %797 = vmatpush3.bf16.msra.mxu0 %v259_v3  ;;  %v763_v6 = vcombine.low %v246_v4, %v246_v4  ;;  %v765_v7 = vcombine.low %v246_v4, %v247_v5  ;;  %802 = vmatprep.subr.bf16.mxu1 %v958_v2  ;;  %v766_v8 = vld [vmem:[%s1038_s9 + $0x4] sm:$0xf]  ;;  %v768_v9 = vld [vmem:[%s1038_s9 + $0x8] sm:$0xf]  ;;  %v770_v14 = vld [vmem:[%s1038_s9 + $0xc] sm:$0xf] }
  0x23   : > { %v319_v10 = vsel %vm257_vm1, %v766_v8, 0  ;;  %804 = vmatprep.mubr.msk.bf16.mxu1 %vm959_vm2, %v958_v2  ;;  %808 = vmatprep.subr.bf16.mxu0 %v958_v2  ;;  %v372_v11 = vsel %vm257_vm1, %v768_v9, 0  ;;  %v426_v17 = vsel %vm257_vm1, %v770_v14, 0  ;;  %v772_v18 = vld [vmem:[%s1038_s9 + $0x10] sm:$0xf]  ;;  %v251_v33 = vld [vmem:[#allocation2] sm:$0xff] }
  0x24   : > { %803 = vmatpush3.bf16.msra.mxu1 %v319_v10  ;;  %v309_v12 = vshrl.u32 %v765_v7, 16  ;;  %v311_v13 = vshll.u32 %v765_v7, 16  ;;  %v367_v19 = vrot.slane %v765_v7, 1  ;;  %v478_v22 = vsel %vm257_vm1, %v772_v18, 0  ;;  %v774_v23 = vld [vmem:[%s1038_s9 + $0x14] sm:$0xf] }
  0x25   : > { %799 = vmatmul.mubr.msk.bf16.vlgmr.msra.gmra.mrb[0].mxu0 %vm253_vm3, %v763_v6  ;;  %814 = vmatprep.subr.bf16.mxu1 %v958_v2  ;;  %v532_v25 = vsel %vm257_vm1, %v774_v23, 0  ;;  %v776_v26 = vld [vmem:[%s1038_s9 + $0x18] sm:$0xf]  ;;  %v473_v27 = vrot.slane %v765_v7, 2  ;;  %v579_v32 = vrot.slane %v765_v7, 3  ;;  %p778_p11 = scmp.ne.s32.totalorder %s931_s12, 6 }
  0x26   : > { %v313_v15 = vrot.slane %v311_v13, 1  ;;  %809 = vmatpush3.bf16.msra.mxu0 %v372_v11  ;;  %810 = vmatprep.mubr.msk.bf16.mxu0 %vm959_vm2, %v958_v2  ;;  %v419_v20 = vrot.slane %v309_v12, 1  ;;  %v420_v21 = vrot.slane %v311_v13, 2  ;;  %v525_v28 = vrot.slane %v309_v12, 2 }
  0x27   : > { %820 = vmatprep.subr.bf16.mxu0 %v958_v2  ;;  %v526_v29 = vrot.slane %v311_v13, 3  ;;  %v584_v30 = vsel %vm257_vm1, %v776_v26, 0  ;;  %vm643_vm5 = vcmask (!%p778_p11), 125952  }
  0x28   : > { %v314_v16 = vor.u32 %v313_v15, %v309_v12  ;;  %v421_v24 = vor.u32 %v420_v21, %v419_v20  ;;  %v779_v12 = vld [vmem:[%s1109_s2] ss:$0 sm:$0xff] (!%p778_p11) }
  0x29   : > { %v527_v31 = vor.u32 %v526_v29, %v525_v28 }
  0x2a   : > { %805 = vmatmul.mubr.msk.bf16.vlgmr.msra.gmra.mrb[0].mxu1 %vm253_vm3, %v314_v16 }
  0x2b   : > { %815 = vmatpush3.bf16.msra.mxu1 %v426_v17  ;;  %816 = vmatprep.mubr.msk.bf16.mxu1 %vm959_vm2, %v958_v2 }
  0x2c   : > { %826 = vmatprep.subr.bf16.mxu1 %v958_v2 }
  0x2d   : > { %811 = vmatmul.mubr.msk.bf16.vlgmr.msra.gmra.mrb[4].mxu0 %vm253_vm3, %v367_v19 }
  0x2e   : > { %821 = vmatpush3.bf16.msra.mxu0 %v478_v22  ;;  %822 = vmatprep.mubr.msk.bf16.mxu0 %vm959_vm2, %v958_v2 }
  0x2f   : > { %832 = vmatprep.subr.bf16.mxu0 %v958_v2 }
  0x32   : > { %817 = vmatmul.mubr.msk.bf16.vlgmr.msra.gmra.mrb[4].mxu1 %vm253_vm3, %v421_v24 }
  0x33   : > { %827 = vmatpush3.bf16.msra.mxu1 %v532_v25  ;;  %828 = vmatprep.mubr.msk.bf16.mxu1 %vm959_vm2, %v958_v2 }
  0x35   : > { %823 = vmatmul.mubr.msk.bf16.vlgmr.msra.gmra.mrb[8].mxu0 %vm253_vm3, %v473_v27 }
  0x36   : > { %833 = vmatpush3.bf16.msra.mxu0 %v584_v30  ;;  %834 = vmatprep.mubr.msk.bf16.mxu0 %vm959_vm2, %v958_v2 }
  0x3a   : > { %829 = vmatmul.mubr.msk.bf16.vlgmr.msra.gmra.mrb[8].mxu1 %vm253_vm3, %v527_v31 }
  0x3d   : > { %835 = vmatmul.mubr.msk.bf16.vlgmr.msra.gmra.mrb[12].mxu0 %vm253_vm3, %v579_v32 }
  0xf8   : > { %v295_v34 = vpop.f32.mrb[0].mxu0 }
  0xf9   : > { %v301_v35 = vadd.f32 %v295_v34, %v251_v33  ;;  %v800_v36 = vpop.f32.mrb[1].mxu0 }
  0xfa   : > { %v298_v37 = vpop.f32.mrb[2].mxu0 }
  0xfb   : > { %303 = vst.msk [vmem:[#allocation2] sm:$0xff] %vm302_vm4, %v301_v35  ;;  %v801_v38 = vpop.f32.mrb[3].mxu0 }
  0xfd   : > { %v355_v39 = vpop.f32.mrb[0].mxu1 }
  0xfe   : > { %v806_v40 = vpop.f32.mrb[1].mxu1 }
  0xff   : > { %v358_v41 = vpop.f32.mrb[2].mxu1 }
 0x100   : > { %v807_v42 = vpop.f32.mrb[3].mxu1  ;;  %v408_v43 = vpop.f32.mrb[4].mxu0 }
 0x101   : > { %v812_v44 = vpop.f32.mrb[5].mxu0 }
 0x102   : > { %v305_v45 = vld [vmem:[#allocation2] sm:$0xff]  ;;  %v411_v46 = vpop.f32.mrb[6].mxu0 }
 0x103   : > { %v361_v47 = vadd.f32 %v355_v39, %v305_v45  ;;  %v813_v48 = vpop.f32.mrb[7].mxu0 }
 0x105   : > { %362 = vst.msk [vmem:[#allocation2] sm:$0xff] %vm302_vm4, %v361_v47  ;;  %v462_v49 = vpop.f32.mrb[4].mxu1 }
 0x106   : > { %v818_v50 = vpop.f32.mrb[5].mxu1 }
 0x107   : > { %v465_v51 = vpop.f32.mrb[6].mxu1 }
 0x108   : > { %v819_v52 = vpop.f32.mrb[7].mxu1  ;;  %v514_v53 = vpop.f32.mrb[8].mxu0 }
 0x109   : > { %v824_v54 = vpop.f32.mrb[9].mxu0 }
 0x10a   : > { %v517_v55 = vpop.f32.mrb[10].mxu0 }
 0x10b   : > { %v825_v56 = vpop.f32.mrb[11].mxu0 }
 0x10c   : > { %v363_v57 = vld [vmem:[#allocation2] sm:$0xff] }
 0x10d   : > { %v414_v58 = vadd.f32 %v408_v43, %v363_v57  ;;  %v568_v59 = vpop.f32.mrb[8].mxu1 }
 0x10e   : > { %v830_v60 = vpop.f32.mrb[9].mxu1 }
 0x10f   : > { %415 = vst.msk [vmem:[#allocation2] sm:$0xff] %vm302_vm4, %v414_v58  ;;  %v571_v61 = vpop.f32.mrb[10].mxu1 }
 0x110   : > { %v831_v62 = vpop.f32.mrb[11].mxu1  ;;  %v620_v63 = vpop.f32.mrb[12].mxu0 }
 0x111   : > { %v836_v0 = vpop.f32.mrb[13].mxu0 }
 0x112   : > { %v623_v1 = vpop.f32.mrb[14].mxu0 }
 0x113   : > { %v837_v2 = vpop.f32.mrb[15].mxu0 }
 0x116   : > { %v416_v3 = vld [vmem:[#allocation2] sm:$0xff] }
 0x117   : > { %v468_v4 = vadd.f32 %v462_v49, %v416_v3 }
 0x119   : > { %469 = vst.msk [vmem:[#allocation2] sm:$0xff] %vm302_vm4, %v468_v4 }
 0x120   : > { %v470_v5 = vld [vmem:[#allocation2] sm:$0xff] }
 0x121   : > { %v520_v6 = vadd.f32 %v514_v53, %v470_v5 }
 0x123   : > { %521 = vst.msk [vmem:[#allocation2] sm:$0xff] %vm302_vm4, %v520_v6 }
 0x12a   : > { %v522_v7 = vld [vmem:[#allocation2] sm:$0xff] }
 0x12b   : > { %v574_v8 = vadd.f32 %v568_v59, %v522_v7 }
 0x12d   : > { %575 = vst.msk [vmem:[#allocation2] sm:$0xff] %vm302_vm4, %v574_v8 }
 0x131   : > { %631 = sbr.rel (%p778_p11) target bundleno = 326 (0x146), region = 40 }
 0x134   : > { %v576_v9 = vld [vmem:[#allocation2] sm:$0xff] }
 0x135   : > { %v626_v10 = vadd.f32 %v620_v63, %v576_v9 }
 0x137   : > { %627 = vst.msk [vmem:[#allocation2] sm:$0xff] %vm302_vm4, %v626_v10 }
 0x13e   : > { %v632_v11 = vld [vmem:[#allocation2] sm:$0xff] }
 0x13f   : > { %v640_v13 = vadd.f32 %v779_v12, %v632_v11 }
 0x141   : > { %v641_v14 = vmax.f32 %v640_v13, 0.0 }
 0x143   : > { %v642_v15 = vpack.c.bf16 %v641_v14, %v641_v14 }
 0x145   : > { %644 = vst.msk [vmem:[%s1043_s23] sm:$0xf] %vm643_vm5, %v642_v15 }
 0x146 PF: > { %s13_s18 = sadd.s32 1, %s955_s18   ;;  %s1111_s12 = smov %s943_s15 }
 0x147   : > { %p10_p12 = scmp.ge.s32.totalorder %s13_s18, 114   ;;  %s1112_s13 = smov %s947_s16 }
 0x148   : > { %s1113_s14 = smov %s951_s17  ;;  %s1114_s15 = smov %s1118_s19 }
 0x149   : > { %s1115_s16 = smov %s1122_s20  ;;  %s1116_s17 = smov %s1126_s21 }
 0x14a   :  { %12 = sbr.rel (!%p10_p12) target bundleno = 4 (0x4), region = 79 }

// kernel: unet_forward.23
= control target key start
LH: loop header
LB: loop body
LE: loop exit
PB: predicated region body
PF: predicated region fallthrough
CT: control target
= control target key end

     0   :  { %s1026_s12 = smov 0   ;;  %s1028_s13 = smov 0   ;;  %s1146_s0 = inlined_call_operand.vmem [shape: bf16[2,14,14,16], index: 0, kind: input, shape index: {}]   ;;  %s1147_s1 = inlined_call_operand.vmem [shape: bf16[7,7,16,16], index: 1, kind: input, shape index: {}]   ;;  %s1148_s2 = inlined_call_operand.vmem [shape: f32[1,16], index: 2, kind: input, shape index: {}]   ;;  %s1149_s3 = inlined_call_operand.vmem [shape: bf16[2,8,8,16], index: 3, kind: output, shape index: {}]  }
   0x1   :  { %s1030_s14 = smov 0   ;;  %s1032_s15 = smov 0  }
   0x2   :  { %s1034_s16 = smov 0   ;;  %s1036_s17 = smov 0  }
   0x3   :  { %s1038_s18 = smov 0  }
   0x4 LB: > { %s25_s19 = sadd.s32 1, %s989_s15  ;;  %s28_s20 = sadd.s32 1, %s993_s16  ;;  %s1001_s18 = sphi %s1038_s18, %s13_s18   ;;  %s997_s17 = sphi %s1036_s17, %s1155_s17   ;;  %s993_s16 = sphi %s1034_s16, %s1154_s16   ;;  %s989_s15 = sphi %s1032_s15, %s1153_s15   ;;  %s985_s14 = sphi %s1030_s14, %s1152_s14   ;;  %s981_s13 = sphi %s1028_s13, %s1151_s13   ;;  %s977_s12 = sphi %s1026_s12, %s1150_s12  }
   0x5   : > { %p26_p0 = scmp.ge.s32.totalorder %s25_s19, 7  ;;  %p782_p1 = scmp.ge.s32.totalorder %s1001_s18, 1 }
   0x6   : > { %p178_p2 = scmp.lt.s32.totalorder %s1001_s18, 113  ;;  %s32_s21 = sadd.s32 1, %s997_s17 }
   0x7   : > { %s1157_s19 = smov (%p26_p0, %s25_s19), 0  ;;  %s1159_s20 = smov (!%p26_p0, %s28_s20), %s993_s16 }
   0x8   : > { %p179_p3 = pnand %p782_p1, %p178_p2  ;;  %p30_p4 = scmp.ge.s32.totalorder %s1159_s20, 8 }
   0x9   : > { %s215_s22 = sadd.s32 (!%p179_p3), %s977_s12, %s981_s13  ;;  %p216_p6 = scmp.lt.s32.totalorder (!%p179_p3), %s985_s14, 1 }
   0xa   : > { %s1161_s20 = smov (%p30_p4, %s1159_s20), 0  ;;  %s1163_s21 = smov (!%p30_p4, %s32_s21), %s997_s17 }
   0xb   : > { %p34_p5 = scmp.ge.s32.totalorder %s1163_s21, 2  ;;  %182 = sbr.rel (%p179_p3) target bundleno = 326 (0x146), region = 32 }
   0xc   : > { %p218_p7 = scmp.lt.s32.totalorder (!%p179_p3), %s215_s22, 13  ;;  %p226_p8 = scmp.lt.s32.totalorder (!%p179_p3), %s977_s12, 6 }
   0xd   : > { %s1165_s21 = smov (%p34_p5, %s1163_s21), 0  ;;  %p233_p9 = scmp.lt.s32.totalorder (!%p179_p3), %s981_s13, 7 }
   0xe   : > { %p788_p10 = scmp.ne.s32.totalorder (!%p179_p3), %s977_s12, 0 }
  0x12   : > { %s1167_s14 = smov (!%p216_p6, %s985_s14), 1  ;;  %s1169_s22 = smov (!%p218_p7, %s215_s22), 13 }
  0x13   : > { %s877_s23 = smul.u32 28, %s1167_s14  ;;  %s783_s24 = sshll.u32 %s1169_s22, 1  ;;  %vm244_vm0 = vcmask (!%p788_p10), 130048   ;;  %v1003_v0 = vmov (!%p788_p10), 0.0  }
  0x14   : > { %s786_s30 = sshll.u32 %s1167_s14, 3  ;;  %s1171_s13 = smov (!%p233_p9, %s981_s13), 7  ;;  %245 = vst.msk [vmem:[#allocation2] sm:$0xff] (!%p788_p10), %vm244_vm0, %v1003_v0 }
  0x15   : > { %s222_s25 = sadd.s32 %s877_s23, %s783_s24  ;;  %s236_s6 = sadd.s32 %s786_s30, %s1171_s13 }
  0x16   : > { %s784_s26 = sshll.u32 %s222_s25, 2  ;;  %s787_s10 = sshll.u32 %s236_s6, 2 }
  0x17   : > { %s224_s29 = scalar_lea.vmem %s1146_s0, %s784_s26  ;;  %s1089_s23 = scalar_lea.vmem %s1149_s3, %s787_s10 }
  0x18   : > { %s227_s4 = scalar_select %p226_p8, %s977_s12, 6 }
  0x19   : > { %243 = sbr.rel (%p788_p10) target bundleno = 32 (0x20), region = 36 }
  0x1a   : > { %s878_s5 = smul.u32 56, %s227_s4 }
  0x1c   : > { %s1084_s9 = scalar_lea.vmem %s1147_s1, %s878_s5 }
  0x20 PF: > { %v938_v1 = vld [vmem:[%s1084_s9] sm:$0xff]   ;;  %v1004_v2 = vmov 0.0   ;;  %vm1005_vm1 = vmmov 0   ;;  %vm260_vm2 = vcmask 130048   ;;  %v941_v7 = vld [vmem:[%s1084_s9 + $0x8] sm:$0xff]   ;;  %v942_v8 = vld [vmem:[%s1084_s9 + $0x10] sm:$0xff]  }
  0x21   : > { %835 = vmatprep.subr.bf16.mxu0 %v1004_v2  ;;  %v246_v3 = vld [vmem:[%s224_s29] sm:$0xf]  ;;  %v247_v4 = vld [vmem:[%s224_s29 + $0x4] sm:$0x7]  ;;  %841 = vmatprep.subr.bf16.mxu1 %v1004_v2  ;;  %v943_v12 = vld [vmem:[%s1084_s9 + $0x18] sm:$0xff]   ;;  %p817_p11 = scmp.ne.s32.totalorder %s977_s12, 6 }
  0x22   : > { %836 = vmatpush3.bf16.msra.mxu0 %v938_v1  ;;  %837 = vmatprep.mubr.msk.bf16.mxu0 %vm1005_vm1, %v1004_v2  ;;  %v789_v5 = vcombine.low %v246_v3, %v246_v3  ;;  %v792_v6 = vcombine.low %v246_v3, %v247_v4  ;;  %v944_v17 = vld [vmem:[%s1084_s9 + $0x20] sm:$0xff]   ;;  %v945_v19 = vld [vmem:[%s1084_s9 + $0x28] sm:$0xff]   ;;  %v946_v23 = vld [vmem:[%s1084_s9 + $0x30] sm:$0xff]   ;;  %vm669_vm3 = vcmask (!%p817_p11), 125952  }
  0x23   : > { %843 = vmatprep.mubr.msk.bf16.mxu1 %vm1005_vm1, %v1004_v2  ;;  %847 = vmatprep.subr.bf16.mxu0 %v1004_v2  ;;  %v251_v26 = vld [vmem:[#allocation2] sm:$0xff] }
  0x24   : > { %842 = vmatpush3.bf16.msra.mxu1 %v941_v7  ;;  %v312_v9 = vshrl.u32 %v792_v6, 16  ;;  %v314_v10 = vshll.u32 %v792_v6, 16  ;;  %v374_v14 = vrot.slane %v792_v6, 1  ;;  %v488_v20 = vrot.slane %v792_v6, 2 }
  0x25   : > { %838 = vmatmul.mubr.msk.bf16.vlgmr.msra.gmra.mrb[0].mxu0 %vm260_vm2, %v789_v5  ;;  %853 = vmatprep.subr.bf16.mxu1 %v1004_v2  ;;  %v602_v25 = vrot.slane %v792_v6, 3  ;;  %v818_v5 = vld [vmem:[%s1148_s2] ss:$0 sm:$0xff] (!%p817_p11) }
  0x26   : > { %v316_v11 = vrot.slane %v314_v10, 1  ;;  %848 = vmatpush3.bf16.msra.mxu0 %v942_v8  ;;  %849 = vmatprep.mubr.msk.bf16.mxu0 %vm1005_vm1, %v1004_v2  ;;  %v430_v15 = vrot.slane %v312_v9, 1  ;;  %v431_v16 = vrot.slane %v314_v10, 2  ;;  %v544_v21 = vrot.slane %v312_v9, 2 }
  0x27   : > { %859 = vmatprep.subr.bf16.mxu0 %v1004_v2  ;;  %v545_v22 = vrot.slane %v314_v10, 3 }
  0x28   : > { %v317_v13 = vor.u32 %v316_v11, %v312_v9  ;;  %v432_v18 = vor.u32 %v431_v16, %v430_v15 }
  0x29   : > { %v546_v24 = vor.u32 %v545_v22, %v544_v21 }
  0x2a   : > { %844 = vmatmul.mubr.msk.bf16.vlgmr.msra.gmra.mrb[0].mxu1 %vm260_vm2, %v317_v13 }
  0x2b   : > { %854 = vmatpush3.bf16.msra.mxu1 %v943_v12  ;;  %855 = vmatprep.mubr.msk.bf16.mxu1 %vm1005_vm1, %v1004_v2 }
  0x2c   : > { %865 = vmatprep.subr.bf16.mxu1 %v1004_v2 }
  0x2d   : > { %850 = vmatmul.mubr.msk.bf16.vlgmr.msra.gmra.mrb[4].mxu0 %vm260_vm2, %v374_v14 }
  0x2e   : > { %860 = vmatpush3.bf16.msra.mxu0 %v944_v17  ;;  %861 = vmatprep.mubr.msk.bf16.mxu0 %vm1005_vm1, %v1004_v2 }
  0x2f   : > { %871 = vmatprep.subr.bf16.mxu0 %v1004_v2 }
  0x32   : > { %856 = vmatmul.mubr.msk.bf16.vlgmr.msra.gmra.mrb[4].mxu1 %vm260_vm2, %v432_v18 }
  0x33   : > { %866 = vmatpush3.bf16.msra.mxu1 %v945_v19  ;;  %867 = vmatprep.mubr.msk.bf16.mxu1 %vm1005_vm1, %v1004_v2 }
  0x35   : > { %862 = vmatmul.mubr.msk.bf16.vlgmr.msra.gmra.mrb[8].mxu0 %vm260_vm2, %v488_v20 }
  0x36   : > { %872 = vmatpush3.bf16.msra.mxu0 %v946_v23  ;;  %873 = vmatprep.mubr.msk.bf16.mxu0 %vm1005_vm1, %v1004_v2 }
  0x3a   : > { %868 = vmatmul.mubr.msk.bf16.vlgmr.msra.gmra.mrb[8].mxu1 %vm260_vm2, %v546_v24 }
  0x3d   : > { %874 = vmatmul.mubr.msk.bf16.vlgmr.msra.gmra.mrb[12].mxu0 %vm260_vm2, %v602_v25 }
  0xf8   : > { %v298_v27 = vpop.f32.mrb[0].mxu0 }
  0xf9   : > { %v304_v28 = vadd.f32 %v298_v27, %v251_v26  ;;  %v839_v29 = vpop.f32.mrb[1].mxu0 }
  0xfa   : > { %v301_v30 = vpop.f32.mrb[2].mxu0 }
  0xfb   : > { %305 = vst.msk [vmem:[#allocation2] sm:$0xff] %vm260_vm2, %v304_v28  ;;  %v840_v31 = vpop.f32.mrb[3].mxu0 }
  0xfd   : > { %v361_v32 = vpop.f32.mrb[0].mxu1 }
  0xfe   : > { %v845_v33 = vpop.f32.mrb[1].mxu1 }
  0xff   : > { %v364_v34 = vpop.f32.mrb[2].mxu1 }
 0x100   : > { %v846_v35 = vpop.f32.mrb[3].mxu1  ;;  %v418_v36 = vpop.f32.mrb[4].mxu0 }
 0x101   : > { %v851_v37 = vpop.f32.mrb[5].mxu0 }
 0x102   : > { %v307_v38 = vld [vmem:[#allocation2] sm:$0xff]  ;;  %v421_v39 = vpop.f32.mrb[6].mxu0 }
 0x103   : > { %v367_v40 = vadd.f32 %v361_v32, %v307_v38  ;;  %v852_v41 = vpop.f32.mrb[7].mxu0 }
 0x105   : > { %368 = vst.msk [vmem:[#allocation2] sm:$0xff] %vm260_vm2, %v367_v40  ;;  %v476_v42 = vpop.f32.mrb[4].mxu1 }
 0x106   : > { %v857_v43 = vpop.f32.mrb[5].mxu1 }
 0x107   : > { %v479_v44 = vpop.f32.mrb[6].mxu1 }
 0x108   : > { %v858_v45 = vpop.f32.mrb[7].mxu1  ;;  %v532_v46 = vpop.f32.mrb[8].mxu0 }
 0x109   : > { %v863_v47 = vpop.f32.mrb[9].mxu0 }
 0x10a   : > { %v535_v48 = vpop.f32.mrb[10].mxu0 }
 0x10b   : > { %v864_v49 = vpop.f32.mrb[11].mxu0 }
 0x10c   : > { %v369_v50 = vld [vmem:[#allocation2] sm:$0xff] }
 0x10d   : > { %v424_v51 = vadd.f32 %v418_v36, %v369_v50  ;;  %v590_v52 = vpop.f32.mrb[8].mxu1 }
 0x10e   : > { %v869_v53 = vpop.f32.mrb[9].mxu1 }
 0x10f   : > { %425 = vst.msk [vmem:[#allocation2] sm:$0xff] %vm260_vm2, %v424_v51  ;;  %v593_v54 = vpop.f32.mrb[10].mxu1 }
 0x110   : > { %v870_v55 = vpop.f32.mrb[11].mxu1  ;;  %v646_v56 = vpop.f32.mrb[12].mxu0 }
 0x111   : > { %v875_v57 = vpop.f32.mrb[13].mxu0 }
 0x112   : > { %v649_v58 = vpop.f32.mrb[14].mxu0 }
 0x113   : > { %v876_v59 = vpop.f32.mrb[15].mxu0 }
 0x116   : > { %v426_v60 = vld [vmem:[#allocation2] sm:$0xff] }
 0x117   : > { %v482_v61 = vadd.f32 %v476_v42, %v426_v60 }
 0x119   : > { %483 = vst.msk [vmem:[#allocation2] sm:$0xff] %vm260_vm2, %v482_v61 }
 0x120   : > { %v484_v62 = vld [vmem:[#allocation2] sm:$0xff] }
 0x121   : > { %v538_v63 = vadd.f32 %v532_v46, %v484_v62 }
 0x123   : > { %539 = vst.msk [vmem:[#allocation2] sm:$0xff] %vm260_vm2, %v538_v63 }
 0x12a   : > { %v540_v0 = vld [vmem:[#allocation2] sm:$0xff] }
 0x12b   : > { %v596_v1 = vadd.f32 %v590_v52, %v540_v0 }
 0x12d   : > { %597 = vst.msk [vmem:[#allocation2] sm:$0xff] %vm260_vm2, %v596_v1 }
 0x131   : > { %657 = sbr.rel (%p817_p11) target bundleno = 326 (0x146), region = 40 }
 0x134   : > { %v598_v2 = vld [vmem:[#allocation2] sm:$0xff] }
 0x135   : > { %v652_v3 = vadd.f32 %v646_v56, %v598_v2 }
 0x137   : > { %653 = vst.msk [vmem:[#allocation2] sm:$0xff] %vm260_vm2, %v652_v3 }
 0x13e   : > { %v658_v4 = vld [vmem:[#allocation2] sm:$0xff] }
 0x13f   : > { %v666_v6 = vadd.f32 %v818_v5, %v658_v4 }
 0x141   : > { %v667_v7 = vmax.f32 %v666_v6, 0.0 }
 0x143   : > { %v668_v8 = vpack.c.bf16 %v667_v7, %v667_v7 }
 0x145   : > { %670 = vst.msk [vmem:[%s1089_s23] sm:$0xf] %vm669_vm3, %v668_v8 }
 0x146 PF: > { %s13_s18 = sadd.s32 1, %s1001_s18   ;;  %s1150_s12 = smov %s989_s15 }
 0x147   : > { %p10_p12 = scmp.ge.s32.totalorder %s13_s18, 114   ;;  %s1151_s13 = smov %s993_s16 }
 0x148   : > { %s1152_s14 = smov %s997_s17  ;;  %s1153_s15 = smov %s1157_s19 }
 0x149   : > { %s1154_s16 = smov %s1161_s20  ;;  %s1155_s17 = smov %s1165_s21 }
 0x14a   :  { %12 = sbr.rel (!%p10_p12) target bundleno = 4 (0x4), region = 79 }

// kernel: unet_forward.25
= control target key start
LH: loop header
LB: loop body
LE: loop exit
PB: predicated region body
PF: predicated region fallthrough
CT: control target
= control target key end

     0   :  { %s874_s12 = smov 0   ;;  %s876_s13 = smov 0   ;;  %s986_s0 = inlined_call_operand.vmem [shape: bf16[2,8,8,16], index: 0, kind: input, shape index: {}]   ;;  %s987_s1 = inlined_call_operand.vmem [shape: bf16[5,5,16,16], index: 1, kind: input, shape index: {}]   ;;  %s988_s2 = inlined_call_operand.vmem [shape: f32[1,16], index: 2, kind: input, shape index: {}]   ;;  %s989_s3 = inlined_call_operand.vmem [shape: bf16[2,4,4,16], index: 3, kind: output, shape index: {}]  }
   0x1   :  { %s878_s14 = smov 0   ;;  %s880_s15 = smov 0  }
   0x2   :  { %s882_s16 = smov 0   ;;  %s884_s17 = smov 0  }
   0x3   :  { %s886_s18 = smov 0  }
   0x4 LB: > { %s25_s19 = sadd.s32 1, %s837_s15  ;;  %s28_s20 = sadd.s32 1, %s841_s16  ;;  %s849_s18 = sphi %s886_s18, %s13_s18   ;;  %s845_s17 = sphi %s884_s17, %s995_s17   ;;  %s841_s16 = sphi %s882_s16, %s994_s16   ;;  %s837_s15 = sphi %s880_s15, %s993_s15   ;;  %s833_s14 = sphi %s878_s14, %s992_s14   ;;  %s829_s13 = sphi %s876_s13, %s991_s13   ;;  %s825_s12 = sphi %s874_s12, %s990_s12  }
   0x5   : > { %p26_p0 = scmp.ge.s32.totalorder %s25_s19, 5  ;;  %p659_p1 = scmp.ge.s32.totalorder %s849_s18, 1 }
   0x6   : > { %p177_p2 = scmp.lt.s32.totalorder %s849_s18, 41  ;;  %s32_s21 = sadd.s32 1, %s845_s17 }
   0x7   : > { %s997_s19 = smov (%p26_p0, %s25_s19), 0  ;;  %s999_s20 = smov (!%p26_p0, %s28_s20), %s841_s16 }
   0x8   : > { %p178_p3 = pnand %p659_p1, %p177_p2  ;;  %p30_p4 = scmp.ge.s32.totalorder %s999_s20, 4 }
   0x9   : > { %s213_s22 = sadd.s32 (!%p178_p3), %s825_s12, %s829_s13  ;;  %p214_p6 = scmp.lt.s32.totalorder (!%p178_p3), %s833_s14, 1 }
   0xa   : > { %s1001_s20 = smov (%p30_p4, %s999_s20), 0  ;;  %s1003_s21 = smov (!%p30_p4, %s32_s21), %s845_s17 }
   0xb   : > { %p34_p5 = scmp.ge.s32.totalorder %s1003_s21, 2  ;;  %181 = sbr.rel (%p178_p3) target bundleno = 305 (0x131), region = 32 }
   0xc   : > { %p216_p7 = scmp.lt.s32.totalorder (!%p178_p3), %s213_s22, 7  ;;  %p223_p8 = scmp.lt.s32.totalorder (!%p178_p3), %s825_s12, 4 }
   0xd   : > { %s1005_s21 = smov (%p34_p5, %s1003_s21), 0  ;;  %p230_p9 = scmp.lt.s32.totalorder (!%p178_p3), %s829_s13, 3 }
   0xe   : > { %p665_p10 = scmp.ne.s32.totalorder (!%p178_p3), %s825_s12, 0 }
  0x12   : > { %s1007_s14 = smov (!%p214_p6, %s833_s14), 1  ;;  %s1009_s22 = smov (!%p216_p7, %s213_s22), 7 }
  0x13   : > { %s660_s23 = sshll.u32 %s1007_s14, 3  ;;  %s663_s29 = sshll.u32 %s1007_s14, 2  ;;  %vm241_vm0 = vcmask (!%p665_p10), 125952   ;;  %v851_v0 = vmov (!%p665_p10), 0.0  }
  0x14   : > { %s219_s24 = sadd.s32 %s660_s23, %s1009_s22  ;;  %s1011_s13 = smov (!%p230_p9, %s829_s13), 3  ;;  %242 = vst.msk [vmem:[#allocation2] sm:$0xf] (!%p665_p10), %vm241_vm0, %v851_v0 }
  0x15   : > { %s661_s25 = sshll.u32 %s219_s24, 2  ;;  %s233_s5 = sadd.s32 %s663_s29, %s1011_s13 }
  0x16   : > { %s221_s28 = scalar_lea.vmem %s986_s0, %s661_s25  ;;  %s664_s9 = sshll.u32 %s233_s5, 1 }
  0x17   : > { %s224_s30 = scalar_select %p223_p8, %s825_s12, 4 }
  0x18   : > { %s937_s22 = scalar_lea.vmem %s989_s3, %s664_s9  ;;  %240 = sbr.rel (%p665_p10) target bundleno = 31 (0x1f), region = 36 }
  0x19   : > { %s729_s4 = smul.u32 40, %s224_s30 }
  0x1b   : > { %s932_s8 = scalar_lea.vmem %s987_s1, %s729_s4 }
  0x1f PF: > { %v789_v1 = vld [vmem:[%s932_s8] sm:$0xff]   ;;  %v852_v2 = vmov 0.0   ;;  %vm853_vm1 = vmmov 0   ;;  %vm255_vm2 = vcmask 130048   ;;  %v791_v4 = vld [vmem:[%s932_s8 + $0x8] sm:$0xff]   ;;  %v792_v7 = vld [vmem:[%s932_s8 + $0x10] sm:$0xff]  }
  0x20   : > { %699 = vmatprep.subr.bf16.mxu0 %v852_v2  ;;  %v790_v3 = vld [vmem:[%s221_s28] ss:$0 sps:$4 sm:$0xff]   ;;  %705 = vmatprep.subr.bf16.mxu1 %v852_v2  ;;  %v793_v9 = vld [vmem:[%s932_s8 + $0x18] sm:$0xff]   ;;  %vm300_vm3 = vcmask 125952   ;;  %p685_p11 = scmp.ne.s32.totalorder %s825_s12, 4 }
  0x21   : > { %700 = vmatpush3.bf16.msra.mxu0 %v789_v1  ;;  %701 = vmatprep.mubr.msk.bf16.mxu0 %vm853_vm1, %v852_v2  ;;  %v306_v5 = vshrl.u32 %v790_v3, 16  ;;  %v308_v6 = vshll.u32 %v790_v3, 16  ;;  %v368_v13 = vrot.slane %v790_v3, 1  ;;  %v794_v14 = vld [vmem:[%s932_s8 + $0x20] sm:$0xff]   ;;  %v482_v16 = vrot.slane %v790_v3, 2 }
  0x22   : > { %707 = vmatprep.mubr.msk.bf16.mxu1 %vm853_vm1, %v852_v2  ;;  %711 = vmatprep.subr.bf16.mxu0 %v852_v2  ;;  %v246_v17 = vld [vmem:[#allocation2] sm:$0xf]  ;;  %vm549_vm4 = vcmask (!%p685_p11), 123904  }
  0x23   : > { %706 = vmatpush3.bf16.msra.mxu1 %v791_v4  ;;  %v310_v8 = vrot.slane %v308_v6, 1  ;;  %v424_v11 = vrot.slane %v306_v5, 1  ;;  %v425_v12 = vrot.slane %v308_v6, 2  ;;  %v686_v48 = vld [vmem:[%s988_s2] ss:$0 sm:$0xff] (!%p685_p11) }
  0x24   : > { %702 = vmatmul.mubr.msk.bf16.vlgmr.msra.gmra.mrb[0].mxu0 %vm255_vm2, %v790_v3  ;;  %717 = vmatprep.subr.bf16.mxu1 %v852_v2 }
  0x25   : > { %712 = vmatpush3.bf16.msra.mxu0 %v792_v7  ;;  %713 = vmatprep.mubr.msk.bf16.mxu0 %vm853_vm1, %v852_v2  ;;  %v311_v10 = vor.u32 %v310_v8, %v306_v5  ;;  %v426_v15 = vor.u32 %v425_v12, %v424_v11 }
  0x26   : > { %723 = vmatprep.subr.bf16.mxu0 %v852_v2 }
  0x27   : > { %708 = vmatmul.mubr.msk.bf16.vlgmr.msra.gmra.mrb[0].mxu1 %vm255_vm2, %v311_v10 }
  0x28   : > { %718 = vmatpush3.bf16.msra.mxu1 %v793_v9  ;;  %719 = vmatprep.mubr.msk.bf16.mxu1 %vm853_vm1, %v852_v2 }
  0x2c   : > { %714 = vmatmul.mubr.msk.bf16.vlgmr.msra.gmra.mrb[4].mxu0 %vm255_vm2, %v368_v13 }
  0x2d   : > { %724 = vmatpush3.bf16.msra.mxu0 %v794_v14  ;;  %725 = vmatprep.mubr.msk.bf16.mxu0 %vm853_vm1, %v852_v2 }
  0x2f   : > { %720 = vmatmul.mubr.msk.bf16.vlgmr.msra.gmra.mrb[4].mxu1 %vm255_vm2, %v426_v15 }
  0x34   : > { %726 = vmatmul.mubr.msk.bf16.vlgmr.msra.gmra.mrb[8].mxu0 %vm255_vm2, %v482_v16 }
  0xf7   : > { %v293_v18 = vpop.f32.mrb[0].mxu0 }
  0xf8   : > { %v299_v19 = vadd.f32 %v293_v18, %v246_v17  ;;  %v703_v20 = vpop.f32.mrb[1].mxu0 }
  0xf9   : > { %v296_v21 = vpop.f32.mrb[2].mxu0 }
  0xfa   : > { %301 = vst.msk [vmem:[#allocation2] sm:$0xf] %vm300_vm3, %v299_v19  ;;  %v704_v22 = vpop.f32.mrb[3].mxu0  ;;  %v355_v23 = vpop.f32.mrb[0].mxu1 }
  0xfb   : > { %v709_v24 = vpop.f32.mrb[1].mxu1 }
  0xfc   : > { %v358_v25 = vpop.f32.mrb[2].mxu1 }
  0xfd   : > { %v710_v26 = vpop.f32.mrb[3].mxu1 }
  0xff   : > { %v412_v27 = vpop.f32.mrb[4].mxu0 }
 0x100   : > { %v715_v28 = vpop.f32.mrb[5].mxu0 }
 0x101   : > { %v302_v29 = vld [vmem:[#allocation2] sm:$0xf]  ;;  %v415_v30 = vpop.f32.mrb[6].mxu0 }
 0x102   : > { %v361_v31 = vadd.f32 %v355_v23, %v302_v29  ;;  %v716_v32 = vpop.f32.mrb[7].mxu0  ;;  %v470_v33 = vpop.f32.mrb[4].mxu1 }
 0x103   : > { %v721_v34 = vpop.f32.mrb[5].mxu1 }
 0x104   : > { %362 = vst.msk [vmem:[#allocation2] sm:$0xf] %vm300_vm3, %v361_v31  ;;  %v473_v35 = vpop.f32.mrb[6].mxu1 }
 0x105   : > { %v722_v36 = vpop.f32.mrb[7].mxu1 }
 0x107   : > { %v526_v37 = vpop.f32.mrb[8].mxu0 }
 0x108   : > { %v727_v38 = vpop.f32.mrb[9].mxu0 }
 0x109   : > { %v529_v39 = vpop.f32.mrb[10].mxu0 }
 0x10a   : > { %v728_v40 = vpop.f32.mrb[11].mxu0 }
 0x10b   : > { %v363_v41 = vld [vmem:[#allocation2] sm:$0xf] }
 0x10c   : > { %v418_v42 = vadd.f32 %v412_v27, %v363_v41 }
 0x10e   : > { %419 = vst.msk [vmem:[#allocation2] sm:$0xf] %vm300_vm3, %v418_v42 }
 0x115   : > { %v420_v43 = vld [vmem:[#allocation2] sm:$0xf] }
 0x116   : > { %v476_v44 = vadd.f32 %v470_v33, %v420_v43 }
 0x118   : > { %477 = vst.msk [vmem:[#allocation2] sm:$0xf] %vm300_vm3, %v476_v44 }
 0x11c   : > { %537 = sbr.rel (%p685_p11) target bundleno = 305 (0x131), region = 40 }
 0x11f   : > { %v478_v45 = vld [vmem:[#allocation2] sm:$0xf] }
 0x120   : > { %v532_v46 = vadd.f32 %v526_v37, %v478_v45 }
 0x122   : > { %533 = vst.msk [vmem:[#allocation2] sm:$0xf] %vm300_vm3, %v532_v46 }
 0x129   : > { %v538_v47 = vld [vmem:[#allocation2] sm:$0xf] }
 0x12a   : > { %v546_v49 = vadd.f32 %v686_v48, %v538_v47 }
 0x12c   : > { %v547_v50 = vmax.f32 %v546_v49, 0.0 }
 0x12e   : > { %v548_v51 = vpack.c.bf16 %v547_v50, %v547_v50 }
 0x130   : > { %550 = vst.msk [vmem:[%s937_s22] sm:$0x3] %vm549_vm4, %v548_v51 }
 0x131 PF: > { %s13_s18 = sadd.s32 1, %s849_s18   ;;  %s990_s12 = smov %s837_s15 }
 0x132   : > { %p10_p12 = scmp.ge.s32.totalorder %s13_s18, 42   ;;  %s991_s13 = smov %s841_s16 }
 0x133   : > { %s992_s14 = smov %s845_s17  ;;  %s993_s15 = smov %s997_s19 }
 0x134   : > { %s994_s16 = smov %s1001_s20  ;;  %s995_s17 = smov %s1005_s21 }
 0x135   :  { %12 = sbr.rel (!%p10_p12) target bundleno = 4 (0x4), region = 77 }

// kernel: unet_forward.28
= control target key start
LH: loop header
LB: loop body
LE: loop exit
PB: predicated region body
PF: predicated region fallthrough
CT: control target
= control target key end

     0   :  { %s725_s12 = smov 0   ;;  %s727_s13 = smov 0   ;;  %s823_s0 = inlined_call_operand.vmem [shape: bf16[2,4,4,16], index: 0, kind: input, shape index: {}]   ;;  %s824_s1 = inlined_call_operand.vmem [shape: bf16[3,3,16,32], index: 1, kind: input, shape index: {}]   ;;  %s825_s2 = inlined_call_operand.vmem [shape: f32[1,32], index: 2, kind: input, shape index: {}]   ;;  %s826_s3 = inlined_call_operand.vmem [shape: bf16[2,2,2,32], index: 3, kind: output, shape index: {}]  }
   0x1   :  { %s729_s14 = smov 0   ;;  %s731_s15 = smov 0  }
   0x2   :  { %s733_s16 = smov 0   ;;  %s735_s17 = smov 0  }
   0x3   :  { %s737_s18 = smov 0  }
   0x4 LB: > { %s25_s19 = sadd.s32 1, %s688_s15  ;;  %s28_s20 = sadd.s32 1, %s692_s16  ;;  %s700_s18 = sphi %s737_s18, %s13_s18   ;;  %s696_s17 = sphi %s735_s17, %s832_s17   ;;  %s692_s16 = sphi %s733_s16, %s831_s16   ;;  %s688_s15 = sphi %s731_s15, %s830_s15   ;;  %s684_s14 = sphi %s729_s14, %s829_s14   ;;  %s680_s13 = sphi %s727_s13, %s828_s13   ;;  %s676_s12 = sphi %s725_s12, %s827_s12  }
   0x5   : > { %p26_p0 = scmp.ge.s32.totalorder %s25_s19, 3  ;;  %p537_p1 = scmp.ge.s32.totalorder %s700_s18, 1 }
   0x6   : > { %p177_p2 = scmp.lt.s32.totalorder %s700_s18, 13  ;;  %s32_s21 = sadd.s32 1, %s696_s17 }
   0x7   : > { %s834_s19 = smov (%p26_p0, %s25_s19), 0  ;;  %s836_s20 = smov (!%p26_p0, %s28_s20), %s692_s16 }
   0x8   : > { %p178_p3 = pnand %p537_p1, %p177_p2  ;;  %p30_p4 = scmp.ge.s32.totalorder %s836_s20, 2 }
   0x9   : > { %s212_s22 = sadd.s32 (!%p178_p3), %s676_s12, %s680_s13  ;;  %p213_p6 = scmp.lt.s32.totalorder (!%p178_p3), %s684_s14, 1 }
   0xa   : > { %s838_s20 = smov (%p30_p4, %s836_s20), 0  ;;  %s840_s21 = smov (!%p30_p4, %s32_s21), %s696_s17 }
   0xb   : > { %p34_p5 = scmp.ge.s32.totalorder %s840_s21, 2  ;;  %181 = sbr.rel (%p178_p3) target bundleno = 285 (0x11d), region = 32 }
   0xc   : > { %p215_p7 = scmp.lt.s32.totalorder (!%p178_p3), %s212_s22, 3  ;;  %p222_p8 = scmp.lt.s32.totalorder (!%p178_p3), %s676_s12, 2 }
   0xd   : > { %s842_s21 = smov (%p34_p5, %s840_s21), 0  ;;  %p229_p9 = scmp.lt.s32.totalorder (!%p178_p3), %s680_s13, 1 }
   0xe   : > { %p542_p10 = scmp.ne.s32.totalorder (!%p178_p3), %s676_s12, 0 }
  0x12   : > { %s844_s14 = smov (!%p213_p6, %s684_s14), 1  ;;  %s846_s22 = smov (!%p215_p7, %s212_s22), 3 }
  0x13   : > { %s538_s23 = sshll.u32 %s844_s14, 2  ;;  %s541_s29 = sshll.u32 %s844_s14, 1  ;;  %vm239_vm0 = vcmask (!%p542_p10), 254976   ;;  %v702_v0 = vmov (!%p542_p10), 0.0  }
  0x14   : > { %s218_s24 = sadd.s32 %s538_s23, %s846_s22  ;;  %s848_s13 = smov (!%p229_p9, %s680_s13), 1  ;;  %240 = vst.msk [vmem:[#allocation2] sm:$0x3] (!%p542_p10), %vm239_vm0, %v702_v0 }
  0x15   : > { %s539_s25 = sshll.u32 %s218_s24, 1  ;;  %s780_s5 = sadd.s32 %s541_s29, %s848_s13 }
  0x16   : > { %s220_s28 = scalar_lea.vmem %s823_s0, %s539_s25  ;;  %s233_s11 = scalar_lea.vmem %s826_s3, %s780_s5 }
  0x17   : > { %s223_s30 = scalar_select %p222_p8, %s676_s12, 2 }
  0x18   : > { %238 = sbr.rel (%p542_p10) target bundleno = 31 (0x1f), region = 36 }
  0x19   : > { %s582_s4 = smul.u32 24, %s223_s30 }
  0x1b   : > { %s226_s8 = scalar_lea.vmem %s824_s1, %s582_s4 }
  0x1f PF: > { %v642_v1 = vld [vmem:[%s226_s8] sm:$0xff]   ;;  %v703_v2 = vmov 0.0   ;;  %vm704_vm1 = vmmov 0   ;;  %vm253_vm2 = vcmask 130048   ;;  %v644_v4 = vld [vmem:[%s226_s8 + $0x8] sm:$0xff]   ;;  %v645_v7 = vld [vmem:[%s226_s8 + $0x10] sm:$0xff]  }
  0x20   : > { %564 = vmatprep.subr.bf16.mxu0 %v703_v2  ;;  %v643_v3 = vld [vmem:[%s220_s28] ss:$0 sps:$4 sm:$0x33]   ;;  %570 = vmatprep.subr.bf16.mxu1 %v703_v2  ;;  %vm298_vm3 = vcmask 254976   ;;  %p554_p11 = scmp.ne.s32.totalorder %s676_s12, 2 }
  0x21   : > { %565 = vmatpush3.bf16.msra.mxu0 %v642_v1  ;;  %566 = vmatprep.mubr.msk.bf16.mxu0 %vm704_vm1, %v703_v2  ;;  %v304_v5 = vshrl.u32 %v643_v3, 16  ;;  %v306_v6 = vshll.u32 %v643_v3, 16  ;;  %v366_v10 = vrot.slane %v643_v3, 1  ;;  %v244_v11 = vld [vmem:[#allocation2] sm:$0x3]  ;;  %vm433_vm4 = vcmask (!%p554_p11), 253952  }
  0x22   : > { %572 = vmatprep.mubr.msk.bf16.mxu1 %vm704_vm1, %v703_v2  ;;  %576 = vmatprep.subr.bf16.mxu0 %v703_v2  ;;  %v555_v30 = vld [vmem:[%s825_s2] ss:$0 sm:$0xff] (!%p554_p11) }
  0x23   : > { %571 = vmatpush3.bf16.msra.mxu1 %v644_v4  ;;  %v308_v8 = vrot.slane %v306_v6, 1 }
  0x24   : > { %567 = vmatmul.mubr.msk.bf16.vlgmr.msra.gmra.mrb[0].mxu0 %vm253_vm2, %v643_v3 }
  0x25   : > { %577 = vmatpush3.bf16.msra.mxu0 %v645_v7  ;;  %578 = vmatprep.mubr.msk.bf16.mxu0 %vm704_vm1, %v703_v2  ;;  %v309_v9 = vor.u32 %v308_v8, %v304_v5 }
  0x27   : > { %573 = vmatmul.mubr.msk.bf16.vlgmr.msra.gmra.mrb[0].mxu1 %vm253_vm2, %v309_v9 }
  0x2c   : > { %579 = vmatmul.mubr.msk.bf16.vlgmr.msra.gmra.mrb[4].mxu0 %vm253_vm2, %v366_v10 }
  0xf7   : > { %v291_v12 = vpop.f32.mrb[0].mxu0 }
  0xf8   : > { %v297_v13 = vadd.f32 %v291_v12, %v244_v11  ;;  %v568_v14 = vpop.f32.mrb[1].mxu0 }
  0xf9   : > { %v294_v15 = vpop.f32.mrb[2].mxu0 }
  0xfa   : > { %299 = vst.msk [vmem:[#allocation2] sm:$0x3] %vm298_vm3, %v297_v13  ;;  %v569_v16 = vpop.f32.mrb[3].mxu0  ;;  %v353_v17 = vpop.f32.mrb[0].mxu1 }
  0xfb   : > { %v574_v18 = vpop.f32.mrb[1].mxu1 }
  0xfc   : > { %v356_v19 = vpop.f32.mrb[2].mxu1 }
  0xfd   : > { %v575_v20 = vpop.f32.mrb[3].mxu1 }
  0xff   : > { %v410_v21 = vpop.f32.mrb[4].mxu0 }
 0x100   : > { %v580_v22 = vpop.f32.mrb[5].mxu0 }
 0x101   : > { %v300_v23 = vld [vmem:[#allocation2] sm:$0x3]  ;;  %v413_v24 = vpop.f32.mrb[6].mxu0 }
 0x102   : > { %v359_v25 = vadd.f32 %v353_v17, %v300_v23  ;;  %v581_v26 = vpop.f32.mrb[7].mxu0 }
 0x104   : > { %360 = vst.msk [vmem:[#allocation2] sm:$0x3] %vm298_vm3, %v359_v25 }
 0x108   : > { %421 = sbr.rel (%p554_p11) target bundleno = 285 (0x11d), region = 40 }
 0x10b   : > { %v361_v27 = vld [vmem:[#allocation2] sm:$0x3] }
 0x10c   : > { %v416_v28 = vadd.f32 %v410_v21, %v361_v27 }
 0x10e   : > { %417 = vst.msk [vmem:[#allocation2] sm:$0x3] %vm298_vm3, %v416_v28 }
 0x115   : > { %v422_v29 = vld [vmem:[#allocation2] sm:$0x3] }
 0x116   : > { %v430_v31 = vadd.f32 %v555_v30, %v422_v29 }
 0x118   : > { %v431_v32 = vmax.f32 %v430_v31, 0.0 }
 0x11a   : > { %v432_v33 = vpack.c.bf16 %v431_v32, %v431_v32 }
 0x11c   : > { %434 = vst.msk [vmem:[%s233_s11] sm:$0x1] %vm433_vm4, %v432_v33 }
 0x11d PF: > { %s13_s18 = sadd.s32 1, %s700_s18   ;;  %s827_s12 = smov %s688_s15 }
 0x11e   : > { %p10_p12 = scmp.ge.s32.totalorder %s13_s18, 14   ;;  %s828_s13 = smov %s692_s16 }
 0x11f   : > { %s829_s14 = smov %s696_s17  ;;  %s830_s15 = smov %s834_s19 }
 0x120   : > { %s831_s16 = smov %s838_s20  ;;  %s832_s17 = smov %s842_s21 }
 0x121   :  { %12 = sbr.rel (!%p10_p12) target bundleno = 4 (0x4), region = 75 }

// kernel: unet_forward.29
= control target key start
LH: loop header
LB: loop body
LE: loop exit
PB: predicated region body
PF: predicated region fallthrough
CT: control target
= control target key end

     0   :  { %s768_s12 = smov 0   ;;  %s770_s13 = smov 0   ;;  %s877_s0 = inlined_call_operand.vmem [shape: bf16[2,4,4,32], index: 0, kind: input, shape index: {}]   ;;  %s878_s1 = inlined_call_operand.vmem [shape: bf16[3,3,32,32], index: 1, kind: input, shape index: {}]   ;;  %s879_s2 = inlined_call_operand.vmem [shape: f32[1,32], index: 2, kind: input, shape index: {}]   ;;  %s880_s3 = inlined_call_operand.vmem [shape: bf16[2,2,2,32], index: 3, kind: output, shape index: {}]  }
   0x1   :  { %s772_s14 = smov 0   ;;  %s774_s15 = smov 0  }
   0x2   :  { %s776_s16 = smov 0   ;;  %s778_s17 = smov 0  }
   0x3   :  { %s780_s18 = smov 0  }
   0x4 LB: > { %s25_s19 = sadd.s32 1, %s731_s15  ;;  %s28_s20 = sadd.s32 1, %s735_s16  ;;  %s743_s18 = sphi %s780_s18, %s13_s18   ;;  %s739_s17 = sphi %s778_s17, %s886_s17   ;;  %s735_s16 = sphi %s776_s16, %s885_s16   ;;  %s731_s15 = sphi %s774_s15, %s884_s15   ;;  %s727_s14 = sphi %s772_s14, %s883_s14   ;;  %s723_s13 = sphi %s770_s13, %s882_s13   ;;  %s719_s12 = sphi %s768_s12, %s881_s12  }
   0x5   : > { %p26_p0 = scmp.ge.s32.totalorder %s25_s19, 3  ;;  %p561_p1 = scmp.ge.s32.totalorder %s743_s18, 1 }
   0x6   : > { %p177_p2 = scmp.lt.s32.totalorder %s743_s18, 13  ;;  %s32_s21 = sadd.s32 1, %s739_s17 }
   0x7   : > { %s888_s19 = smov (%p26_p0, %s25_s19), 0  ;;  %s890_s20 = smov (!%p26_p0, %s28_s20), %s735_s16 }
   0x8   : > { %p178_p3 = pnand %p561_p1, %p177_p2  ;;  %p30_p4 = scmp.ge.s32.totalorder %s890_s20, 2 }
   0x9   : > { %s212_s22 = sadd.s32 (!%p178_p3), %s719_s12, %s723_s13  ;;  %p213_p6 = scmp.lt.s32.totalorder (!%p178_p3), %s727_s14, 1 }
   0xa   : > { %s892_s20 = smov (%p30_p4, %s890_s20), 0  ;;  %s894_s21 = smov (!%p30_p4, %s32_s21), %s739_s17 }
   0xb   : > { %p34_p5 = scmp.ge.s32.totalorder %s894_s21, 2  ;;  %181 = sbr.rel (%p178_p3) target bundleno = 289 (0x121), region = 32 }
   0xc   : > { %p215_p7 = scmp.lt.s32.totalorder (!%p178_p3), %s212_s22, 3  ;;  %p222_p8 = scmp.lt.s32.totalorder (!%p178_p3), %s719_s12, 2 }
   0xd   : > { %s896_s21 = smov (%p34_p5, %s894_s21), 0  ;;  %p229_p9 = scmp.lt.s32.totalorder (!%p178_p3), %s723_s13, 1 }
   0xe   : > { %p566_p10 = scmp.ne.s32.totalorder (!%p178_p3), %s719_s12, 0 }
  0x12   : > { %s898_s14 = smov (!%p213_p6, %s727_s14), 1  ;;  %s900_s22 = smov (!%p215_p7, %s212_s22), 3 }
  0x13   : > { %s562_s23 = sshll.u32 %s898_s14, 2  ;;  %s565_s29 = sshll.u32 %s898_s14, 1  ;;  %vm239_vm0 = vcmask (!%p566_p10), 254976   ;;  %v745_v0 = vmov (!%p566_p10), 0.0  }
  0x14   : > { %s218_s24 = sadd.s32 %s562_s23, %s900_s22  ;;  %s902_s13 = smov (!%p229_p9, %s723_s13), 1  ;;  %240 = vst.msk [vmem:[#allocation2] sm:$0x3] (!%p566_p10), %vm239_vm0, %v745_v0 }
  0x15   : > { %s563_s25 = sshll.u32 %s218_s24, 1  ;;  %s823_s5 = sadd.s32 %s565_s29, %s902_s13 }
  0x16   : > { %s220_s28 = scalar_lea.vmem %s877_s0, %s563_s25  ;;  %s233_s11 = scalar_lea.vmem %s880_s3, %s823_s5 }
  0x17   : > { %s223_s30 = scalar_select %p222_p8, %s719_s12, 2 }
  0x18   : > { %238 = sbr.rel (%p566_p10) target bundleno = 31 (0x1f), region = 36 }
  0x19   : > { %s622_s4 = smul.u32 48, %s223_s30 }
  0x1b   : > { %s828_s8 = scalar_lea.vmem %s878_s1, %s622_s4 }
  0x1f PF: > { %v682_v1 = vld [vmem:[%s828_s8] sm:$0xff]   ;;  %v746_v2 = vmov 0.0   ;;  %v683_v3 = vld [vmem:[%s828_s8 + $0x8] sm:$0xff]   ;;  %vm747_vm1 = vmmov 0   ;;  %v685_v5 = vld [vmem:[%s828_s8 + $0x10] sm:$0xff]   ;;  %vm261_vm2 = vcmask 261120  }
  0x20   : > { %598 = vmatprep.subr.bf16.mxu0 %v746_v2  ;;  %606 = vmatprep.subr.bf16.mxu1 %v746_v2  ;;  %v684_v4 = vld [vmem:[%s220_s28] ss:$0 sps:$4 sm:$0x33]   ;;  %v686_v6 = vld [vmem:[%s828_s8 + $0x18] sm:$0xff]   ;;  %v688_v12 = vld [vmem:[%s828_s8 + $0x28] sm:$0xff]   ;;  %vm306_vm3 = vcmask 254976  }
  0x21   : > { %599 = vmatpush3.bf16.msra.mxu0 %v682_v1  ;;  %602 = vmatprep.mubr.msk.bf16.mxu0 %vm747_vm1, %v746_v2  ;;  %v314_v7 = vshrl.u32 %v684_v4, 16  ;;  %v316_v8 = vshll.u32 %v684_v4, 16  ;;  %v687_v9 = vld [vmem:[%s828_s8 + $0x20] sm:$0xff]   ;;  %v384_v13 = vrot.slane %v684_v4, 1  ;;  %p585_p11 = scmp.ne.s32.totalorder %s719_s12, 2 }
  0x22   : > { %600 = vmatprep.subr.bf16.mxu0 %v746_v2  ;;  %610 = vmatprep.mubr.msk.bf16.mxu1 %vm747_vm1, %v746_v2  ;;  %v244_v14 = vld [vmem:[#allocation2] sm:$0x3]  ;;  %vm457_vm4 = vcmask (!%p585_p11), 253952  }
  0x23   : > { %607 = vmatpush3.bf16.msra.mxu1 %v685_v5  ;;  %v318_v10 = vrot.slane %v316_v8, 1  ;;  %v586_v33 = vld [vmem:[%s879_s2] ss:$0 sm:$0xff] (!%p585_p11) }
  0x24   : > { %608 = vmatprep.subr.bf16.mxu1 %v746_v2 }
  0x25   : > { %601 = vmatpush3.bf16.msra.mxu0 %v683_v3  ;;  %v319_v11 = vor.u32 %v318_v10, %v314_v7 }
  0x26   : > { %614 = vmatprep.subr.bf16.mxu0 %v746_v2 }
  0x27   : > { %609 = vmatpush3.bf16.msra.mxu1 %v686_v6 }
  0x28   : > { %603 = vmatmul.mubr.msk.bf16.vlgmr.msra.gmra.mrb[0].mxu0 %vm261_vm2, %v684_v4 }
  0x29   : > { %615 = vmatpush3.bf16.msra.mxu0 %v687_v9  ;;  %618 = vmatprep.mubr.msk.bf16.mxu0 %vm747_vm1, %v746_v2 }
  0x2a   : > { %616 = vmatprep.subr.bf16.mxu0 %v746_v2  ;;  %611 = vmatmul.mubr.msk.bf16.vlgmr.msra.gmra.mrb[0].mxu1 %vm261_vm2, %v319_v11 }
  0x2d   : > { %617 = vmatpush3.bf16.msra.mxu0 %v688_v12 }
  0x30   : > { %619 = vmatmul.mubr.msk.bf16.vlgmr.msra.gmra.mrb[4].mxu0 %vm261_vm2, %v384_v13 }
  0xfb   : > { %v299_v15 = vpop.f32.mrb[0].mxu0 }
  0xfc   : > { %v305_v16 = vadd.f32 %v299_v15, %v244_v14  ;;  %v604_v17 = vpop.f32.mrb[1].mxu0 }
  0xfd   : > { %v302_v18 = vpop.f32.mrb[2].mxu0  ;;  %v369_v20 = vpop.f32.mrb[0].mxu1 }
  0xfe   : > { %307 = vst.msk [vmem:[#allocation2] sm:$0x3] %vm306_vm3, %v305_v16  ;;  %v605_v19 = vpop.f32.mrb[3].mxu0  ;;  %v612_v21 = vpop.f32.mrb[1].mxu1 }
  0xff   : > { %v372_v22 = vpop.f32.mrb[2].mxu1 }
 0x100   : > { %v613_v23 = vpop.f32.mrb[3].mxu1 }
 0x103   : > { %v434_v24 = vpop.f32.mrb[4].mxu0 }
 0x104   : > { %v620_v25 = vpop.f32.mrb[5].mxu0 }
 0x105   : > { %v308_v26 = vld [vmem:[#allocation2] sm:$0x3]  ;;  %v437_v27 = vpop.f32.mrb[6].mxu0 }
 0x106   : > { %v375_v28 = vadd.f32 %v369_v20, %v308_v26  ;;  %v621_v29 = vpop.f32.mrb[7].mxu0 }
 0x108   : > { %376 = vst.msk [vmem:[#allocation2] sm:$0x3] %vm306_vm3, %v375_v28 }
 0x10c   : > { %445 = sbr.rel (%p585_p11) target bundleno = 289 (0x121), region = 40 }
 0x10f   : > { %v377_v30 = vld [vmem:[#allocation2] sm:$0x3] }
 0x110   : > { %v440_v31 = vadd.f32 %v434_v24, %v377_v30 }
 0x112   : > { %441 = vst.msk [vmem:[#allocation2] sm:$0x3] %vm306_vm3, %v440_v31 }
 0x119   : > { %v446_v32 = vld [vmem:[#allocation2] sm:$0x3] }
 0x11a   : > { %v454_v34 = vadd.f32 %v586_v33, %v446_v32 }
 0x11c   : > { %v455_v35 = vmax.f32 %v454_v34, 0.0 }
 0x11e   : > { %v456_v36 = vpack.c.bf16 %v455_v35, %v455_v35 }
 0x120   : > { %458 = vst.msk [vmem:[%s233_s11] sm:$0x1] %vm457_vm4, %v456_v36 }
 0x121 PF: > { %s13_s18 = sadd.s32 1, %s743_s18   ;;  %s881_s12 = smov %s731_s15 }
 0x122   : > { %p10_p12 = scmp.ge.s32.totalorder %s13_s18, 14   ;;  %s882_s13 = smov %s735_s16 }
 0x123   : > { %s883_s14 = smov %s739_s17  ;;  %s884_s15 = smov %s888_s19 }
 0x124   : > { %s885_s16 = smov %s892_s20  ;;  %s886_s17 = smov %s896_s21 }
 0x125   :  { %12 = sbr.rel (!%p10_p12) target bundleno = 4 (0x4), region = 75 }

// kernel: unet_forward.30
= control target key start
LH: loop header
LB: loop body
LE: loop exit
PB: predicated region body
PF: predicated region fallthrough
CT: control target
= control target key end

     0   :  { %s777_s12 = smov 0   ;;  %s779_s13 = smov 0   ;;  %s881_s0 = inlined_call_operand.vmem [shape: bf16[2,6,6,32], index: 0, kind: input, shape index: {}]   ;;  %s882_s1 = inlined_call_operand.vmem [shape: bf16[3,3,32,16], index: 1, kind: input, shape index: {}]   ;;  %s883_s2 = inlined_call_operand.vmem [shape: f32[1,16], index: 2, kind: input, shape index: {}]   ;;  %s884_s3 = inlined_call_operand.vmem [shape: bf16[2,4,4,16], index: 3, kind: output, shape index: {}]  }
   0x1   :  { %s781_s14 = smov 0   ;;  %s783_s15 = smov 0  }
   0x2   :  { %s785_s16 = smov 0   ;;  %s787_s17 = smov 0  }
   0x3   :  { %s789_s18 = smov 0  }
   0x4 LB: > { %s25_s19 = sadd.s32 1, %s740_s15  ;;  %s28_s20 = sadd.s32 1, %s744_s16  ;;  %s752_s18 = sphi %s789_s18, %s13_s18   ;;  %s748_s17 = sphi %s787_s17, %s890_s17   ;;  %s744_s16 = sphi %s785_s16, %s889_s16   ;;  %s740_s15 = sphi %s783_s15, %s888_s15   ;;  %s736_s14 = sphi %s781_s14, %s887_s14   ;;  %s732_s13 = sphi %s779_s13, %s886_s13   ;;  %s728_s12 = sphi %s777_s12, %s885_s12  }
   0x5   : > { %p26_p0 = scmp.ge.s32.totalorder %s25_s19, 3  ;;  %p569_p1 = scmp.ge.s32.totalorder %s752_s18, 1 }
   0x6   : > { %p177_p2 = scmp.lt.s32.totalorder %s752_s18, 25  ;;  %s32_s21 = sadd.s32 1, %s748_s17 }
   0x7   : > { %s892_s19 = smov (%p26_p0, %s25_s19), 0  ;;  %s894_s20 = smov (!%p26_p0, %s28_s20), %s744_s16 }
   0x8   : > { %p178_p3 = pnand %p569_p1, %p177_p2  ;;  %p30_p4 = scmp.ge.s32.totalorder %s894_s20, 4 }
   0x9   : > { %s213_s22 = sadd.s32 (!%p178_p3), %s728_s12, %s732_s13  ;;  %p214_p6 = scmp.lt.s32.totalorder (!%p178_p3), %s736_s14, 1 }
   0xa   : > { %s896_s20 = smov (%p30_p4, %s894_s20), 0  ;;  %s898_s21 = smov (!%p30_p4, %s32_s21), %s748_s17 }
   0xb   : > { %p34_p5 = scmp.ge.s32.totalorder %s898_s21, 2  ;;  %181 = sbr.rel (%p178_p3) target bundleno = 290 (0x122), region = 32 }
   0xc   : > { %p216_p7 = scmp.lt.s32.totalorder (!%p178_p3), %s213_s22, 5  ;;  %p223_p8 = scmp.lt.s32.totalorder (!%p178_p3), %s728_s12, 2 }
   0xd   : > { %s900_s21 = smov (%p34_p5, %s898_s21), 0  ;;  %p230_p9 = scmp.lt.s32.totalorder (!%p178_p3), %s732_s13, 3 }
   0xe   : > { %p574_p10 = scmp.ne.s32.totalorder (!%p178_p3), %s728_s12, 0 }
  0x12   : > { %s902_s14 = smov (!%p214_p6, %s736_s14), 1  ;;  %s904_s22 = smov (!%p216_p7, %s213_s22), 5 }
  0x13   : > { %s630_s23 = smul.u32 6, %s902_s14  ;;  %s572_s7 = sshll.u32 %s902_s14, 2  ;;  %vm241_vm0 = vcmask (!%p574_p10), 125952   ;;  %v754_v0 = vmov (!%p574_p10), 0.0  }
  0x14   : > { %s224_s24 = scalar_select %p223_p8, %s728_s12, 2 }
  0x15   : > { %s219_s25 = sadd.s32 %s630_s23, %s904_s22  ;;  %s906_s13 = smov (!%p230_p9, %s732_s13), 3  ;;  %242 = vst.msk [vmem:[#allocation2] sm:$0xf] (!%p574_p10), %vm241_vm0, %v754_v0 }
  0x16   : > { %s570_s26 = sshll.u32 %s219_s25, 2  ;;  %s631_s27 = smul.u32 48, %s224_s24 }
  0x17   : > { %s221_s30 = scalar_lea.vmem %s881_s0, %s570_s26  ;;  %s233_s8 = sadd.s32 %s572_s7, %s906_s13 }
  0x18   : > { %s834_s6 = scalar_lea.vmem %s882_s1, %s631_s27  ;;  %s573_s9 = sshll.u32 %s233_s8, 1 }
  0x19   : > { %s840_s22 = scalar_lea.vmem %s884_s3, %s573_s9  ;;  %240 = sbr.rel (%p574_p10) target bundleno = 32 (0x20), region = 36 }
  0x20 PF: > { %v691_v1 = vld [vmem:[%s834_s6] sm:$0xff]   ;;  %v755_v2 = vmov 0.0   ;;  %v692_v3 = vld [vmem:[%s834_s6 + $0x8] sm:$0xff]   ;;  %vm756_vm1 = vmmov 0   ;;  %v694_v5 = vld [vmem:[%s834_s6 + $0x10] sm:$0xff]   ;;  %vm263_vm2 = vcmask 261120  }
  0x21   : > { %606 = vmatprep.subr.bf16.mxu0 %v755_v2  ;;  %614 = vmatprep.subr.bf16.mxu1 %v755_v2  ;;  %v693_v4 = vld [vmem:[%s221_s30] ss:$0 sps:$4 sm:$0x77]   ;;  %v695_v6 = vld [vmem:[%s834_s6 + $0x18] sm:$0xff]   ;;  %v697_v12 = vld [vmem:[%s834_s6 + $0x28] sm:$0xff]   ;;  %vm308_vm3 = vcmask 125952  }
  0x22   : > { %607 = vmatpush3.bf16.msra.mxu0 %v691_v1  ;;  %610 = vmatprep.mubr.msk.bf16.mxu0 %vm756_vm1, %v755_v2  ;;  %v316_v7 = vshrl.u32 %v693_v4, 16  ;;  %v318_v8 = vshll.u32 %v693_v4, 16  ;;  %v696_v9 = vld [vmem:[%s834_s6 + $0x20] sm:$0xff]   ;;  %v386_v13 = vrot.slane %v693_v4, 1  ;;  %p593_p11 = scmp.ne.s32.totalorder %s728_s12, 2 }
  0x23   : > { %608 = vmatprep.subr.bf16.mxu0 %v755_v2  ;;  %618 = vmatprep.mubr.msk.bf16.mxu1 %vm756_vm1, %v755_v2  ;;  %v246_v14 = vld [vmem:[#allocation2] sm:$0xf]  ;;  %vm459_vm4 = vcmask (!%p593_p11), 123904  }
  0x24   : > { %615 = vmatpush3.bf16.msra.mxu1 %v694_v5  ;;  %v320_v10 = vrot.slane %v318_v8, 1  ;;  %v594_v33 = vld [vmem:[%s883_s2] ss:$0 sm:$0xff] (!%p593_p11) }
  0x25   : > { %616 = vmatprep.subr.bf16.mxu1 %v755_v2 }
  0x26   : > { %609 = vmatpush3.bf16.msra.mxu0 %v692_v3  ;;  %v321_v11 = vor.u32 %v320_v10, %v316_v7 }
  0x27   : > { %622 = vmatprep.subr.bf16.mxu0 %v755_v2 }
  0x28   : > { %617 = vmatpush3.bf16.msra.mxu1 %v695_v6 }
  0x29   : > { %611 = vmatmul.mubr.msk.bf16.vlgmr.msra.gmra.mrb[0].mxu0 %vm263_vm2, %v693_v4 }
  0x2a   : > { %623 = vmatpush3.bf16.msra.mxu0 %v696_v9  ;;  %626 = vmatprep.mubr.msk.bf16.mxu0 %vm756_vm1, %v755_v2 }
  0x2b   : > { %624 = vmatprep.subr.bf16.mxu0 %v755_v2  ;;  %619 = vmatmul.mubr.msk.bf16.vlgmr.msra.gmra.mrb[0].mxu1 %vm263_vm2, %v321_v11 }
  0x2e   : > { %625 = vmatpush3.bf16.msra.mxu0 %v697_v12 }
  0x31   : > { %627 = vmatmul.mubr.msk.bf16.vlgmr.msra.gmra.mrb[4].mxu0 %vm263_vm2, %v386_v13 }
  0xfc   : > { %v301_v15 = vpop.f32.mrb[0].mxu0 }
  0xfd   : > { %v307_v16 = vadd.f32 %v301_v15, %v246_v14  ;;  %v612_v17 = vpop.f32.mrb[1].mxu0 }
  0xfe   : > { %v304_v18 = vpop.f32.mrb[2].mxu0  ;;  %v371_v20 = vpop.f32.mrb[0].mxu1 }
  0xff   : > { %309 = vst.msk [vmem:[#allocation2] sm:$0xf] %vm308_vm3, %v307_v16  ;;  %v613_v19 = vpop.f32.mrb[3].mxu0  ;;  %v620_v21 = vpop.f32.mrb[1].mxu1 }
 0x100   : > { %v374_v22 = vpop.f32.mrb[2].mxu1 }
 0x101   : > { %v621_v23 = vpop.f32.mrb[3].mxu1 }
 0x104   : > { %v436_v24 = vpop.f32.mrb[4].mxu0 }
 0x105   : > { %v628_v25 = vpop.f32.mrb[5].mxu0 }
 0x106   : > { %v310_v26 = vld [vmem:[#allocation2] sm:$0xf]  ;;  %v439_v27 = vpop.f32.mrb[6].mxu0 }
 0x107   : > { %v377_v28 = vadd.f32 %v371_v20, %v310_v26  ;;  %v629_v29 = vpop.f32.mrb[7].mxu0 }
 0x109   : > { %378 = vst.msk [vmem:[#allocation2] sm:$0xf] %vm308_vm3, %v377_v28 }
 0x10d   : > { %447 = sbr.rel (%p593_p11) target bundleno = 290 (0x122), region = 40 }
 0x110   : > { %v379_v30 = vld [vmem:[#allocation2] sm:$0xf] }
 0x111   : > { %v442_v31 = vadd.f32 %v436_v24, %v379_v30 }
 0x113   : > { %443 = vst.msk [vmem:[#allocation2] sm:$0xf] %vm308_vm3, %v442_v31 }
 0x11a   : > { %v448_v32 = vld [vmem:[#allocation2] sm:$0xf] }
 0x11b   : > { %v456_v34 = vadd.f32 %v594_v33, %v448_v32 }
 0x11d   : > { %v457_v35 = vmax.f32 %v456_v34, 0.0 }
 0x11f   : > { %v458_v36 = vpack.c.bf16 %v457_v35, %v457_v35 }
 0x121   : > { %460 = vst.msk [vmem:[%s840_s22] sm:$0x3] %vm459_vm4, %v458_v36 }
 0x122 PF: > { %s13_s18 = sadd.s32 1, %s752_s18   ;;  %s885_s12 = smov %s740_s15 }
 0x123   : > { %p10_p12 = scmp.ge.s32.totalorder %s13_s18, 26   ;;  %s886_s13 = smov %s744_s16 }
 0x124   : > { %s887_s14 = smov %s748_s17  ;;  %s888_s15 = smov %s892_s19 }
 0x125   : > { %s889_s16 = smov %s896_s20  ;;  %s890_s17 = smov %s900_s21 }
 0x126   :  { %12 = sbr.rel (!%p10_p12) target bundleno = 4 (0x4), region = 75 }

// kernel: unet_forward.31
= control target key start
LH: loop header
LB: loop body
LE: loop exit
PB: predicated region body
PF: predicated region fallthrough
CT: control target
= control target key end

     0   :  { %s734_s12 = smov 0   ;;  %s736_s13 = smov 0   ;;  %s827_s0 = inlined_call_operand.vmem [shape: bf16[2,6,6,16], index: 0, kind: input, shape index: {}]   ;;  %s828_s1 = inlined_call_operand.vmem [shape: bf16[3,3,16,16], index: 1, kind: input, shape index: {}]   ;;  %s829_s2 = inlined_call_operand.vmem [shape: f32[1,16], index: 2, kind: input, shape index: {}]   ;;  %s830_s3 = inlined_call_operand.vmem [shape: bf16[2,4,4,16], index: 3, kind: output, shape index: {}]  }
   0x1   :  { %s738_s14 = smov 0   ;;  %s740_s15 = smov 0  }
   0x2   :  { %s742_s16 = smov 0   ;;  %s744_s17 = smov 0  }
   0x3   :  { %s746_s18 = smov 0  }
   0x4 LB: > { %s25_s19 = sadd.s32 1, %s697_s15  ;;  %s28_s20 = sadd.s32 1, %s701_s16  ;;  %s709_s18 = sphi %s746_s18, %s13_s18   ;;  %s705_s17 = sphi %s744_s17, %s838_s17   ;;  %s701_s16 = sphi %s742_s16, %s837_s16   ;;  %s697_s15 = sphi %s740_s15, %s836_s15   ;;  %s693_s14 = sphi %s738_s14, %s835_s14   ;;  %s689_s13 = sphi %s736_s13, %s834_s13   ;;  %s685_s12 = sphi %s734_s12, %s833_s12  }
   0x5   : > { %p26_p0 = scmp.ge.s32.totalorder %s25_s19, 3  ;;  %p545_p1 = scmp.ge.s32.totalorder %s709_s18, 1 }
   0x6   : > { %p177_p2 = scmp.lt.s32.totalorder %s709_s18, 25  ;;  %s32_s21 = sadd.s32 1, %s705_s17 }
   0x7   : > { %s840_s19 = smov (%p26_p0, %s25_s19), 0  ;;  %s842_s20 = smov (!%p26_p0, %s28_s20), %s701_s16 }
   0x8   : > { %p178_p3 = pnand %p545_p1, %p177_p2  ;;  %p30_p4 = scmp.ge.s32.totalorder %s842_s20, 4 }
   0x9   : > { %s213_s22 = sadd.s32 (!%p178_p3), %s685_s12, %s689_s13  ;;  %p214_p6 = scmp.lt.s32.totalorder (!%p178_p3), %s693_s14, 1 }
   0xa   : > { %s844_s20 = smov (%p30_p4, %s842_s20), 0  ;;  %s846_s21 = smov (!%p30_p4, %s32_s21), %s705_s17 }
   0xb   : > { %p34_p5 = scmp.ge.s32.totalorder %s846_s21, 2  ;;  %181 = sbr.rel (%p178_p3) target bundleno = 286 (0x11e), region = 32 }
   0xc   : > { %p216_p7 = scmp.lt.s32.totalorder (!%p178_p3), %s213_s22, 5  ;;  %p223_p8 = scmp.lt.s32.totalorder (!%p178_p3), %s685_s12, 2 }
   0xd   : > { %s848_s21 = smov (%p34_p5, %s846_s21), 0  ;;  %p230_p9 = scmp.lt.s32.totalorder (!%p178_p3), %s689_s13, 3 }
   0xe   : > { %831 = sst [smem:[#allocation3_spill]] %s848_s21  ;;  %p550_p10 = scmp.ne.s32.totalorder (!%p178_p3), %s685_s12, 0 }
  0x12   : > { %s850_s14 = smov (!%p214_p6, %s693_s14), 1  ;;  %s852_s22 = smov (!%p216_p7, %s213_s22), 5 }
  0x13   : > { %s590_s23 = smul.u32 6, %s850_s14  ;;  %s548_s7 = sshll.u32 %s850_s14, 2  ;;  %vm241_vm0 = vcmask (!%p550_p10), 125952   ;;  %v711_v0 = vmov (!%p550_p10), 0.0  }
  0x14   : > { %s224_s24 = scalar_select %p223_p8, %s685_s12, 2 }
  0x15   : > { %s219_s25 = sadd.s32 %s590_s23, %s852_s22  ;;  %s854_s13 = smov (!%p230_p9, %s689_s13), 3  ;;  %242 = vst.msk [vmem:[#allocation2] sm:$0xf] (!%p550_p10), %vm241_vm0, %v711_v0 }
  0x16   : > { %s546_s26 = sshll.u32 %s219_s25, 2  ;;  %s591_s27 = smul.u32 24, %s224_s24 }
  0x17   : > { %s221_s30 = scalar_lea.vmem %s827_s0, %s546_s26  ;;  %s233_s8 = sadd.s32 %s548_s7, %s854_s13 }
  0x18   : > { %s227_s6 = scalar_lea.vmem %s828_s1, %s591_s27  ;;  %s549_s9 = sshll.u32 %s233_s8, 1 }
  0x19   : > { %s795_s21 = scalar_lea.vmem %s830_s3, %s549_s9  ;;  %240 = sbr.rel (%p550_p10) target bundleno = 32 (0x20), region = 36 }
  0x20 PF: > { %v651_v1 = vld [vmem:[%s227_s6] sm:$0xff]   ;;  %v712_v2 = vmov 0.0   ;;  %vm713_vm1 = vmmov 0   ;;  %vm255_vm2 = vcmask 130048   ;;  %v653_v4 = vld [vmem:[%s227_s6 + $0x8] sm:$0xff]   ;;  %v654_v7 = vld [vmem:[%s227_s6 + $0x10] sm:$0xff]  }
  0x21   : > { %572 = vmatprep.subr.bf16.mxu0 %v712_v2  ;;  %v652_v3 = vld [vmem:[%s221_s30] ss:$0 sps:$4 sm:$0x77]   ;;  %578 = vmatprep.subr.bf16.mxu1 %v712_v2  ;;  %vm300_vm3 = vcmask 125952   ;;  %p562_p11 = scmp.ne.s32.totalorder %s685_s12, 2 }
  0x22   : > { %573 = vmatpush3.bf16.msra.mxu0 %v651_v1  ;;  %574 = vmatprep.mubr.msk.bf16.mxu0 %vm713_vm1, %v712_v2  ;;  %v306_v5 = vshrl.u32 %v652_v3, 16  ;;  %v308_v6 = vshll.u32 %v652_v3, 16  ;;  %v368_v10 = vrot.slane %v652_v3, 1  ;;  %v246_v11 = vld [vmem:[#allocation2] sm:$0xf]  ;;  %vm435_vm4 = vcmask (!%p562_p11), 123904  }
  0x23   : > { %580 = vmatprep.mubr.msk.bf16.mxu1 %vm713_vm1, %v712_v2  ;;  %584 = vmatprep.subr.bf16.mxu0 %v712_v2  ;;  %v563_v30 = vld [vmem:[%s829_s2] ss:$0 sm:$0xff] (!%p562_p11) }
  0x24   : > { %579 = vmatpush3.bf16.msra.mxu1 %v653_v4  ;;  %v310_v8 = vrot.slane %v308_v6, 1 }
  0x25   : > { %575 = vmatmul.mubr.msk.bf16.vlgmr.msra.gmra.mrb[0].mxu0 %vm255_vm2, %v652_v3 }
  0x26   : > { %585 = vmatpush3.bf16.msra.mxu0 %v654_v7  ;;  %586 = vmatprep.mubr.msk.bf16.mxu0 %vm713_vm1, %v712_v2  ;;  %v311_v9 = vor.u32 %v310_v8, %v306_v5 }
  0x28   : > { %581 = vmatmul.mubr.msk.bf16.vlgmr.msra.gmra.mrb[0].mxu1 %vm255_vm2, %v311_v9 }
  0x2d   : > { %587 = vmatmul.mubr.msk.bf16.vlgmr.msra.gmra.mrb[4].mxu0 %vm255_vm2, %v368_v10 }
  0xf8   : > { %v293_v12 = vpop.f32.mrb[0].mxu0 }
  0xf9   : > { %v299_v13 = vadd.f32 %v293_v12, %v246_v11  ;;  %v576_v14 = vpop.f32.mrb[1].mxu0 }
  0xfa   : > { %v296_v15 = vpop.f32.mrb[2].mxu0 }
  0xfb   : > { %301 = vst.msk [vmem:[#allocation2] sm:$0xf] %vm300_vm3, %v299_v13  ;;  %v577_v16 = vpop.f32.mrb[3].mxu0  ;;  %v355_v17 = vpop.f32.mrb[0].mxu1 }
  0xfc   : > { %v582_v18 = vpop.f32.mrb[1].mxu1 }
  0xfd   : > { %v358_v19 = vpop.f32.mrb[2].mxu1 }
  0xfe   : > { %v583_v20 = vpop.f32.mrb[3].mxu1 }
 0x100   : > { %v412_v21 = vpop.f32.mrb[4].mxu0 }
 0x101   : > { %v588_v22 = vpop.f32.mrb[5].mxu0 }
 0x102   : > { %v302_v23 = vld [vmem:[#allocation2] sm:$0xf]  ;;  %v415_v24 = vpop.f32.mrb[6].mxu0 }
 0x103   : > { %v361_v25 = vadd.f32 %v355_v17, %v302_v23  ;;  %v589_v26 = vpop.f32.mrb[7].mxu0 }
 0x105   : > { %362 = vst.msk [vmem:[#allocation2] sm:$0xf] %vm300_vm3, %v361_v25 }
 0x109   : > { %423 = sbr.rel (%p562_p11) target bundleno = 286 (0x11e), region = 40 }
 0x10c   : > { %v363_v27 = vld [vmem:[#allocation2] sm:$0xf] }
 0x10d   : > { %v418_v28 = vadd.f32 %v412_v21, %v363_v27 }
 0x10f   : > { %419 = vst.msk [vmem:[#allocation2] sm:$0xf] %vm300_vm3, %v418_v28 }
 0x116   : > { %v424_v29 = vld [vmem:[#allocation2] sm:$0xf] }
 0x117   : > { %v432_v31 = vadd.f32 %v563_v30, %v424_v29 }
 0x119   : > { %v433_v32 = vmax.f32 %v432_v31, 0.0 }
 0x11b   : > { %v434_v33 = vpack.c.bf16 %v433_v32, %v433_v32 }
 0x11d   : > { %436 = vst.msk [vmem:[%s795_s21] sm:$0x3] %vm435_vm4, %v434_v33 }
 0x11e PF: > { %s13_s18 = sadd.s32 1, %s709_s18   ;;  %s832_s22 = sld [smem:[#allocation3_spill]] }
 0x11f   : > { %p10_p12 = scmp.ge.s32.totalorder %s13_s18, 26   ;;  %s833_s12 = smov %s697_s15 }
 0x120   : > { %s834_s13 = smov %s701_s16  ;;  %s835_s14 = smov %s705_s17 }
 0x121   : > { %s836_s15 = smov %s840_s19  ;;  %s837_s16 = smov %s844_s20 }
 0x122   :  { %12 = sbr.rel (!%p10_p12) target bundleno = 4 (0x4), region = 75 }
 0x124   : > { %s838_s17 = smov %s832_s22 }

// kernel: unet_forward.32
= control target key start
LH: loop header
LB: loop body
LE: loop exit
PB: predicated region body
PF: predicated region fallthrough
CT: control target
= control target key end

     0   :  { %s790_s12 = smov 0   ;;  %s792_s13 = smov 0   ;;  %s894_s0 = inlined_call_operand.vmem [shape: bf16[2,10,10,32], index: 0, kind: input, shape index: {}]   ;;  %s895_s1 = inlined_call_operand.vmem [shape: bf16[3,3,32,16], index: 1, kind: input, shape index: {}]   ;;  %s896_s2 = inlined_call_operand.vmem [shape: f32[1,16], index: 2, kind: input, shape index: {}]   ;;  %s897_s3 = inlined_call_operand.vmem [shape: bf16[2,8,8,16], index: 3, kind: output, shape index: {}]  }
   0x1   :  { %s794_s14 = smov 0   ;;  %s796_s15 = smov 0  }
   0x2   :  { %s798_s16 = smov 0   ;;  %s800_s17 = smov 0  }
   0x3   :  { %s802_s18 = smov 0  }
   0x4 LB: > { %s25_s19 = sadd.s32 1, %s753_s15  ;;  %s28_s20 = sadd.s32 1, %s757_s16  ;;  %s765_s18 = sphi %s802_s18, %s13_s18   ;;  %s761_s17 = sphi %s800_s17, %s903_s17   ;;  %s757_s16 = sphi %s798_s16, %s902_s16   ;;  %s753_s15 = sphi %s796_s15, %s901_s15   ;;  %s749_s14 = sphi %s794_s14, %s900_s14   ;;  %s745_s13 = sphi %s792_s13, %s899_s13   ;;  %s741_s12 = sphi %s790_s12, %s898_s12  }
   0x5   : > { %p26_p0 = scmp.ge.s32.totalorder %s25_s19, 3  ;;  %p579_p1 = scmp.ge.s32.totalorder %s765_s18, 1 }
   0x6   : > { %p178_p2 = scmp.lt.s32.totalorder %s765_s18, 49  ;;  %s32_s21 = sadd.s32 1, %s761_s17 }
   0x7   : > { %s905_s19 = smov (%p26_p0, %s25_s19), 0  ;;  %s907_s20 = smov (!%p26_p0, %s28_s20), %s757_s16 }
   0x8   : > { %p179_p3 = pnand %p579_p1, %p178_p2  ;;  %p30_p4 = scmp.ge.s32.totalorder %s907_s20, 8 }
   0x9   : > { %s215_s22 = sadd.s32 (!%p179_p3), %s741_s12, %s745_s13  ;;  %p216_p6 = scmp.lt.s32.totalorder (!%p179_p3), %s749_s14, 1 }
   0xa   : > { %s909_s20 = smov (%p30_p4, %s907_s20), 0  ;;  %s911_s21 = smov (!%p30_p4, %s32_s21), %s761_s17 }
   0xb   : > { %p34_p5 = scmp.ge.s32.totalorder %s911_s21, 2  ;;  %182 = sbr.rel (%p179_p3) target bundleno = 290 (0x122), region = 32 }
   0xc   : > { %p218_p7 = scmp.lt.s32.totalorder (!%p179_p3), %s215_s22, 9  ;;  %p226_p8 = scmp.lt.s32.totalorder (!%p179_p3), %s741_s12, 2 }
   0xd   : > { %s913_s21 = smov (%p34_p5, %s911_s21), 0  ;;  %p233_p9 = scmp.lt.s32.totalorder (!%p179_p3), %s745_s13, 7 }
   0xe   : > { %p585_p10 = scmp.ne.s32.totalorder (!%p179_p3), %s741_s12, 0 }
  0x12   : > { %s915_s14 = smov (!%p216_p6, %s749_s14), 1  ;;  %s917_s22 = smov (!%p218_p7, %s215_s22), 9 }
  0x13   : > { %s642_s23 = smul.u32 20, %s915_s14  ;;  %s580_s24 = sshll.u32 %s917_s22, 1  ;;  %vm244_vm0 = vcmask (!%p585_p10), 130048   ;;  %v767_v0 = vmov (!%p585_p10), 0.0  }
  0x14   : > { %s583_s30 = sshll.u32 %s915_s14, 3  ;;  %s919_s13 = smov (!%p233_p9, %s745_s13), 7  ;;  %245 = vst.msk [vmem:[#allocation2] sm:$0xff] (!%p585_p10), %vm244_vm0, %v767_v0 }
  0x15   : > { %s222_s25 = sadd.s32 %s642_s23, %s580_s24  ;;  %s236_s6 = sadd.s32 %s583_s30, %s919_s13 }
  0x16   : > { %s581_s26 = sshll.u32 %s222_s25, 2  ;;  %s584_s10 = sshll.u32 %s236_s6, 2 }
  0x17   : > { %s224_s29 = scalar_lea.vmem %s894_s0, %s581_s26  ;;  %s853_s23 = scalar_lea.vmem %s897_s3, %s584_s10 }
  0x18   : > { %s227_s4 = scalar_select %p226_p8, %s741_s12, 2 }
  0x19   : > { %243 = sbr.rel (%p585_p10) target bundleno = 32 (0x20), region = 36 }
  0x1a   : > { %s643_s5 = smul.u32 48, %s227_s4 }
  0x1c   : > { %s848_s9 = scalar_lea.vmem %s895_s1, %s643_s5 }
  0x20 PF: > { %v703_v1 = vld [vmem:[%s848_s9] sm:$0xff]   ;;  %v768_v2 = vmov 0.0   ;;  %v704_v3 = vld [vmem:[%s848_s9 + $0x8] sm:$0xff]   ;;  %vm769_vm1 = vmmov 0   ;;  %v707_v6 = vld [vmem:[%s848_s9 + $0x10] sm:$0xff]   ;;  %vm268_vm2 = vcmask 261120  }
  0x21   : > { %618 = vmatprep.subr.bf16.mxu0 %v768_v2  ;;  %626 = vmatprep.subr.bf16.mxu1 %v768_v2  ;;  %v246_v4 = vld [vmem:[%s224_s29] sm:$0xf]  ;;  %v247_v5 = vld [vmem:[%s224_s29 + $0x4] sm:$0x1]  ;;  %v708_v8 = vld [vmem:[%s848_s9 + $0x18] sm:$0xff]   ;;  %vm313_vm3 = vcmask 130048  }
  0x22   : > { %619 = vmatpush3.bf16.msra.mxu0 %v703_v1  ;;  %622 = vmatprep.mubr.msk.bf16.mxu0 %vm769_vm1, %v768_v2  ;;  %v590_v7 = vcombine.low %v246_v4, %v247_v5  ;;  %v586_v9 = vcombine.low %v246_v4, %v246_v4  ;;  %v709_v12 = vld [vmem:[%s848_s9 + $0x20] sm:$0xff]   ;;  %v710_v15 = vld [vmem:[%s848_s9 + $0x28] sm:$0xff]   ;;  %p605_p11 = scmp.ne.s32.totalorder %s741_s12, 2 }
  0x23   : > { %620 = vmatprep.subr.bf16.mxu0 %v768_v2  ;;  %630 = vmatprep.mubr.msk.bf16.mxu1 %vm769_vm1, %v768_v2  ;;  %v251_v17 = vld [vmem:[#allocation2] sm:$0xff]  ;;  %vm466_vm4 = vcmask (!%p605_p11), 125952  }
  0x24   : > { %627 = vmatpush3.bf16.msra.mxu1 %v707_v6  ;;  %v323_v10 = vshrl.u32 %v590_v7, 16  ;;  %v325_v11 = vshll.u32 %v590_v7, 16  ;;  %v393_v16 = vrot.slane %v590_v7, 1  ;;  %v606_v36 = vld [vmem:[%s896_s2] ss:$0 sm:$0xff] (!%p605_p11) }
  0x25   : > { %628 = vmatprep.subr.bf16.mxu1 %v768_v2 }
  0x26   : > { %621 = vmatpush3.bf16.msra.mxu0 %v704_v3  ;;  %v327_v13 = vrot.slane %v325_v11, 1 }
  0x27   : > { %634 = vmatprep.subr.bf16.mxu0 %v768_v2 }
  0x28   : > { %629 = vmatpush3.bf16.msra.mxu1 %v708_v8  ;;  %v328_v14 = vor.u32 %v327_v13, %v323_v10 }
  0x29   : > { %623 = vmatmul.mubr.msk.bf16.vlgmr.msra.gmra.mrb[0].mxu0 %vm268_vm2, %v586_v9 }
  0x2a   : > { %635 = vmatpush3.bf16.msra.mxu0 %v709_v12  ;;  %638 = vmatprep.mubr.msk.bf16.mxu0 %vm769_vm1, %v768_v2 }
  0x2b   : > { %631 = vmatmul.mubr.msk.bf16.vlgmr.msra.gmra.mrb[0].mxu1 %vm268_vm2, %v328_v14  ;;  %636 = vmatprep.subr.bf16.mxu0 %v768_v2 }
  0x2e   : > { %637 = vmatpush3.bf16.msra.mxu0 %v710_v15 }
  0x31   : > { %639 = vmatmul.mubr.msk.bf16.vlgmr.msra.gmra.mrb[4].mxu0 %vm268_vm2, %v393_v16 }
  0xfc   : > { %v306_v18 = vpop.f32.mrb[0].mxu0 }
  0xfd   : > { %v312_v19 = vadd.f32 %v306_v18, %v251_v17  ;;  %v624_v20 = vpop.f32.mrb[1].mxu0 }
  0xfe   : > { %v309_v21 = vpop.f32.mrb[2].mxu0  ;;  %v378_v22 = vpop.f32.mrb[0].mxu1 }
  0xff   : > { %314 = vst.msk [vmem:[#allocation2] sm:$0xff] %vm313_vm3, %v312_v19  ;;  %v625_v23 = vpop.f32.mrb[3].mxu0  ;;  %v632_v24 = vpop.f32.mrb[1].mxu1 }
 0x100   : > { %v381_v25 = vpop.f32.mrb[2].mxu1 }
 0x101   : > { %v633_v26 = vpop.f32.mrb[3].mxu1 }
 0x104   : > { %v443_v27 = vpop.f32.mrb[4].mxu0 }
 0x105   : > { %v640_v28 = vpop.f32.mrb[5].mxu0 }
 0x106   : > { %v316_v29 = vld [vmem:[#allocation2] sm:$0xff]  ;;  %v446_v30 = vpop.f32.mrb[6].mxu0 }
 0x107   : > { %v384_v31 = vadd.f32 %v378_v22, %v316_v29  ;;  %v641_v32 = vpop.f32.mrb[7].mxu0 }
 0x109   : > { %385 = vst.msk [vmem:[#allocation2] sm:$0xff] %vm313_vm3, %v384_v31 }
 0x10d   : > { %454 = sbr.rel (%p605_p11) target bundleno = 290 (0x122), region = 40 }
 0x110   : > { %v386_v33 = vld [vmem:[#allocation2] sm:$0xff] }
 0x111   : > { %v449_v34 = vadd.f32 %v443_v27, %v386_v33 }
 0x113   : > { %450 = vst.msk [vmem:[#allocation2] sm:$0xff] %vm313_vm3, %v449_v34 }
 0x11a   : > { %v455_v35 = vld [vmem:[#allocation2] sm:$0xff] }
 0x11b   : > { %v463_v37 = vadd.f32 %v606_v36, %v455_v35 }
 0x11d   : > { %v464_v38 = vmax.f32 %v463_v37, 0.0 }
 0x11f   : > { %v465_v39 = vpack.c.bf16 %v464_v38, %v464_v38 }
 0x121   : > { %467 = vst.msk [vmem:[%s853_s23] sm:$0xf] %vm466_vm4, %v465_v39 }
 0x122 PF: > { %s13_s18 = sadd.s32 1, %s765_s18   ;;  %s898_s12 = smov %s753_s15 }
 0x123   : > { %p10_p12 = scmp.ge.s32.totalorder %s13_s18, 50   ;;  %s899_s13 = smov %s757_s16 }
 0x124   : > { %s900_s14 = smov %s761_s17  ;;  %s901_s15 = smov %s905_s19 }
 0x125   : > { %s902_s16 = smov %s909_s20  ;;  %s903_s17 = smov %s913_s21 }
 0x126   :  { %12 = sbr.rel (!%p10_p12) target bundleno = 4 (0x4), region = 75 }

// kernel: unet_forward.33
= control target key start
LH: loop header
LB: loop body
LE: loop exit
PB: predicated region body
PF: predicated region fallthrough
CT: control target
= control target key end

     0   :  { %s746_s12 = smov 0   ;;  %s748_s13 = smov 0   ;;  %s842_s0 = inlined_call_operand.vmem [shape: bf16[2,10,10,16], index: 0, kind: input, shape index: {}]   ;;  %s843_s1 = inlined_call_operand.vmem [shape: bf16[3,3,16,16], index: 1, kind: input, shape index: {}]   ;;  %s844_s2 = inlined_call_operand.vmem [shape: f32[1,16], index: 2, kind: input, shape index: {}]   ;;  %s845_s3 = inlined_call_operand.vmem [shape: bf16[2,8,8,16], index: 3, kind: output, shape index: {}]  }
   0x1   :  { %s750_s14 = smov 0   ;;  %s752_s15 = smov 0  }
   0x2   :  { %s754_s16 = smov 0   ;;  %s756_s17 = smov 0  }
   0x3   :  { %s758_s18 = smov 0  }
   0x4 LB: > { %s25_s19 = sadd.s32 1, %s709_s15  ;;  %s28_s20 = sadd.s32 1, %s713_s16  ;;  %s721_s18 = sphi %s758_s18, %s13_s18   ;;  %s717_s17 = sphi %s756_s17, %s851_s17   ;;  %s713_s16 = sphi %s754_s16, %s850_s16   ;;  %s709_s15 = sphi %s752_s15, %s849_s15   ;;  %s705_s14 = sphi %s750_s14, %s848_s14   ;;  %s701_s13 = sphi %s748_s13, %s847_s13   ;;  %s697_s12 = sphi %s746_s12, %s846_s12  }
   0x5   : > { %p26_p0 = scmp.ge.s32.totalorder %s25_s19, 3  ;;  %p554_p1 = scmp.ge.s32.totalorder %s721_s18, 1 }
   0x6   : > { %p178_p2 = scmp.lt.s32.totalorder %s721_s18, 49  ;;  %s32_s21 = sadd.s32 1, %s717_s17 }
   0x7   : > { %s853_s19 = smov (%p26_p0, %s25_s19), 0  ;;  %s855_s20 = smov (!%p26_p0, %s28_s20), %s713_s16 }
   0x8   : > { %p179_p3 = pnand %p554_p1, %p178_p2  ;;  %p30_p4 = scmp.ge.s32.totalorder %s855_s20, 8 }
   0x9   : > { %s215_s22 = sadd.s32 (!%p179_p3), %s697_s12, %s701_s13  ;;  %p216_p6 = scmp.lt.s32.totalorder (!%p179_p3), %s705_s14, 1 }
   0xa   : > { %s857_s20 = smov (%p30_p4, %s855_s20), 0  ;;  %s859_s21 = smov (!%p30_p4, %s32_s21), %s717_s17 }
   0xb   : > { %p34_p5 = scmp.ge.s32.totalorder %s859_s21, 2  ;;  %182 = sbr.rel (%p179_p3) target bundleno = 286 (0x11e), region = 32 }
   0xc   : > { %p218_p7 = scmp.lt.s32.totalorder (!%p179_p3), %s215_s22, 9  ;;  %p226_p8 = scmp.lt.s32.totalorder (!%p179_p3), %s697_s12, 2 }
   0xd   : > { %s861_s21 = smov (%p34_p5, %s859_s21), 0  ;;  %p233_p9 = scmp.lt.s32.totalorder (!%p179_p3), %s701_s13, 7 }
   0xe   : > { %p560_p10 = scmp.ne.s32.totalorder (!%p179_p3), %s697_s12, 0 }
  0x12   : > { %s863_s14 = smov (!%p216_p6, %s705_s14), 1  ;;  %s865_s22 = smov (!%p218_p7, %s215_s22), 9 }
  0x13   : > { %s601_s23 = smul.u32 20, %s863_s14  ;;  %s555_s24 = sshll.u32 %s865_s22, 1  ;;  %vm244_vm0 = vcmask (!%p560_p10), 130048   ;;  %v723_v0 = vmov (!%p560_p10), 0.0  }
  0x14   : > { %s558_s30 = sshll.u32 %s863_s14, 3  ;;  %s867_s13 = smov (!%p233_p9, %s701_s13), 7  ;;  %245 = vst.msk [vmem:[#allocation2] sm:$0xff] (!%p560_p10), %vm244_vm0, %v723_v0 }
  0x15   : > { %s222_s25 = sadd.s32 %s601_s23, %s555_s24  ;;  %s236_s6 = sadd.s32 %s558_s30, %s867_s13 }
  0x16   : > { %s556_s26 = sshll.u32 %s222_s25, 2  ;;  %s559_s10 = sshll.u32 %s236_s6, 2 }
  0x17   : > { %s224_s29 = scalar_lea.vmem %s842_s0, %s556_s26  ;;  %s807_s23 = scalar_lea.vmem %s845_s3, %s559_s10 }
  0x18   : > { %s227_s4 = scalar_select %p226_p8, %s697_s12, 2 }
  0x19   : > { %243 = sbr.rel (%p560_p10) target bundleno = 32 (0x20), region = 36 }
  0x1a   : > { %s602_s5 = smul.u32 24, %s227_s4 }
  0x1c   : > { %s230_s9 = scalar_lea.vmem %s843_s1, %s602_s5 }
  0x20 PF: > { %v662_v1 = vld [vmem:[%s230_s9] sm:$0xff]   ;;  %v724_v2 = vmov 0.0   ;;  %vm725_vm1 = vmmov 0   ;;  %vm260_vm2 = vcmask 130048   ;;  %v665_v7 = vld [vmem:[%s230_s9 + $0x8] sm:$0xff]   ;;  %v666_v8 = vld [vmem:[%s230_s9 + $0x10] sm:$0xff]  }
  0x21   : > { %583 = vmatprep.subr.bf16.mxu0 %v724_v2  ;;  %v246_v3 = vld [vmem:[%s224_s29] sm:$0xf]  ;;  %v247_v4 = vld [vmem:[%s224_s29 + $0x4] sm:$0x1]  ;;  %589 = vmatprep.subr.bf16.mxu1 %v724_v2  ;;  %p573_p11 = scmp.ne.s32.totalorder %s697_s12, 2 }
  0x22   : > { %584 = vmatpush3.bf16.msra.mxu0 %v662_v1  ;;  %585 = vmatprep.mubr.msk.bf16.mxu0 %vm725_vm1, %v724_v2  ;;  %v561_v5 = vcombine.low %v246_v3, %v246_v3  ;;  %v564_v6 = vcombine.low %v246_v3, %v247_v4  ;;  %v251_v14 = vld [vmem:[#allocation2] sm:$0xff]  ;;  %vm441_vm3 = vcmask (!%p573_p11), 125952  }
  0x23   : > { %591 = vmatprep.mubr.msk.bf16.mxu1 %vm725_vm1, %v724_v2  ;;  %595 = vmatprep.subr.bf16.mxu0 %v724_v2  ;;  %v574_v33 = vld [vmem:[%s844_s2] ss:$0 sm:$0xff] (!%p573_p11) }
  0x24   : > { %590 = vmatpush3.bf16.msra.mxu1 %v665_v7  ;;  %v312_v9 = vshrl.u32 %v564_v6, 16  ;;  %v314_v10 = vshll.u32 %v564_v6, 16  ;;  %v374_v13 = vrot.slane %v564_v6, 1 }
  0x25   : > { %586 = vmatmul.mubr.msk.bf16.vlgmr.msra.gmra.mrb[0].mxu0 %vm260_vm2, %v561_v5 }
  0x26   : > { %v316_v11 = vrot.slane %v314_v10, 1  ;;  %596 = vmatpush3.bf16.msra.mxu0 %v666_v8  ;;  %597 = vmatprep.mubr.msk.bf16.mxu0 %vm725_vm1, %v724_v2 }
  0x28   : > { %v317_v12 = vor.u32 %v316_v11, %v312_v9 }
  0x2a   : > { %592 = vmatmul.mubr.msk.bf16.vlgmr.msra.gmra.mrb[0].mxu1 %vm260_vm2, %v317_v12 }
  0x2d   : > { %598 = vmatmul.mubr.msk.bf16.vlgmr.msra.gmra.mrb[4].mxu0 %vm260_vm2, %v374_v13 }
  0xf8   : > { %v298_v15 = vpop.f32.mrb[0].mxu0 }
  0xf9   : > { %v304_v16 = vadd.f32 %v298_v15, %v251_v14  ;;  %v587_v17 = vpop.f32.mrb[1].mxu0 }
  0xfa   : > { %v301_v18 = vpop.f32.mrb[2].mxu0 }
  0xfb   : > { %305 = vst.msk [vmem:[#allocation2] sm:$0xff] %vm260_vm2, %v304_v16  ;;  %v588_v19 = vpop.f32.mrb[3].mxu0 }
  0xfd   : > { %v361_v20 = vpop.f32.mrb[0].mxu1 }
  0xfe   : > { %v593_v21 = vpop.f32.mrb[1].mxu1 }
  0xff   : > { %v364_v22 = vpop.f32.mrb[2].mxu1 }
 0x100   : > { %v594_v23 = vpop.f32.mrb[3].mxu1  ;;  %v418_v24 = vpop.f32.mrb[4].mxu0 }
 0x101   : > { %v599_v25 = vpop.f32.mrb[5].mxu0 }
 0x102   : > { %v307_v26 = vld [vmem:[#allocation2] sm:$0xff]  ;;  %v421_v27 = vpop.f32.mrb[6].mxu0 }
 0x103   : > { %v367_v28 = vadd.f32 %v361_v20, %v307_v26  ;;  %v600_v29 = vpop.f32.mrb[7].mxu0 }
 0x105   : > { %368 = vst.msk [vmem:[#allocation2] sm:$0xff] %vm260_vm2, %v367_v28 }
 0x109   : > { %429 = sbr.rel (%p573_p11) target bundleno = 286 (0x11e), region = 40 }
 0x10c   : > { %v369_v30 = vld [vmem:[#allocation2] sm:$0xff] }
 0x10d   : > { %v424_v31 = vadd.f32 %v418_v24, %v369_v30 }
 0x10f   : > { %425 = vst.msk [vmem:[#allocation2] sm:$0xff] %vm260_vm2, %v424_v31 }
 0x116   : > { %v430_v32 = vld [vmem:[#allocation2] sm:$0xff] }
 0x117   : > { %v438_v34 = vadd.f32 %v574_v33, %v430_v32 }
 0x119   : > { %v439_v35 = vmax.f32 %v438_v34, 0.0 }
 0x11b   : > { %v440_v36 = vpack.c.bf16 %v439_v35, %v439_v35 }
 0x11d   : > { %442 = vst.msk [vmem:[%s807_s23] sm:$0xf] %vm441_vm3, %v440_v36 }
 0x11e PF: > { %s13_s18 = sadd.s32 1, %s721_s18   ;;  %s846_s12 = smov %s709_s15 }
 0x11f   : > { %p10_p12 = scmp.ge.s32.totalorder %s13_s18, 50   ;;  %s847_s13 = smov %s713_s16 }
 0x120   : > { %s848_s14 = smov %s717_s17  ;;  %s849_s15 = smov %s853_s19 }
 0x121   : > { %s850_s16 = smov %s857_s20  ;;  %s851_s17 = smov %s861_s21 }
 0x122   :  { %12 = sbr.rel (!%p10_p12) target bundleno = 4 (0x4), region = 75 }

// kernel: unet_forward.34
= control target key start
LH: loop header
LB: loop body
LE: loop exit
PB: predicated region body
PF: predicated region fallthrough
CT: control target
= control target key end

     0   :  { %s838_s12 = smov 0   ;;  %s840_s13 = smov 0   ;;  %s949_s0 = inlined_call_operand.vmem [shape: bf16[2,18,18,32], index: 0, kind: input, shape index: {}]   ;;  %s950_s1 = inlined_call_operand.vmem [shape: bf16[3,3,32,8], index: 1, kind: input, shape index: {}]   ;;  %s951_s2 = inlined_call_operand.vmem [shape: f32[1,8], index: 2, kind: input, shape index: {}]   ;;  %s952_s3 = inlined_call_operand.vmem [shape: bf16[2,16,16,8], index: 3, kind: output, shape index: {}]  }
   0x1   :  { %s842_s14 = smov 0   ;;  %s844_s15 = smov 0  }
   0x2   :  { %s846_s16 = smov 0   ;;  %s848_s17 = smov 0  }
   0x3   :  { %s850_s18 = smov 0  }
   0x4 LB: > { %s25_s19 = sadd.s32 1, %s801_s15  ;;  %s28_s20 = sadd.s32 1, %s805_s16  ;;  %s813_s18 = sphi %s850_s18, %s13_s18   ;;  %s809_s17 = sphi %s848_s17, %s960_s17   ;;  %s805_s16 = sphi %s846_s16, %s959_s16   ;;  %s801_s15 = sphi %s844_s15, %s958_s15   ;;  %s797_s14 = sphi %s842_s14, %s957_s14   ;;  %s793_s13 = sphi %s840_s13, %s956_s13   ;;  %s789_s12 = sphi %s838_s12, %s955_s12  }
   0x5   : > { %p26_p0 = scmp.ge.s32.totalorder %s25_s19, 3  ;;  %p622_p1 = scmp.ge.s32.totalorder %s813_s18, 1 }
   0x6   : > { %p178_p2 = scmp.lt.s32.totalorder %s813_s18, 97  ;;  %s32_s21 = sadd.s32 1, %s809_s17 }
   0x7   : > { %s962_s19 = smov (%p26_p0, %s25_s19), 0  ;;  %s964_s20 = smov (!%p26_p0, %s28_s20), %s805_s16 }
   0x8   : > { %p179_p3 = pnand %p622_p1, %p178_p2  ;;  %p30_p4 = scmp.ge.s32.totalorder %s964_s20, 16 }
   0x9   : > { %s216_s22 = sadd.s32 (!%p179_p3), %s789_s12, %s793_s13  ;;  %p217_p6 = scmp.lt.s32.totalorder (!%p179_p3), %s797_s14, 1 }
   0xa   : > { %s966_s20 = smov (%p30_p4, %s964_s20), 0  ;;  %s968_s21 = smov (!%p30_p4, %s32_s21), %s809_s17 }
   0xb   : > { %p34_p5 = scmp.ge.s32.totalorder %s968_s21, 2  ;;  %182 = sbr.rel (%p179_p3) target bundleno = 293 (0x125), region = 32 }
   0xc   : > { %p219_p7 = scmp.lt.s32.totalorder (!%p179_p3), %s216_s22, 17  ;;  %p227_p8 = scmp.lt.s32.totalorder (!%p179_p3), %s789_s12, 2 }
   0xd   : > { %s970_s21 = smov (%p34_p5, %s968_s21), 0  ;;  %p234_p9 = scmp.lt.s32.totalorder (!%p179_p3), %s793_s13, 15 }
   0xe   : > { %953 = sst [smem:[#allocation3_spill]] %s970_s21  ;;  %p628_p10 = scmp.ne.s32.totalorder (!%p179_p3), %s789_s12, 0 }
  0x12   : > { %s972_s14 = smov (!%p217_p6, %s797_s14), 1  ;;  %s974_s22 = smov (!%p219_p7, %s216_s22), 17 }
  0x13   : > { %s690_s23 = smul.u32 54, %s972_s14  ;;  %s626_s8 = sshll.u32 %s972_s14, 5  ;;  %vm246_vm0 = vcmask (!%p628_p10), 64512   ;;  %v815_v0 = vmov (!%p628_p10), 0.0  }
  0x14   : > { %s689_s24 = smul.u32 3, %s974_s22  ;;  %s976_s13 = smov (!%p234_p9, %s793_s13), 15  ;;  %247 = vst.msk [vmem:[#allocation2] sm:$0xff] (!%p628_p10), %vm246_vm0, %v815_v0  ;;  %248 = vst.msk [vmem:[#allocation2 + $0x8] sm:$0xff] (!%p628_p10), %vm246_vm0, %v815_v0 }
  0x15   : > { %s228_s25 = scalar_select %p227_p8, %s789_s12, 2 }
  0x16   : > { %s223_s26 = sadd.s32 %s690_s23, %s689_s24  ;;  %s625_s9 = sshll.u32 %s976_s13, 1 }
  0x17   : > { %s623_s27 = sshll.u32 %s223_s26, 2  ;;  %s691_s28 = smul.u32 48, %s228_s25 }
  0x18   : > { %s225_s4 = scalar_lea.vmem %s949_s0, %s623_s27  ;;  %s238_s10 = sadd.s32 %s626_s8, %s625_s9 }
  0x19   : > { %s895_s7 = scalar_lea.vmem %s950_s1, %s691_s28  ;;  %s627_s11 = sshll.u32 %s238_s10, 2 }
  0x1a   : > { %s901_s23 = scalar_lea.vmem %s952_s3, %s627_s11  ;;  %245 = sbr.rel (%p628_p10) target bundleno = 33 (0x21), region = 36 }
  0x21 PF: > { %v751_v1 = vld [vmem:[%s895_s7] sm:$0xff]   ;;  %v816_v2 = vmov 0.0   ;;  %v752_v3 = vld [vmem:[%s895_s7 + $0x8] sm:$0xff]   ;;  %vm817_vm1 = vmmov 0   ;;  %v754_v5 = vld [vmem:[%s895_s7 + $0x10] sm:$0xff]   ;;  %vm274_vm2 = vcmask 261120  }
  0x22   : > { %665 = vmatprep.subr.bf16.mxu0 %v816_v2  ;;  %673 = vmatprep.subr.bf16.mxu1 %v816_v2  ;;  %v753_v4 = vld [vmem:[%s225_s4] sm:$0xff]   ;;  %v755_v6 = vld [vmem:[%s895_s7 + $0x18] sm:$0xff]   ;;  %v756_v8 = vld [vmem:[%s225_s4 + $0x8] ss:$0 sps:$4 sm:$0x11]   ;;  %vm413_vm4 = vcmask 1046528  }
  0x23   : > { %666 = vmatpush3.bf16.msra.mxu0 %v751_v1  ;;  %669 = vmatprep.mubr.msk.bf16.mxu0 %vm817_vm1, %v816_v2  ;;  %v333_v7 = vshrl.u32 %v753_v4, 16  ;;  %v335_v9 = vshll.u32 %v753_v4, 16  ;;  %v340_v11 = vshll.u32 %v756_v8, 16  ;;  %v757_v12 = vld [vmem:[%s895_s7 + $0x20] sm:$0xff]   ;;  %vm332_vm3 = vsmask.f32 7424 }
  0x24   : > { %667 = vmatprep.subr.bf16.mxu0 %v816_v2  ;;  %677 = vmatprep.mubr.msk.bf16.mxu1 %vm817_vm1, %v816_v2  ;;  %v758_v15 = vld [vmem:[%s895_s7 + $0x28] sm:$0xff]   ;;  %v414_v16 = vrot.slane %v753_v4, 1  ;;  %v415_v17 = vrot.slane %v756_v8, 1  ;;  %v256_v20 = vld [vmem:[#allocation2] sm:$0xff]  ;;  %vm321_vm5 = vcmask 64512   ;;  %p648_p11 = scmp.ne.s32.totalorder %s789_s12, 2 }
  0x25   : > { %674 = vmatpush3.bf16.msra.mxu1 %v754_v5  ;;  %v337_v10 = vrot.slane %v335_v9, 1  ;;  %v342_v14 = vrot.slane %v340_v11, 1  ;;  %v257_v22 = vld [vmem:[#allocation2 + $0x8] sm:$0xff]  ;;  %v649_v45 = vld [vmem:[%s951_s2] ss:$0 sm:$0xff] (!%p648_p11)  ;;  %vm502_vm6 = vcmask (!%p648_p11), 60416  }
  0x26   : > { %675 = vmatprep.subr.bf16.mxu1 %v816_v2  ;;  %v416_v19 = vsel %vm413_vm4, %v414_v16, %v415_v17 }
  0x27   : > { %668 = vmatpush3.bf16.msra.mxu0 %v752_v3  ;;  %v338_v13 = vor.u32 %v337_v10, %v333_v7 }
  0x28   : > { %681 = vmatprep.subr.bf16.mxu0 %v816_v2 }
  0x29   : > { %676 = vmatpush3.bf16.msra.mxu1 %v755_v6  ;;  %v343_v18 = vsel %vm332_vm3, %v338_v13, %v342_v14 }
  0x2a   : > { %670 = vmatmul.mubr.msk.bf16.vlgmr.msra.gmra.mrb[0].mxu0 %vm274_vm2, %v753_v4 }
  0x2b   : > { %682 = vmatpush3.bf16.msra.mxu0 %v757_v12  ;;  %685 = vmatprep.mubr.msk.bf16.mxu0 %vm817_vm1, %v816_v2 }
  0x2c   : > { %683 = vmatprep.subr.bf16.mxu0 %v816_v2  ;;  %678 = vmatmul.mubr.msk.bf16.vlgmr.msra.gmra.mrb[0].mxu1 %vm274_vm2, %v343_v18 }
  0x2f   : > { %684 = vmatpush3.bf16.msra.mxu0 %v758_v15 }
  0x32   : > { %686 = vmatmul.mubr.msk.bf16.vlgmr.msra.gmra.mrb[4].mxu0 %vm274_vm2, %v416_v19 }
  0xfd   : > { %v312_v21 = vpop.f32.mrb[0].mxu0 }
  0xfe   : > { %v319_v23 = vadd.f32 %v312_v21, %v256_v20  ;;  %v671_v24 = vpop.f32.mrb[1].mxu0 }
  0xff   : > { %v315_v25 = vpop.f32.mrb[2].mxu0  ;;  %v393_v28 = vpop.f32.mrb[0].mxu1 }
 0x100   : > { %322 = vst.msk [vmem:[#allocation2] sm:$0xff] %vm321_vm5, %v319_v23  ;;  %v320_v26 = vadd.f32 %v315_v25, %v257_v22  ;;  %v672_v27 = vpop.f32.mrb[3].mxu0  ;;  %v679_v29 = vpop.f32.mrb[1].mxu1 }
 0x101   : > { %v396_v30 = vpop.f32.mrb[2].mxu1 }
 0x102   : > { %323 = vst.msk [vmem:[#allocation2 + $0x8] sm:$0xff] %vm321_vm5, %v320_v26  ;;  %v680_v31 = vpop.f32.mrb[3].mxu1 }
 0x105   : > { %v466_v32 = vpop.f32.mrb[4].mxu0 }
 0x106   : > { %v687_v33 = vpop.f32.mrb[5].mxu0 }
 0x107   : > { %v325_v34 = vld [vmem:[#allocation2] sm:$0xff]  ;;  %v469_v35 = vpop.f32.mrb[6].mxu0 }
 0x108   : > { %v400_v36 = vadd.f32 %v393_v28, %v325_v34  ;;  %v688_v37 = vpop.f32.mrb[7].mxu0 }
 0x109   : > { %v326_v38 = vld [vmem:[#allocation2 + $0x8] sm:$0xff] }
 0x10a   : > { %402 = vst.msk [vmem:[#allocation2] sm:$0xff] %vm321_vm5, %v400_v36  ;;  %v401_v39 = vadd.f32 %v396_v30, %v326_v38 }
 0x10c   : > { %403 = vst.msk [vmem:[#allocation2 + $0x8] sm:$0xff] %vm321_vm5, %v401_v39 }
 0x110   : > { %480 = sbr.rel (%p648_p11) target bundleno = 293 (0x125), region = 40 }
 0x111   : > { %v404_v40 = vld [vmem:[#allocation2] sm:$0xff] }
 0x112   : > { %v473_v41 = vadd.f32 %v466_v32, %v404_v40 }
 0x113   : > { %v405_v42 = vld [vmem:[#allocation2 + $0x8] sm:$0xff] }
 0x114   : > { %475 = vst.msk [vmem:[#allocation2] sm:$0xff] %vm321_vm5, %v473_v41  ;;  %v474_v43 = vadd.f32 %v469_v35, %v405_v42 }
 0x116   : > { %476 = vst.msk [vmem:[#allocation2 + $0x8] sm:$0xff] %vm321_vm5, %v474_v43 }
 0x11b   : > { %v481_v44 = vld [vmem:[#allocation2] sm:$0xff] }
 0x11c   : > { %v490_v47 = vadd.f32 %v649_v45, %v481_v44 }
 0x11d   : > { %v482_v46 = vld [vmem:[#allocation2 + $0x8] sm:$0xff] }
 0x11e   : > { %v491_v48 = vadd.f32 %v649_v45, %v482_v46  ;;  %v492_v49 = vmax.f32 %v490_v47, 0.0 }
 0x120   : > { %v493_v50 = vmax.f32 %v491_v48, 0.0  ;;  %v654_v51 = vpack.c.bf16 %v492_v49, %v492_v49 }
 0x122   : > { %v655_v52 = vpack.c.bf16 %v493_v50, %v493_v50  ;;  %503 = vst.msk [vmem:[%s901_s23] sm:$0xf] %vm502_vm6, %v654_v51 }
 0x124   : > { %504 = vst.msk [vmem:[%s901_s23 + $0x4] sm:$0xf] %vm502_vm6, %v655_v52 }
 0x125 PF: > { %s13_s18 = sadd.s32 1, %s813_s18   ;;  %s954_s21 = sld [smem:[#allocation3_spill]] }
 0x126   : > { %p10_p12 = scmp.ge.s32.totalorder %s13_s18, 98   ;;  %s955_s12 = smov %s801_s15 }
 0x127   : > { %s956_s13 = smov %s805_s16  ;;  %s957_s14 = smov %s809_s17 }
 0x128   : > { %s958_s15 = smov %s962_s19  ;;  %s959_s16 = smov %s966_s20 }
 0x129   :  { %12 = sbr.rel (!%p10_p12) target bundleno = 4 (0x4), region = 75 }
 0x12b   : > { %s960_s17 = smov %s954_s21 }

// kernel: unet_forward.35
= control target key start
LH: loop header
LB: loop body
LE: loop exit
PB: predicated region body
PF: predicated region fallthrough
CT: control target
= control target key end

     0   :  { %s775_s12 = smov 0   ;;  %s777_s13 = smov 0   ;;  %s886_s0 = inlined_call_operand.vmem [shape: bf16[2,18,18,8], index: 0, kind: input, shape index: {}]   ;;  %s887_s1 = inlined_call_operand.vmem [shape: bf16[3,3,8,8], index: 1, kind: input, shape index: {}]   ;;  %s888_s2 = inlined_call_operand.vmem [shape: f32[1,8], index: 2, kind: input, shape index: {}]   ;;  %s889_s3 = inlined_call_operand.vmem [shape: bf16[2,16,16,8], index: 3, kind: output, shape index: {}]  }
   0x1   :  { %s779_s14 = smov 0   ;;  %s781_s15 = smov 0  }
   0x2   :  { %s783_s16 = smov 0   ;;  %s785_s17 = smov 0  }
   0x3   :  { %s787_s18 = smov 0  }
   0x4 LB: > { %s25_s19 = sadd.s32 1, %s738_s15  ;;  %s28_s20 = sadd.s32 1, %s742_s16  ;;  %s750_s18 = sphi %s787_s18, %s13_s18   ;;  %s746_s17 = sphi %s785_s17, %s897_s17   ;;  %s742_s16 = sphi %s783_s16, %s896_s16   ;;  %s738_s15 = sphi %s781_s15, %s895_s15   ;;  %s734_s14 = sphi %s779_s14, %s894_s14   ;;  %s730_s13 = sphi %s777_s13, %s893_s13   ;;  %s726_s12 = sphi %s775_s12, %s892_s12  }
   0x5   : > { %p26_p0 = scmp.ge.s32.totalorder %s25_s19, 3  ;;  %p586_p1 = scmp.ge.s32.totalorder %s750_s18, 1 }
   0x6   : > { %p178_p2 = scmp.lt.s32.totalorder %s750_s18, 97  ;;  %s32_s21 = sadd.s32 1, %s746_s17 }
   0x7   : > { %s899_s19 = smov (%p26_p0, %s25_s19), 0  ;;  %s901_s20 = smov (!%p26_p0, %s28_s20), %s742_s16 }
   0x8   : > { %p179_p3 = pnand %p586_p1, %p178_p2  ;;  %p30_p4 = scmp.ge.s32.totalorder %s901_s20, 16 }
   0x9   : > { %s216_s22 = sadd.s32 (!%p179_p3), %s726_s12, %s730_s13  ;;  %p217_p6 = scmp.lt.s32.totalorder (!%p179_p3), %s734_s14, 1 }
   0xa   : > { %s903_s20 = smov (%p30_p4, %s901_s20), 0  ;;  %s905_s21 = smov (!%p30_p4, %s32_s21), %s746_s17 }
   0xb   : > { %p34_p5 = scmp.ge.s32.totalorder %s905_s21, 2  ;;  %182 = sbr.rel (%p179_p3) target bundleno = 289 (0x121), region = 32 }
   0xc   : > { %p219_p7 = scmp.lt.s32.totalorder (!%p179_p3), %s216_s22, 17  ;;  %p227_p8 = scmp.lt.s32.totalorder (!%p179_p3), %s726_s12, 2 }
   0xd   : > { %s907_s21 = smov (%p34_p5, %s905_s21), 0  ;;  %p234_p9 = scmp.lt.s32.totalorder (!%p179_p3), %s730_s13, 15 }
   0xe   : > { %890 = sst [smem:[#allocation3_spill]] %s907_s21  ;;  %p592_p10 = scmp.ne.s32.totalorder (!%p179_p3), %s726_s12, 0 }
  0x12   : > { %s909_s14 = smov (!%p217_p6, %s734_s14), 1  ;;  %s911_s22 = smov (!%p219_p7, %s216_s22), 17 }
  0x13   : > { %s633_s23 = smul.u32 54, %s909_s14  ;;  %s590_s8 = sshll.u32 %s909_s14, 5  ;;  %vm246_vm0 = vcmask (!%p592_p10), 64512   ;;  %v752_v0 = vmov (!%p592_p10), 0.0  }
  0x14   : > { %s632_s24 = smul.u32 3, %s911_s22  ;;  %s913_s13 = smov (!%p234_p9, %s730_s13), 15  ;;  %247 = vst.msk [vmem:[#allocation2] sm:$0xff] (!%p592_p10), %vm246_vm0, %v752_v0  ;;  %248 = vst.msk [vmem:[#allocation2 + $0x8] sm:$0xff] (!%p592_p10), %vm246_vm0, %v752_v0 }
  0x15   : > { %s228_s25 = scalar_select %p227_p8, %s726_s12, 2 }
  0x16   : > { %s223_s26 = sadd.s32 %s633_s23, %s632_s24  ;;  %s589_s9 = sshll.u32 %s913_s13, 1 }
  0x17   : > { %s587_s27 = sshll.u32 %s223_s26, 2  ;;  %s634_s28 = smul.u32 12, %s228_s25 }
  0x18   : > { %s225_s4 = scalar_lea.vmem %s886_s0, %s587_s27  ;;  %s238_s10 = sadd.s32 %s590_s8, %s589_s9 }
  0x19   : > { %s832_s7 = scalar_lea.vmem %s887_s1, %s634_s28  ;;  %s591_s11 = sshll.u32 %s238_s10, 2 }
  0x1a   : > { %s838_s23 = scalar_lea.vmem %s889_s3, %s591_s11  ;;  %245 = sbr.rel (%p592_p10) target bundleno = 33 (0x21), region = 36 }
  0x21 PF: > { %v258_v1 = vld [vmem:[%s832_s7] sm:$0xf]  ;;  %vm263_vm1 = vcmask 1043456   ;;  %v753_v3 = vmov 0.0   ;;  %vm754_vm2 = vmmov 0   ;;  %vm259_vm3 = vcmask 64512  }
  0x22   : > { %v694_v2 = vld [vmem:[%s225_s4] sm:$0xff]   ;;  %614 = vmatprep.subr.bf16.mxu0 %v753_v3  ;;  %v265_v4 = vsel %vm263_vm1, %v258_v1, 0  ;;  %616 = vmatprep.mubr.msk.bf16.mxu0 %vm754_vm2, %v753_v3  ;;  %v695_v7 = vld [vmem:[%s225_s4 + $0x8] ss:$0 sps:$4 sm:$0x11]   ;;  %vm386_vm5 = vcmask 1046528  }
  0x23   : > { %615 = vmatpush3.bf16.msra.mxu0 %v265_v4  ;;  %620 = vmatprep.subr.bf16.mxu1 %v753_v3  ;;  %v596_v5 = vld [vmem:[%s832_s7 + $0x4] sm:$0xf]  ;;  %v318_v8 = vshrl.u32 %v694_v2, 16  ;;  %v320_v9 = vshll.u32 %v694_v2, 16  ;;  %v598_v10 = vld [vmem:[%s832_s7 + $0x8] sm:$0xf] }
  0x24   : > { %v333_v6 = vsel %vm263_vm1, %v596_v5, 0  ;;  %622 = vmatprep.mubr.msk.bf16.mxu1 %vm754_vm2, %v753_v3  ;;  %626 = vmatprep.subr.bf16.mxu0 %v753_v3  ;;  %v325_v12 = vshll.u32 %v695_v7, 16  ;;  %v394_v13 = vsel %vm263_vm1, %v598_v10, 0  ;;  %vm317_vm4 = vsmask.f32 7424  ;;  %v256_v20 = vld [vmem:[#allocation2] sm:$0xff] }
  0x25   : > { %621 = vmatpush3.bf16.msra.mxu1 %v333_v6  ;;  %v322_v11 = vrot.slane %v320_v9, 1  ;;  %v387_v14 = vrot.slane %v694_v2, 1  ;;  %v388_v15 = vrot.slane %v695_v7, 1  ;;  %v257_v22 = vld [vmem:[#allocation2 + $0x8] sm:$0xff]  ;;  %p600_p11 = scmp.ne.s32.totalorder %s726_s12, 2 }
  0x26   : > { %617 = vmatmul.mubr.msk.bf16.vlgmr.msra.gmra.mrb[0].mxu0 %vm259_vm3, %v694_v2  ;;  %v327_v17 = vrot.slane %v325_v12, 1  ;;  %v601_v45 = vld [vmem:[%s888_s2] ss:$0 sm:$0xff] (!%p600_p11)  ;;  %vm466_vm6 = vcmask (!%p600_p11), 60416  }
  0x27   : > { %627 = vmatpush3.bf16.msra.mxu0 %v394_v13  ;;  %628 = vmatprep.mubr.msk.bf16.mxu0 %vm754_vm2, %v753_v3  ;;  %v323_v16 = vor.u32 %v322_v11, %v318_v8  ;;  %v389_v19 = vsel %vm386_vm5, %v387_v14, %v388_v15 }
  0x29   : > { %v328_v18 = vsel %vm317_vm4, %v323_v16, %v327_v17 }
  0x2a   : > { %623 = vmatmul.mubr.msk.bf16.vlgmr.msra.gmra.mrb[0].mxu1 %vm259_vm3, %v328_v18 }
  0x2e   : > { %629 = vmatmul.mubr.msk.bf16.vlgmr.msra.gmra.mrb[4].mxu0 %vm259_vm3, %v389_v19 }
  0xf9   : > { %v301_v21 = vpop.f32.mrb[0].mxu0 }
  0xfa   : > { %v308_v23 = vadd.f32 %v301_v21, %v256_v20  ;;  %v618_v24 = vpop.f32.mrb[1].mxu0 }
  0xfb   : > { %v304_v25 = vpop.f32.mrb[2].mxu0 }
  0xfc   : > { %310 = vst.msk [vmem:[#allocation2] sm:$0xff] %vm259_vm3, %v308_v23  ;;  %v309_v26 = vadd.f32 %v304_v25, %v257_v22  ;;  %v619_v27 = vpop.f32.mrb[3].mxu0 }
  0xfd   : > { %v369_v28 = vpop.f32.mrb[0].mxu1 }
  0xfe   : > { %311 = vst.msk [vmem:[#allocation2 + $0x8] sm:$0xff] %vm259_vm3, %v309_v26  ;;  %v624_v29 = vpop.f32.mrb[1].mxu1 }
  0xff   : > { %v372_v30 = vpop.f32.mrb[2].mxu1 }
 0x100   : > { %v625_v31 = vpop.f32.mrb[3].mxu1 }
 0x101   : > { %v430_v32 = vpop.f32.mrb[4].mxu0 }
 0x102   : > { %v630_v33 = vpop.f32.mrb[5].mxu0 }
 0x103   : > { %v313_v34 = vld [vmem:[#allocation2] sm:$0xff]  ;;  %v433_v35 = vpop.f32.mrb[6].mxu0 }
 0x104   : > { %v376_v36 = vadd.f32 %v369_v28, %v313_v34  ;;  %v631_v37 = vpop.f32.mrb[7].mxu0 }
 0x105   : > { %v314_v38 = vld [vmem:[#allocation2 + $0x8] sm:$0xff] }
 0x106   : > { %378 = vst.msk [vmem:[#allocation2] sm:$0xff] %vm259_vm3, %v376_v36  ;;  %v377_v39 = vadd.f32 %v372_v30, %v314_v38 }
 0x108   : > { %379 = vst.msk [vmem:[#allocation2 + $0x8] sm:$0xff] %vm259_vm3, %v377_v39 }
 0x10c   : > { %444 = sbr.rel (%p600_p11) target bundleno = 289 (0x121), region = 40 }
 0x10d   : > { %v380_v40 = vld [vmem:[#allocation2] sm:$0xff] }
 0x10e   : > { %v437_v41 = vadd.f32 %v430_v32, %v380_v40 }
 0x10f   : > { %v381_v42 = vld [vmem:[#allocation2 + $0x8] sm:$0xff] }
 0x110   : > { %439 = vst.msk [vmem:[#allocation2] sm:$0xff] %vm259_vm3, %v437_v41  ;;  %v438_v43 = vadd.f32 %v433_v35, %v381_v42 }
 0x112   : > { %440 = vst.msk [vmem:[#allocation2 + $0x8] sm:$0xff] %vm259_vm3, %v438_v43 }
 0x117   : > { %v445_v44 = vld [vmem:[#allocation2] sm:$0xff] }
 0x118   : > { %v454_v47 = vadd.f32 %v601_v45, %v445_v44 }
 0x119   : > { %v446_v46 = vld [vmem:[#allocation2 + $0x8] sm:$0xff] }
 0x11a   : > { %v455_v48 = vadd.f32 %v601_v45, %v446_v46  ;;  %v456_v49 = vmax.f32 %v454_v47, 0.0 }
 0x11c   : > { %v457_v50 = vmax.f32 %v455_v48, 0.0  ;;  %v606_v51 = vpack.c.bf16 %v456_v49, %v456_v49 }
 0x11e   : > { %v607_v52 = vpack.c.bf16 %v457_v50, %v457_v50  ;;  %467 = vst.msk [vmem:[%s838_s23] sm:$0xf] %vm466_vm6, %v606_v51 }
 0x120   : > { %468 = vst.msk [vmem:[%s838_s23 + $0x4] sm:$0xf] %vm466_vm6, %v607_v52 }
 0x121 PF: > { %s13_s18 = sadd.s32 1, %s750_s18   ;;  %s891_s21 = sld [smem:[#allocation3_spill]] }
 0x122   : > { %p10_p12 = scmp.ge.s32.totalorder %s13_s18, 98   ;;  %s892_s12 = smov %s738_s15 }
 0x123   : > { %s893_s13 = smov %s742_s16  ;;  %s894_s14 = smov %s746_s17 }
 0x124   : > { %s895_s15 = smov %s899_s19  ;;  %s896_s16 = smov %s903_s20 }
 0x125   :  { %12 = sbr.rel (!%p10_p12) target bundleno = 4 (0x4), region = 75 }
 0x127   : > { %s897_s17 = smov %s891_s21 }

// kernel: unet_forward.36
= control target key start
LH: loop header
LB: loop body
LE: loop exit
PB: predicated region body
PF: predicated region fallthrough
CT: control target
= control target key end

     0   :  { %s592_s12 = smov 0   ;;  %s594_s13 = smov 0   ;;  %s654_s0 = inlined_call_operand.vmem [shape: bf16[2,16,16,16], index: 0, kind: input, shape index: {}]   ;;  %s655_s1 = inlined_call_operand.vmem [shape: bf16[1,1,16,16], index: 1, kind: input, shape index: {}]   ;;  %s656_s2 = inlined_call_operand.vmem [shape: f32[1,16], index: 2, kind: input, shape index: {}]   ;;  %s657_s3 = inlined_call_operand.vmem [shape: bf16[2,16,16,16], index: 3, kind: output, shape index: {}]  }
   0x1   :  { %s596_s14 = smov 0   ;;  %s598_s15 = smov 0  }
   0x2   :  { %s600_s16 = smov 0  }
   0x3 LB: > { %s28_s17 = sadd.s32 1, %s560_s14  ;;  %s32_s18 = sadd.s32 1, %s564_s15  ;;  %s568_s16 = sphi %s600_s16, %s13_s16   ;;  %s564_s15 = sphi %s598_s15, %s661_s15   ;;  %s560_s14 = sphi %s596_s14, %s660_s14   ;;  %s556_s13 = sphi %s594_s13, %s659_s13   ;;  %s552_s12 = sphi %s592_s12, %s658_s12  }
   0x4   : > { %p30_p0 = scmp.ge.s32.totalorder %s28_s17, 16  ;;  %p461_p1 = scmp.ge.s32.totalorder %s568_s16, 1 }
   0x5   : > { %p178_p2 = scmp.lt.s32.totalorder %s568_s16, 33 }
   0x6   : > { %s663_s17 = smov (%p30_p0, %s28_s17), 0  ;;  %s665_s18 = smov (!%p30_p0, %s32_s18), %s564_s15 }
   0x7   : > { %p179_p3 = pnand %p461_p1, %p178_p2  ;;  %p34_p4 = scmp.ge.s32.totalorder %s665_s18, 2 }
   0x8   : > { %v528_v0 = vld [vmem:[%s655_s1] sm:$0xff] (!%p179_p3)   ;;  %v570_v1 = vmov (!%p179_p3), 0.0   ;;  %p217_p5 = scmp.lt.s32.totalorder (!%p179_p3), %s556_s13, 1  ;;  %p219_p6 = scmp.lt.s32.totalorder (!%p179_p3), %s552_s12, 15  ;;  %vm246_vm0 = vcmask (!%p179_p3), 130048   ;;  %vm571_vm1 = vmmov (!%p179_p3), 0  }
   0x9   : > { %s667_s18 = smov (%p34_p4, %s665_s18), 0  ;;  %182 = sbr.rel (%p179_p3) target bundleno = 253 (0xfd), region = 32 }
   0xa   : > { %480 = vmatprep.subr.bf16.mxu0 (!%p179_p3), %v570_v1  ;;  %482 = vmatprep.mubr.msk.bf16.mxu0 (!%p179_p3), %vm571_vm1, %v570_v1  ;;  %247 = vst.msk [vmem:[#allocation2] sm:$0xff] (!%p179_p3), %vm246_vm0, %v570_v1  ;;  %248 = vst.msk [vmem:[#allocation2 + $0x8] sm:$0xff] (!%p179_p3), %vm246_vm0, %v570_v1  ;;  %v471_v11 = vld [vmem:[%s656_s2] ss:$0 sm:$0xff] (!%p179_p3)  ;;  %vm339_vm2 = vcmask (!%p179_p3), 125952  }
   0xb   : > { %481 = vmatpush3.bf16.msra.mxu0 (!%p179_p3), %v528_v0 }
  0x10   : > { %s669_s13 = smov (!%p217_p5, %s556_s13), 1  ;;  %s671_s12 = smov (!%p219_p6, %s552_s12), 15 }
  0x11   : > { %s463_s21 = sshll.u32 %s669_s13, 5  ;;  %s462_s22 = sshll.u32 %s671_s12, 1  ;;  %v251_v3 = vld [vmem:[#allocation2] sm:$0xff]  ;;  %v252_v5 = vld [vmem:[#allocation2 + $0x8] sm:$0xff] }
  0x12   : > { %s223_s23 = sadd.s32 %s463_s21, %s462_s22 }
  0x13   : > { %s464_s24 = sshll.u32 %s223_s23, 2 }
  0x14   : > { %s225_s27 = scalar_lea.vmem %s654_s0, %s464_s24  ;;  %s240_s5 = scalar_lea.vmem %s657_s3, %s464_s24 }
  0x15   : > { %v529_v2 = vld [vmem:[%s225_s27] sm:$0xff]  }
  0x16   : > { %483 = vmatmul.mubr.msk.bf16.vlgmr.msra.gmra.mrb[0].mxu0 %vm246_vm0, %v529_v2 }
  0xe9   : > { %v304_v4 = vpop.f32.mrb[0].mxu0 }
  0xea   : > { %v311_v6 = vadd.f32 %v304_v4, %v251_v3  ;;  %v484_v7 = vpop.f32.mrb[1].mxu0 }
  0xeb   : > { %v307_v8 = vpop.f32.mrb[2].mxu0 }
  0xec   : > { %313 = vst.msk [vmem:[#allocation2] sm:$0xff] %vm246_vm0, %v311_v6  ;;  %v312_v9 = vadd.f32 %v307_v8, %v252_v5  ;;  %v485_v10 = vpop.f32.mrb[3].mxu0 }
  0xee   : > { %314 = vst.msk [vmem:[#allocation2 + $0x8] sm:$0xff] %vm246_vm0, %v312_v9 }
  0xf3   : > { %v318_v12 = vld [vmem:[#allocation2] sm:$0xff] }
  0xf4   : > { %v327_v13 = vadd.f32 %v471_v11, %v318_v12 }
  0xf5   : > { %v319_v14 = vld [vmem:[#allocation2 + $0x8] sm:$0xff] }
  0xf6   : > { %v329_v15 = vmax.f32 %v327_v13, 0.0  ;;  %v328_v16 = vadd.f32 %v471_v11, %v319_v14 }
  0xf8   : > { %v476_v17 = vpack.c.bf16 %v329_v15, %v329_v15  ;;  %v330_v18 = vmax.f32 %v328_v16, 0.0 }
  0xfa   : > { %340 = vst.msk [vmem:[%s240_s5] sm:$0xf] %vm339_vm2, %v476_v17  ;;  %v477_v19 = vpack.c.bf16 %v330_v18, %v330_v18 }
  0xfc   : > { %341 = vst.msk [vmem:[%s240_s5 + $0x4] sm:$0xf] %vm339_vm2, %v477_v19 }
  0xfd PF: > { %s13_s16 = sadd.s32 1, %s568_s16   ;;  %s658_s12 = smov %s560_s14 }
  0xfe   : > { %p10_p7 = scmp.ge.s32.totalorder %s13_s16, 34   ;;  %s659_s13 = smov %s564_s15 }
  0xff   : > { %s660_s14 = smov %s663_s17  ;;  %s661_s15 = smov %s667_s18 }
 0x100   :  { %12 = sbr.rel (!%p10_p7) target bundleno = 3 (0x3), region = 73 }

// kernel: unet_forward.37
= control target key start
LH: loop header
LB: loop body
LE: loop exit
PB: predicated region body
PF: predicated region fallthrough
CT: control target
= control target key end

     0   :  { %s578_s12 = smov 0   ;;  %s580_s13 = smov 0   ;;  %s641_s0 = inlined_call_operand.vmem [shape: bf16[2,16,16,16], index: 0, kind: input, shape index: {}]   ;;  %s642_s1 = inlined_call_operand.vmem [shape: bf16[1,1,16,3], index: 1, kind: input, shape index: {}]   ;;  %s643_s2 = inlined_call_operand.vmem [shape: f32[1,3], index: 2, kind: input, shape index: {}]   ;;  %s644_s3 = inlined_call_operand.vmem [shape: f32[2,16,16,3], index: 3, kind: output, shape index: {}]  }
   0x1   :  { %s582_s14 = smov 0   ;;  %s584_s15 = smov 0  }
   0x2   :  { %s586_s16 = smov 0  }
   0x3 LB: > { %s28_s17 = sadd.s32 1, %s546_s14  ;;  %s32_s18 = sadd.s32 1, %s550_s15  ;;  %s554_s16 = sphi %s586_s16, %s13_s16   ;;  %s550_s15 = sphi %s584_s15, %s648_s15   ;;  %s546_s14 = sphi %s582_s14, %s647_s14   ;;  %s542_s13 = sphi %s580_s13, %s646_s13   ;;  %s538_s12 = sphi %s578_s12, %s645_s12  }
   0x4   : > { %p30_p0 = scmp.ge.s32.totalorder %s28_s17, 16  ;;  %p451_p1 = scmp.ge.s32.totalorder %s554_s16, 1 }
   0x5   : > { %p178_p2 = scmp.lt.s32.totalorder %s554_s16, 33 }
   0x6   : > { %s650_s17 = smov (%p30_p0, %s28_s17), 0  ;;  %s652_s18 = smov (!%p30_p0, %s32_s18), %s550_s15 }
   0x7   : > { %p179_p3 = pnand %p451_p1, %p178_p2  ;;  %p34_p4 = scmp.ge.s32.totalorder %s652_s18, 2 }
   0x8   : > { %vm246_vm0 = vcmask (!%p179_p3), 23552   ;;  %v556_v0 = vmov (!%p179_p3), 0.0   ;;  %v514_v1 = vld [vmem:[%s642_s1] sm:$0xff] (!%p179_p3)   ;;  %p217_p5 = scmp.lt.s32.totalorder (!%p179_p3), %s542_s13, 1  ;;  %p219_p6 = scmp.lt.s32.totalorder (!%p179_p3), %s538_s12, 15  ;;  %vm557_vm1 = vmmov (!%p179_p3), 0  }
   0x9   : > { %s654_s18 = smov (%p34_p4, %s652_s18), 0  ;;  %182 = sbr.rel (%p179_p3) target bundleno = 249 (0xf9), region = 32 }
   0xa   : > { %247 = vst.msk [vmem:[#allocation2] sm:$0xff] (!%p179_p3), %vm246_vm0, %v556_v0  ;;  %248 = vst.msk [vmem:[#allocation2 + $0x8] sm:$0xff] (!%p179_p3), %vm246_vm0, %v556_v0  ;;  %466 = vmatprep.subr.bf16.mxu0 (!%p179_p3), %v556_v0  ;;  %468 = vmatprep.mubr.msk.bf16.mxu0 (!%p179_p3), %vm557_vm1, %v556_v0  ;;  %vm266_vm2 = vcmask (!%p179_p3), 130048   ;;  %v461_v11 = vld [vmem:[%s643_s2] ss:$0 sm:$0xff] (!%p179_p3) }
   0xb   : > { %467 = vmatpush3.bf16.msra.mxu0 (!%p179_p3), %v514_v1 }
  0x10   : > { %s656_s13 = smov (!%p217_p5, %s542_s13), 1  ;;  %s658_s12 = smov (!%p219_p6, %s538_s12), 15 }
  0x11   : > { %s453_s21 = sshll.u32 %s656_s13, 5  ;;  %s452_s22 = sshll.u32 %s658_s12, 1  ;;  %v251_v3 = vld [vmem:[#allocation2] sm:$0xff]  ;;  %v252_v5 = vld [vmem:[#allocation2 + $0x8] sm:$0xff] }
  0x12   : > { %s223_s23 = sadd.s32 %s453_s21, %s452_s22 }
  0x13   : > { %s454_s24 = sshll.u32 %s223_s23, 2  ;;  %s457_s28 = sshll.u32 %s223_s23, 3 }
  0x14   : > { %s225_s27 = scalar_lea.vmem %s641_s0, %s454_s24  ;;  %s240_s6 = scalar_lea.vmem %s644_s3, %s457_s28 }
  0x15   : > { %v515_v2 = vld [vmem:[%s225_s27] sm:$0xff]  }
  0x16   : > { %469 = vmatmul.mubr.msk.bf16.vlgmr.msra.gmra.mrb[0].mxu0 %vm266_vm2, %v515_v2 }
  0xe9   : > { %v304_v4 = vpop.f32.mrb[0].mxu0 }
  0xea   : > { %v311_v6 = vadd.f32 %v304_v4, %v251_v3  ;;  %v470_v7 = vpop.f32.mrb[1].mxu0 }
  0xeb   : > { %v307_v8 = vpop.f32.mrb[2].mxu0 }
  0xec   : > { %314 = vst.msk [vmem:[#allocation2] sm:$0xff] %vm246_vm0, %v311_v6  ;;  %v312_v9 = vadd.f32 %v307_v8, %v252_v5  ;;  %v471_v10 = vpop.f32.mrb[3].mxu0 }
  0xee   : > { %315 = vst.msk [vmem:[#allocation2 + $0x8] sm:$0xff] %vm246_vm0, %v312_v9 }
  0xf3   : > { %v319_v12 = vld [vmem:[#allocation2] sm:$0xff] }
  0xf4   : > { %v328_v13 = vadd.f32 %v461_v11, %v319_v12 }
  0xf5   : > { %v320_v14 = vld [vmem:[#allocation2 + $0x8] sm:$0xff] }
  0xf6   : > { %330 = vst.msk [vmem:[%s240_s6] sm:$0xff] %vm246_vm0, %v328_v13  ;;  %v329_v15 = vadd.f32 %v461_v11, %v320_v14 }
  0xf8   : > { %331 = vst.msk [vmem:[%s240_s6 + $0x8] sm:$0xff] %vm246_vm0, %v329_v15 }
  0xf9 PF: > { %s13_s16 = sadd.s32 1, %s554_s16   ;;  %s645_s12 = smov %s546_s14 }
  0xfa   : > { %p10_p7 = scmp.ge.s32.totalorder %s13_s16, 34   ;;  %s646_s13 = smov %s550_s15 }
  0xfb   : > { %s647_s14 = smov %s650_s17  ;;  %s648_s15 = smov %s654_s18 }
  0xfc   :  { %12 = sbr.rel (!%p10_p7) target bundleno = 3 (0x3), region = 73 }

</bundles_post_ra>
